<compile_context>
chip_gen: v7x
topology: tpu7x:2x2x1
jax: 0.10.0
libtpu: 0.0.40
codegen_flags: <defaults>
</compile_context>

<pallas_src>
import functools

import jax
import jax.numpy as jnp
from jax.experimental import pallas as pl
from jax.experimental.pallas import tpu as pltpu


def inverse_sigmoid(x):
    return jnp.log(x / (1.0 - x))


def light_sg_kernel(theta_ref, a_ref, b_ref, c_ref, ra_ref, rb_ref, rc_ref,
                    lgt_ref, rot_ref):
    """One row-tile of rays.

    theta_ref : (TR, 1)      per-ray Y-rotation angle
    a/b/c     : (1, 7*N_l)   per-SG coefficient rows  (lgtSG = c*A + s*B + C)
    ra/rb/rc  : (1, 9)       rotation-matrix coefficient rows
    lgt_ref   : (TR, 7*N_l)  lane-dense lgtSG slab (row-major [sg][component])
    rot_ref   : (TR, 9)      flattened row-major rotation matrices
    """
    th = theta_ref[...]                       # (TR, 1)
    cos_t = jnp.cos(th)                       # EUP
    sin_t = jnp.sin(th)
    lgt_ref[...] = cos_t * a_ref[...] + sin_t * b_ref[...] + c_ref[...]
    rot_ref[...] = cos_t * ra_ref[...] + sin_t * rb_ref[...] + rc_ref[...]


def _pack_coeffs(lobe, lbd, mu):
    """Fold rotation structure + normalize + log-sigmoid + abs into per-SG rows.

    Rotated lobe for R_Y(theta):  x' = c*lx + s*lz ; y' = ly ; z' = -s*lx + c*lz,
    and ||R_Y lobe|| == ||lobe||, so F.normalize can use the pre-rotation norm.
    """
    n_l = lobe.shape[0]
    inv = 1.0 / jnp.maximum(
        jnp.sqrt(jnp.sum(lobe * lobe, axis=-1, keepdims=True)), 1e-12)
    ln = lobe * inv                                     # normalized lobes (N_l, 3)
    lbd_s = jnp.log(jax.nn.sigmoid(lbd)) * -74.4891     # (N_l, 1)
    mu_a = jnp.abs(mu)                                  # (N_l, 3)
    z1 = jnp.zeros((n_l, 1), jnp.float32)
    z4 = jnp.zeros((n_l, 4), jnp.float32)
    a = jnp.concatenate([ln[:, 0:1], z1, ln[:, 2:3], z4], axis=-1)     # (N_l, 7)
    b = jnp.concatenate([ln[:, 2:3], z1, -ln[:, 0:1], z4], axis=-1)    # (N_l, 7)
    c = jnp.concatenate([z1, ln[:, 1:2], z1, lbd_s, mu_a], axis=-1)    # (N_l, 7)
    w = 7 * n_l
    return a.reshape(1, w), b.reshape(1, w), c.reshape(1, w)


@functools.partial(jax.jit, static_argnames=("num_rays", "tile_r"))
def light_model_sg_forward(euler, lobe, lbd, mu, idx, num_rays, tile_r=512):
    """Pallas forward of Light_Model_SG.

    euler: (num_imgs, 1) f32; lobe/mu: (N_l, 3) f32; lbd: (N_l, 1) f32;
    idx: (N_bs,) int32.  Returns (lgtSG (num_rays, N_l, 7), rot_mats (num_rays, 3, 3)).
    """
    n_bs = idx.shape[0]
    n_l = lobe.shape[0]
    w = 7 * n_l

    # per-ray angle: euler[idx] repeated num_rays // N_bs times, block-contiguous
    theta = euler[idx].reshape(n_bs)
    theta = jnp.repeat(theta, num_rays // n_bs)          # (num_rays,)

    tile_r = max(8, (int(tile_r) // 8) * 8)
    n_pad = pl.cdiv(num_rays, tile_r) * tile_r
    theta_p = jnp.zeros((n_pad, 1), jnp.float32).at[:num_rays, 0].set(theta)

    a, b, c = _pack_coeffs(lobe, lbd, mu)
    # R_Y(theta) flattened row-major: [c,0,s, 0,1,0, -s,0,c] = c*RA + s*RB + RC
    ra = jnp.array([[1., 0., 0., 0., 0., 0., 0., 0., 1.]], jnp.float32)
    rb = jnp.array([[0., 0., 1., 0., 0., 0., -1., 0., 0.]], jnp.float32)
    rc = jnp.array([[0., 0., 0., 0., 1., 0., 0., 0., 0.]], jnp.float32)

    def const_spec(shape):
        return pl.BlockSpec(shape, lambda i: (0, 0))

    lgt_flat, rot_flat = pl.pallas_call(
        light_sg_kernel,
        out_shape=(jax.ShapeDtypeStruct((n_pad, w), jnp.float32),
                   jax.ShapeDtypeStruct((n_pad, 9), jnp.float32)),
        grid=(n_pad // tile_r,),
        in_specs=[
            pl.BlockSpec((tile_r, 1), lambda i: (i, 0)),   # theta tile
            const_spec((1, w)), const_spec((1, w)), const_spec((1, w)),
            const_spec((1, 9)), const_spec((1, 9)), const_spec((1, 9)),
        ],
        out_specs=(pl.BlockSpec((tile_r, w), lambda i: (i, 0)),
                   pl.BlockSpec((tile_r, 9), lambda i: (i, 0))),
        compiler_params=pltpu.CompilerParams(
            dimension_semantics=("parallel",)),
    )(theta_p, a, b, c, ra, rb, rc)

    lgtSG = lgt_flat[:num_rays].reshape(num_rays, n_l, 7)     # free reshape
    rot_mats = rot_flat[:num_rays].reshape(num_rays, 3, 3)    # free reshape
    return lgtSG, rot_mats


def reference_forward(euler, lobe, lbd, mu, idx, num_rays):
    """Pure-JAX mirror of the PyTorch forward (for correctness checking)."""
    n_bs = idx.shape[0]
    n_l = lobe.shape[0]
    ang = euler[idx].reshape(n_bs)
    c, s = jnp.cos(ang), jnp.sin(ang)
    zero, one = jnp.zeros_like(c), jnp.ones_like(c)
    rot = jnp.stack([c, zero, s, zero, one, zero, -s, zero, c],
                    axis=-1).reshape(n_bs, 3, 3)
    rot = jnp.repeat(rot, num_rays // n_bs, axis=0)                  # (R, 3, 3)
    lobe_r = jnp.broadcast_to(lobe[None], (num_rays, n_l, 3))
    lobe_r = (lobe_r[..., None, :] * rot[:, None, :, :]).sum(-1)     # R @ lobe
    norm = jnp.sqrt(jnp.sum(lobe_r * lobe_r, axis=-1, keepdims=True))
    lobe_r = lobe_r / jnp.maximum(norm, 1e-12)
    lbd_r = jnp.broadcast_to((jnp.log(jax.nn.sigmoid(lbd)) * -74.4891)[None],
                             (num_rays, n_l, 1))
    mu_r = jnp.broadcast_to(jnp.abs(mu)[None], (num_rays, n_l, 3))
    lgt = jnp.concatenate([lobe_r, lbd_r, mu_r], axis=-1)
    return lgt, rot


# TODO(synk): safe_init / pretrained-weight loading, nn.Parameter bookkeeping and
# set_trainable_true are host-side initialization / autograd concerns, not kernel
# ops; gradients would be taken with jax.grad around light_model_sg_forward.

if __name__ == "__main__":
    key = jax.random.PRNGKey(0)
    k_sg, k_euler = jax.random.split(key)

    num_sgs, num_imgs, num_rays = 32, 20, 256
    idx = jnp.array([3, 7], jnp.int32)                      # N_bs = 2

    # Parameters mirroring the load_pretrained path of the module.
    sg_init = jax.random.normal(k_sg, (num_sgs, 7), jnp.float32)
    lobe = sg_init[:, :3]
    mu = sg_init[:, -3:]
    lbd = inverse_sigmoid(jnp.full((num_sgs, 1), 0.65, jnp.float32))
    euler = jax.random.uniform(k_euler, (num_imgs, 1), jnp.float32,
                               -3.14159, 3.14159)

    lgtSG, rot_mats = light_model_sg_forward(
        euler, lobe, lbd, mu, idx, num_rays, tile_r=128)    # grid of 2 tiles
    lgtSG, rot_mats = jax.block_until_ready((lgtSG, rot_mats))

    ref_lgt, ref_rot = reference_forward(euler, lobe, lbd, mu, idx, num_rays)
    assert lgtSG.shape == (num_rays, num_sgs, 7)
    assert rot_mats.shape == (num_rays, 3, 3)
    assert jnp.allclose(lgtSG, ref_lgt, atol=1e-4, rtol=1e-4), float(
        jnp.max(jnp.abs(lgtSG - ref_lgt)))
    assert jnp.allclose(rot_mats, ref_rot, atol=1e-5, rtol=1e-5), float(
        jnp.max(jnp.abs(rot_mats - ref_rot)))

    print("KERNEL_OK")
</pallas_src>

<mosaic_0001>
module attributes {stable_mosaic.version = 11 : i64} {
  func.func @light_sg_kernel(%arg0: i32, %arg1: memref<128x1xf32, #tpu.memory_space<vmem>>, %arg2: memref<1x224xf32, #tpu.memory_space<vmem>>, %arg3: memref<1x224xf32, #tpu.memory_space<vmem>>, %arg4: memref<1x224xf32, #tpu.memory_space<vmem>>, %arg5: memref<1x9xf32, #tpu.memory_space<vmem>>, %arg6: memref<1x9xf32, #tpu.memory_space<vmem>>, %arg7: memref<1x9xf32, #tpu.memory_space<vmem>>, %arg8: memref<128x224xf32, #tpu.memory_space<vmem>>, %arg9: memref<128x9xf32, #tpu.memory_space<vmem>>) attributes {dimension_semantics = [#tpu.dimension_semantics<parallel>], iteration_bounds = array<i64: 2>, scalar_prefetch = 0 : i64, scratch_operands = 0 : i64, tpu.core_type = #tpu.core_type<tc>, window_params = [{transform_indices = @transform_0, window_bounds = array<i64: 128, 1>}, {pipeline_mode = #tpu.pipeline_mode<synchronous>, transform_indices = @transform_1, window_bounds = array<i64: 1, 224>}, {pipeline_mode = #tpu.pipeline_mode<synchronous>, transform_indices = @transform_2, window_bounds = array<i64: 1, 224>}, {pipeline_mode = #tpu.pipeline_mode<synchronous>, transform_indices = @transform_3, window_bounds = array<i64: 1, 224>}, {pipeline_mode = #tpu.pipeline_mode<synchronous>, transform_indices = @transform_4, window_bounds = array<i64: 1, 9>}, {pipeline_mode = #tpu.pipeline_mode<synchronous>, transform_indices = @transform_5, window_bounds = array<i64: 1, 9>}, {pipeline_mode = #tpu.pipeline_mode<synchronous>, transform_indices = @transform_6, window_bounds = array<i64: 1, 9>}, {transform_indices = @transform_7, window_bounds = array<i64: 128, 224>}, {transform_indices = @transform_8, window_bounds = array<i64: 128, 9>}]} {
    %c0 = arith.constant 0 : index
    %c0_0 = arith.constant 0 : index
    %0 = vector.load %arg1[%c0, %c0_0] : memref<128x1xf32, #tpu.memory_space<vmem>>, vector<128x1xf32>
    %1 = math.cos %0 : vector<128x1xf32>
    %2 = math.sin %0 : vector<128x1xf32>
    %c0_1 = arith.constant 0 : index
    %c0_2 = arith.constant 0 : index
    %3 = vector.load %arg2[%c0_1, %c0_2] : memref<1x224xf32, #tpu.memory_space<vmem>>, vector<1x224xf32>
    %4 = vector.broadcast %1 : vector<128x1xf32> to vector<128x224xf32>
    %5 = vector.broadcast %3 : vector<1x224xf32> to vector<128x224xf32>
    %6 = arith.mulf %4, %5 : vector<128x224xf32>
    %c0_3 = arith.constant 0 : index
    %c0_4 = arith.constant 0 : index
    %7 = vector.load %arg3[%c0_3, %c0_4] : memref<1x224xf32, #tpu.memory_space<vmem>>, vector<1x224xf32>
    %8 = vector.broadcast %2 : vector<128x1xf32> to vector<128x224xf32>
    %9 = vector.broadcast %7 : vector<1x224xf32> to vector<128x224xf32>
    %10 = arith.mulf %8, %9 : vector<128x224xf32>
    %11 = arith.addf %6, %10 : vector<128x224xf32>
    %c0_5 = arith.constant 0 : index
    %c0_6 = arith.constant 0 : index
    %12 = vector.load %arg4[%c0_5, %c0_6] : memref<1x224xf32, #tpu.memory_space<vmem>>, vector<1x224xf32>
    %13 = vector.broadcast %12 : vector<1x224xf32> to vector<128x224xf32>
    %14 = arith.addf %11, %13 : vector<128x224xf32>
    %c0_7 = arith.constant 0 : index
    %c0_8 = arith.constant 0 : index
    %15 = vector.load %arg8[%c0_7, %c0_8] : memref<128x224xf32, #tpu.memory_space<vmem>>, vector<128x224xf32>
    tpu.vector_store %arg8[%c0_7, %c0_8], %14 {strides = array<i32>} : memref<128x224xf32, #tpu.memory_space<vmem>>, vector<128x224xf32>,
    %c0_9 = arith.constant 0 : index
    %c0_10 = arith.constant 0 : index
    %16 = vector.load %arg5[%c0_9, %c0_10] : memref<1x9xf32, #tpu.memory_space<vmem>>, vector<1x9xf32>
    %17 = vector.broadcast %1 : vector<128x1xf32> to vector<128x9xf32>
    %18 = vector.broadcast %16 : vector<1x9xf32> to vector<128x9xf32>
    %19 = arith.mulf %17, %18 : vector<128x9xf32>
    %c0_11 = arith.constant 0 : index
    %c0_12 = arith.constant 0 : index
    %20 = vector.load %arg6[%c0_11, %c0_12] : memref<1x9xf32, #tpu.memory_space<vmem>>, vector<1x9xf32>
    %21 = vector.broadcast %2 : vector<128x1xf32> to vector<128x9xf32>
    %22 = vector.broadcast %20 : vector<1x9xf32> to vector<128x9xf32>
    %23 = arith.mulf %21, %22 : vector<128x9xf32>
    %24 = arith.addf %19, %23 : vector<128x9xf32>
    %c0_13 = arith.constant 0 : index
    %c0_14 = arith.constant 0 : index
    %25 = vector.load %arg7[%c0_13, %c0_14] : memref<1x9xf32, #tpu.memory_space<vmem>>, vector<1x9xf32>
    %26 = vector.broadcast %25 : vector<1x9xf32> to vector<128x9xf32>
    %27 = arith.addf %24, %26 : vector<128x9xf32>
    %c0_15 = arith.constant 0 : index
    %c0_16 = arith.constant 0 : index
    %28 = vector.load %arg9[%c0_15, %c0_16] : memref<128x9xf32, #tpu.memory_space<vmem>>, vector<128x9xf32>
    tpu.vector_store %arg9[%c0_15, %c0_16], %27 {strides = array<i32>} : memref<128x9xf32, #tpu.memory_space<vmem>>, vector<128x9xf32>,
    return
  }
  func.func @transform_0(%arg0: i32) -> (i32, i32) {
    %c0_i32 = arith.constant 0 : i32
    %c0_i32_0 = arith.constant 0 : i32
    return %arg0, %c0_i32 : i32, i32
  }
  func.func @transform_1(%arg0: i32) -> (i32, i32) {
    %c0_i32 = arith.constant 0 : i32
    %c0_i32_0 = arith.constant 0 : i32
    %c0_i32_1 = arith.constant 0 : i32
    return %c0_i32, %c0_i32_0 : i32, i32
  }
  func.func @transform_2(%arg0: i32) -> (i32, i32) {
    %c0_i32 = arith.constant 0 : i32
    %c0_i32_0 = arith.constant 0 : i32
    %c0_i32_1 = arith.constant 0 : i32
    return %c0_i32, %c0_i32_0 : i32, i32
  }
  func.func @transform_3(%arg0: i32) -> (i32, i32) {
    %c0_i32 = arith.constant 0 : i32
    %c0_i32_0 = arith.constant 0 : i32
    %c0_i32_1 = arith.constant 0 : i32
    return %c0_i32, %c0_i32_0 : i32, i32
  }
  func.func @transform_4(%arg0: i32) -> (i32, i32) {
    %c0_i32 = arith.constant 0 : i32
    %c0_i32_0 = arith.constant 0 : i32
    %c0_i32_1 = arith.constant 0 : i32
    return %c0_i32, %c0_i32_0 : i32, i32
  }
  func.func @transform_5(%arg0: i32) -> (i32, i32) {
    %c0_i32 = arith.constant 0 : i32
    %c0_i32_0 = arith.constant 0 : i32
    %c0_i32_1 = arith.constant 0 : i32
    return %c0_i32, %c0_i32_0 : i32, i32
  }
  func.func @transform_6(%arg0: i32) -> (i32, i32) {
    %c0_i32 = arith.constant 0 : i32
    %c0_i32_0 = arith.constant 0 : i32
    %c0_i32_1 = arith.constant 0 : i32
    return %c0_i32, %c0_i32_0 : i32, i32
  }
  func.func @transform_7(%arg0: i32) -> (i32, i32) {
    %c0_i32 = arith.constant 0 : i32
    %c0_i32_0 = arith.constant 0 : i32
    return %arg0, %c0_i32 : i32, i32
  }
  func.func @transform_8(%arg0: i32) -> (i32, i32) {
    %c0_i32 = arith.constant 0 : i32
    %c0_i32_0 = arith.constant 0 : i32
    return %arg0, %c0_i32 : i32, i32
  }
}

</mosaic_0001>

<bundles_post_ra>
// kernel: light_model_sg_forward.1
= control target key start
LH: loop header
LB: loop body
LE: loop exit
PB: predicated region body
PF: predicated region fallthrough
CT: control target
= control target key end

     0   :  { %s4555_s27 = smov 0   ;;  %s6694_s0 = inlined_call_operand.vmem [shape: f32[256,1], index: 0, kind: input, shape index: {}]   ;;  %s6695_s1 = inlined_call_operand.vmem [shape: f32[1,224], index: 1, kind: input, shape index: {}]   ;;  %s6696_s2 = inlined_call_operand.vmem [shape: f32[1,224], index: 2, kind: input, shape index: {}]   ;;  %s6697_s3 = inlined_call_operand.vmem [shape: f32[1,224], index: 3, kind: input, shape index: {}]   ;;  %s6698_s4 = inlined_call_operand.vmem [shape: f32[1,9], index: 4, kind: input, shape index: {}]   ;;  %s6699_s5 = inlined_call_operand.vmem [shape: f32[1,9], index: 5, kind: input, shape index: {}]   ;;  %s6700_s6 = inlined_call_operand.vmem [shape: f32[1,9], index: 6, kind: input, shape index: {}]   ;;  %s6701_s7 = inlined_call_operand.vmem [shape: f32[256,224], index: 7, kind: output, shape index: {0}]   ;;  %s6702_s8 = inlined_call_operand.vmem [shape: f32[256,9], index: 8, kind: output, shape index: {1}]  }
   0x1 LB: > { %s4204_s28 = sadd.s32 4294967295, %s4501_s27   ;;  %p4208_p0 = scmp.ge.s32.totalorder %s4501_s27, 1  ;;  %s4501_s27 = sphi %s4555_s27, %s19_s27  }
   0x2   : > { %p266_p1 = scmp.lt.s32.totalorder %s4501_s27, 3 }
   0x4   : > { %p267_p2 = pnand %p4208_p0, %p266_p1 }
   0x6   : > { %270 = sbr.rel (%p267_p2) target bundleno = 619 (0x26b), region = 48 }
   0xd   : > { %s4209_s29 = sshll.u32 %s4204_s28, 4  ;;  %v4503_v0 = vmov 0   ;;  %v6729_v31 = vmov 683565275   ;;  %v6720_v33 = vmov 2475754826  }
   0xe   : > { %4430 = vset.pattern.permute.xlu1 %v4503_v0  ;;  %4429 = vset.pattern.permute.xlu0 %v4503_v0  ;;  %p307_p3 = scmp.lt.s32.totalorder %s4209_s29, 31  ;;  %v6718_v35 = vmov 2131351028   ;;  %v6716_v37 = vmov 2102212464  }
   0xf   : > { %v6769_v39 = vmov 920167782   ;;  %v6727_v47 = vmov 1326507024  }
  0x10   : > { %s6933_s29 = smov (!%p307_p3, %s4209_s29), 31 }
  0x11   : > { %s4210_s30 = sshll.u32 %s6933_s29, 3  ;;  %s4349_s22 = sshll.u32 %s6933_s29, 4 }
  0x12   : > { %s4571_s11 = scalar_lea.vmem %s6694_s0, %s4210_s30  ;;  %s6395_s28 = scalar_lea.vmem %s6701_s7, %s4349_s22 }
  0x13   : > { %v4574_v1 = vld [vmem:[%s4571_s11 + $0x10] sm:$0xff]  ;;  %v4577_v2 = vld [vmem:[%s4571_s11] sm:$0xff]  ;;  %v4582_v5 = vld [vmem:[%s4571_s11 + $0x18] sm:$0xff] }
  0x14   : > { %6798 = vst [vmem:[#allocation2_spill] sm:$0xff] %v4574_v1  ;;  %6799 = vst [vmem:[#allocation3_spill] sm:$0xff] %v4577_v2  ;;  %v547_v3 = vand.u32 2147483647, %v4574_v1  ;;  %v550_v4 = vand.u32 2139095040, %v4574_v1  ;;  %v344_v7 = vand.u32 2139095040, %v4577_v2 }
  0x15   : > { %v341_v6 = vand.u32 2147483647, %v4577_v2  ;;  %v653_v12 = vand.u32 2139095040, %v4582_v5  ;;  %v650_v25 = vand.u32 2147483647, %v4582_v5  ;;  %vm549_vm13 = vcmp.lt.s32.totalorder %v4574_v1, 0 }
  0x16   : > { %v551_v8 = vshrl.u32 %v550_v4, 23  ;;  %v554_v9 = vand.u32 8388607, %v547_v3  ;;  %v345_v10 = vshrl.u32 %v344_v7, 23 }
  0x17   : > { %v348_v11 = vand.u32 8388607, %v341_v6  ;;  %v654_v15 = vshrl.u32 %v653_v12, 23 }
  0x18   : > { %v4224_v13 = vadd.s32 4294967169, %v551_v8  ;;  %v4216_v14 = vadd.s32 4294967169, %v345_v10  ;;  %v555_v17 = vor.u32 8388608, %v554_v9 }
  0x19   : > { %v349_v18 = vor.u32 8388608, %v348_v11  ;;  %v4228_v20 = vadd.s32 4294967169, %v654_v15 }
  0x1a   : > { %v557_v16 = vadd.s32 1, %v4224_v13  ;;  %v351_v19 = vadd.s32 1, %v4216_v14  ;;  %v4592_v26 = vshll.u32 %v555_v17, 8 }
  0x1b   : > { %v4594_v28 = vshll.u32 %v349_v18, 8  ;;  %v4596_v29 = vadd.s32 1, %v4228_v20 }
  0x1c   : > { %vm558_vm0 = vcmp.gt.s32.totalorder %v557_v16, 0  ;;  %vm352_vm1 = vcmp.gt.s32.totalorder %v351_v19, 0 }
  0x1d   : > { %v559_v21 = vsel %vm558_vm0, %v557_v16, 0  ;;  %v353_v24 = vsel %vm352_vm1, %v351_v19, 0  ;;  %vm661_vm6 = vcmp.gt.s32.totalorder %v4596_v29, 0 }
  0x1e   : > { %v560_v22 = vshrl.u32 %v559_v21, 5  ;;  %v561_v23 = vand.u32 31, %v559_v21  ;;  %v355_v27 = vand.u32 31, %v353_v24  ;;  %v4603_v41 = vshrl.u32 %v353_v24, 5 }
  0x20   : > { %v562_v30 = vsub.s32 32, %v561_v23  ;;  %v564_v32 = vshll.u32 %v6729_v31, %v561_v23  ;;  %v567_v34 = vshll.u32 %v6720_v33, %v561_v23  ;;  %v570_v36 = vshll.u32 %v6718_v35, %v561_v23 }
  0x21   : > { %v573_v38 = vshll.u32 %v6716_v37, %v561_v23  ;;  %v576_v40 = vshll.u32 %v6769_v39, %v561_v23  ;;  %vm579_vm2 = vcmp.lt.s32.totalorder %v560_v22, 1  ;;  %vm580_vm3 = vcmp.lt.s32.totalorder %v560_v22, 2 }
  0x22   : > { %v563_v42 = vshrl.u32 %v6729_v31, %v562_v30  ;;  %v565_v43 = vshrl.u32 %v6720_v33, %v562_v30  ;;  %v568_v44 = vshrl.u32 %v6718_v35, %v562_v30  ;;  %v571_v45 = vshrl.u32 %v6716_v37, %v562_v30 }
  0x23   : > { %v574_v46 = vshrl.u32 %v6769_v39, %v562_v30  ;;  %v577_v48 = vshrl.u32 %v6727_v47, %v562_v30  ;;  %vm582_vm4 = vcmp.lt.s32.totalorder %v560_v22, 4  ;;  %v356_v52 = vsub.s32 32, %v355_v27 }
  0x24   : > { %v566_v49 = vor.u32 %v565_v43, %v564_v32  ;;  %v569_v50 = vor.u32 %v568_v44, %v567_v34  ;;  %v572_v51 = vor.u32 %v571_v45, %v570_v36  ;;  %vm581_vm5 = vcmp.lt.s32.totalorder %v560_v22, 3 }
  0x25   : > { %v575_v53 = vor.u32 %v574_v46, %v573_v38  ;;  %v578_v54 = vor.u32 %v577_v48, %v576_v40  ;;  %v358_v55 = vshll.u32 %v6729_v31, %v355_v27  ;;  %v361_v63 = vshll.u32 %v6720_v33, %v355_v27 }
  0x26   : > { %v583_v56 = vsel %vm579_vm2, %v563_v42, %v566_v49  ;;  %v584_v57 = vsel %vm582_vm4, %v572_v51, 2102212464  ;;  %v587_v58 = vsel %vm579_vm2, %v566_v49, %v569_v50  ;;  %v591_v59 = vsel %vm579_vm2, %v569_v50, %v572_v51 }
  0x27   : > { %v585_v60 = vsel %vm581_vm5, %v569_v50, %v584_v57  ;;  %v588_v61 = vsel %vm582_vm4, %v575_v53, 920167782  ;;  %v592_v62 = vsel %vm582_vm4, %v578_v54, 1326507024  ;;  %v357_v7 = vshrl.u32 %v6729_v31, %v356_v52  ;;  %v4655_v54 = vld [vmem:[%s4571_s11 + $0x8] sm:$0xff] }
  0x28   : > { %v589_v0 = vsel %vm581_vm5, %v572_v51, %v588_v61  ;;  %v593_v4 = vsel %vm581_vm5, %v575_v53, %v592_v62  ;;  %v359_v8 = vshrl.u32 %v6720_v33, %v356_v52  ;;  %v586_v9 = vsel %vm580_vm3, %v583_v56, %v585_v60 }
  0x29   : > { %v590_v10 = vsel %vm580_vm3, %v587_v58, %v589_v0  ;;  %v594_v11 = vsel %vm580_vm3, %v591_v59, %v593_v4  ;;  %v362_v12 = vshrl.u32 %v6718_v35, %v356_v52  ;;  %v364_v19 = vshll.u32 %v6718_v35, %v355_v27 }
  0x2a   : > { %v4624_v13 = vmul.u32.u64.low %v4592_v26, %v594_v11  ;;  %v4625_v14 = vmul.u32.u64.high %v4592_v26, %v594_v11, %v4624_v13  ;;  %v4628_v15 = vmul.u32.u64.low %v4592_v26, %v590_v10  ;;  %v4629_v16 = vmul.u32.u64.high %v4592_v26, %v590_v10, %v4628_v15 }
  0x2b   : > { %v360_v17 = vor.u32 %v359_v8, %v358_v55  ;;  %v363_v18 = vor.u32 %v362_v12, %v361_v63  ;;  %v365_v20 = vshrl.u32 %v6716_v37, %v356_v52  ;;  %v367_v21 = vshll.u32 %v6716_v37, %v355_v27 }
  0x2c   : > { %v368_v22 = vshrl.u32 %v6769_v39, %v356_v52  ;;  %v370_v23 = vshll.u32 %v6769_v39, %v355_v27  ;;  %v371_v24 = vshrl.u32 %v6727_v47, %v356_v52  ;;  %v602_v30 = vmul.u32 %v4592_v26, %v586_v9 }
  0x2d   : > { %v366_v32 = vor.u32 %v365_v20, %v364_v19  ;;  %vm373_vm7 = vcmp.lt.s32.totalorder %v4603_v41, 1  ;;  %vm374_vm8 = vcmp.lt.s32.totalorder %v4603_v41, 2  ;;  %vm604_vm9 = vc.u32 %v4625_v14, %v4628_v15 }
  0x2e   : > { %v605_v34 = vadd.s32 1, %v4629_v16  ;;  %v369_v36 = vor.u32 %v368_v22, %v367_v21  ;;  %vm375_vm10 = vcmp.lt.s32.totalorder %v4603_v41, 3  ;;  %v372_v38 = vor.u32 %v371_v24, %v370_v23 }
  0x2f   : > { %vm376_vm11 = vcmp.lt.s32.totalorder %v4603_v41, 4  ;;  %v377_v27 = vsel %vm373_vm7, %v357_v7, %v360_v17  ;;  %v381_v40 = vsel %vm373_vm7, %v360_v17, %v363_v18  ;;  %v385_v44 = vsel %vm373_vm7, %v363_v18, %v366_v32 }
  0x30   : > { %v606_v26 = vsel %vm604_vm9, %v605_v34, %v4629_v16  ;;  %v378_v42 = vsel %vm376_vm11, %v366_v32, 2102212464  ;;  %v382_v43 = vsel %vm376_vm11, %v369_v36, 920167782  ;;  %v386_v49 = vsel %vm376_vm11, %v372_v38, 1326507024 }
  0x31   : > { %v607_v45 = vadd.s32 %v606_v26, %v602_v30  ;;  %v379_v46 = vsel %vm375_vm10, %v363_v18, %v378_v42  ;;  %v383_v48 = vsel %vm375_vm10, %v366_v32, %v382_v43  ;;  %v387_v52 = vsel %vm375_vm10, %v369_v36, %v386_v49 }
  0x32   : > { %v380_v50 = vsel %vm374_vm8, %v377_v27, %v379_v46  ;;  %v384_v51 = vsel %vm374_vm8, %v381_v40, %v383_v48  ;;  %v662_v53 = vsel %vm661_vm6, %v4596_v29, 0  ;;  %v388_v56 = vsel %vm374_vm8, %v385_v44, %v387_v52 }
  0x33   : > { %v608_v55 = vadd.s32 536870912, %v607_v45  ;;  %v4660_v57 = vmul.u32.u64.low %v4594_v28, %v384_v51  ;;  %v4661_v58 = vmul.u32.u64.high %v4594_v28, %v384_v51, %v4660_v57  ;;  %v657_v61 = vand.u32 8388607, %v650_v25 }
  0x34   : > { %v4665_v59 = vmul.u32.u64.low %v4594_v28, %v388_v56  ;;  %v4666_v60 = vmul.u32.u64.high %v4594_v28, %v388_v56, %v4665_v59  ;;  %v664_v29 = vand.u32 31, %v662_v53  ;;  %v447_v63 = vand.u32 2139095040, %v4655_v54 }
  0x35   : > { %v4670_v62 = vshrl.u32 %v608_v55, 30  ;;  %v396_v41 = vmul.u32 %v4594_v28, %v380_v50  ;;  %v399_v4 = vadd.s32 1, %v4661_v58  ;;  %v658_v8 = vor.u32 8388608, %v657_v61 }
  0x36   : > { %v665_v7 = vsub.s32 32, %v664_v29  ;;  %vm398_vm12 = vc.u32 %v4666_v60, %v4660_v57  ;;  %v663_v11 = vshrl.u32 %v662_v53, 5  ;;  %v448_v12 = vshrl.u32 %v447_v63, 23 }
  0x37   : > { %v610_v0 = vshll.u32 %v4670_v62, 30  ;;  %v400_v10 = vsel %vm398_vm12, %v399_v4, %v4661_v58  ;;  %v667_v16 = vshll.u32 %v6729_v31, %v664_v29  ;;  %v670_v17 = vshll.u32 %v6720_v33, %v664_v29 }
  0x38   : > { %v401_v13 = vadd.s32 %v400_v10, %v396_v41  ;;  %v668_v28 = vshrl.u32 %v6720_v33, %v665_v7  ;;  %v671_v19 = vshrl.u32 %v6718_v35, %v665_v7  ;;  %v673_v20 = vshll.u32 %v6718_v35, %v664_v29 }
  0x39   : > { %v4678_v9 = vsub.s32 %v607_v45, %v610_v0  ;;  %v674_v21 = vshrl.u32 %v6716_v37, %v665_v7  ;;  %v603_v22 = vadd.s32 %v4628_v15, %v4625_v14  ;;  %v676_v24 = vshll.u32 %v6716_v37, %v664_v29 }
  0x3a   : > { %v402_v23 = vadd.s32 536870912, %v401_v13  ;;  %v4691_v30 = vshll.u32 %v658_v8, 8  ;;  %v666_v34 = vshrl.u32 %v6729_v31, %v665_v7  ;;  %vm685_vm14 = vcmp.lt.s32.totalorder %v663_v11, 4 }
  0x3b   : > { %v613_v18 = vsub.s32 0, %v4678_v9  ;;  %v4220_v36 = vadd.s32 4294967169, %v448_v12  ;;  %v669_v27 = vor.u32 %v668_v28, %v667_v16  ;;  %v677_v40 = vshrl.u32 %v6769_v39, %v665_v7 }
  0x3c   : > { %v4696_v38 = vshrl.u32 %v402_v23, 30  ;;  %v679_v14 = vshll.u32 %v6769_v39, %v664_v29  ;;  %v672_v26 = vor.u32 %v671_v19, %v670_v17  ;;  %v675_v42 = vor.u32 %v674_v21, %v673_v20 }
  0x3d   : > { %v4225_v32 = vmin.u32 %v613_v18, %v4678_v9  ;;  %v680_v43 = vshrl.u32 %v6727_v47, %v665_v7  ;;  %v678_v45 = vor.u32 %v677_v40, %v676_v24  ;;  %vm682_vm15 = vcmp.lt.s32.totalorder %v663_v11, 1 }
  0x3e   : > { %v404_v44 = vshll.u32 %v4696_v38, 30  ;;  %vm684_vm0 = vcmp.lt.s32.totalorder %v663_v11, 3  ;;  %vm683_vm1 = vcmp.lt.s32.totalorder %v663_v11, 2  ;;  %v687_v49 = vsel %vm685_vm14, %v675_v42, 2102212464 }
  0x3f   : > { %v615_v15 = vclz %v4225_v32  ;;  %v681_v48 = vor.u32 %v680_v43, %v679_v14  ;;  %vm4705_vm2 = vcmp.le.f32.partialorder %v547_v3, 0.7853982  ;;  %v633_v51 = vsub.s32 4, %v4670_v62 }
  0x40   : > { %v4710_v52 = vsub.s32 %v401_v13, %v404_v44  ;;  %v686_v53 = vsel %vm682_vm15, %v666_v34, %v669_v27  ;;  %v691_v55 = vsel %vm685_vm14, %v678_v45, 920167782  ;;  %v690_v56 = vsel %vm682_vm15, %v669_v27, %v672_v26 }
  0x41   : > { %v4226_v46 = vadd.s32 4294967294, %v615_v15  ;;  %v692_v58 = vsel %vm684_vm0, %v675_v42, %v691_v55  ;;  %v695_v59 = vsel %vm685_vm14, %v681_v48, 1326507024  ;;  %v688_v29 = vsel %vm684_vm0, %v672_v26, %v687_v49 }
  0x42   : > { %v407_v3 = vsub.s32 0, %v4710_v52  ;;  %v694_v63 = vsel %vm682_vm15, %v672_v26, %v675_v42  ;;  %v696_v7 = vsel %vm684_vm0, %v678_v45, %v695_v59  ;;  %v634_v8 = vsel %vm549_vm13, %v633_v51, %v4670_v62 }
  0x43   : > { %vm4227_vm3 = vcmp.lt.s32.totalorder %v4226_v46, 0  ;;  %v693_v12 = vsel %vm683_vm1, %v690_v56, %v692_v58  ;;  %v444_v13 = vand.u32 2147483647, %v4655_v54  ;;  %vm343_vm4 = vcmp.lt.s32.totalorder %v4577_v2, 0 }
  0x44   : > { %v618_v61 = vsel %vm4227_vm3, 0, %v4226_v46  ;;  %v4217_v10 = vmin.u32 %v407_v3, %v4710_v52  ;;  %v689_v17 = vsel %vm683_vm1, %v686_v53, %v688_v29  ;;  %v454_v62 = vadd.s32 1, %v4220_v36 }
  0x45   : > { %v619_v41 = vsub.s32 32, %v618_v61  ;;  %v620_v0 = vshll.u32 %v4678_v9, %v618_v61  ;;  %v623_v4 = vsub.s32 4294967266, %v618_v61  ;;  %v697_v9 = vsel %vm683_vm1, %v694_v63, %v696_v7 }
  0x46   : > { %v409_v18 = vclz %v4217_v10  ;;  %v4732_v19 = vmul.u32.u64.low %v4691_v30, %v697_v9  ;;  %v4733_v20 = vmul.u32.u64.high %v4691_v30, %v697_v9, %v4732_v19  ;;  %v4744_v11 = vand.u32 8388607, %v444_v13 }
  0x47   : > { %v621_v16 = vshrl.u32 %v603_v22, %v619_v41  ;;  %v624_v28 = vadd.s32 127, %v623_v4  ;;  %v4736_v24 = vmul.u32.u64.low %v4691_v30, %v693_v12  ;;  %v4737_v32 = vmul.u32.u64.high %v4691_v30, %v693_v12, %v4736_v24 }
  0x48   : > { %v397_v22 = vadd.s32 %v4660_v57, %v4666_v60  ;;  %v4218_v34 = vadd.s32 4294967294, %v409_v18  ;;  %vm455_vm5 = vcmp.gt.s32.totalorder %v454_v62, 0  ;;  %v4748_v36 = vsel %vm4705_vm2, 0, %v634_v8 }
  0x49   : > { %v622_v21 = vor.u32 %v621_v16, %v620_v0  ;;  %v625_v23 = vshll.u32 %v624_v28, 23  ;;  %v456_v14 = vsel %vm455_vm5, %v454_v62, 0  ;;  %v427_v15 = vsub.s32 4, %v4696_v38 }
  0x4a   : > { %vm4219_vm6 = vcmp.lt.s32.totalorder %v4218_v34, 0  ;;  %v705_v26 = vmul.u32 %v4691_v30, %v689_v17  ;;  %vm707_vm7 = vc.u32 %v4733_v20, %v4736_v24  ;;  %v708_v42 = vadd.s32 1, %v4737_v32 }
  0x4b   : > { %v626_v27 = vor.u32 4788187, %v625_v23  ;;  %v629_v40 = vcvt.s32.f32 %v622_v21  ;;  %v412_v60 = vsel %vm4219_vm6, 0, %v4218_v34  ;;  %v458_v43 = vand.u32 31, %v456_v14 }
  0x4c   : > { %v413_v44 = vsub.s32 32, %v412_v60  ;;  %v414_v45 = vshll.u32 %v4710_v52, %v412_v60  ;;  %v417_v46 = vsub.s32 4294967266, %v412_v60  ;;  %v452_v48 = vor.u32 8388608, %v4744_v11 }
  0x4d   : > { %v627_v57 = vand.u32 2147483647, %v626_v27  ;;  %v4758_v51 = vand.u32 3, %v4748_v36  ;;  %v709_v30 = vsel %vm707_vm7, %v708_v42, %v4737_v32  ;;  %v459_v53 = vsub.s32 32, %v458_v43 }
  0x4e   : > { %vm4763_vm8 = vcmp.le.f32.partialorder %v341_v6, 0.7853982  ;;  %v415_v56 = vshrl.u32 %v397_v22, %v413_v44  ;;  %v418_v58 = vadd.s32 127, %v417_v46  ;;  %v428_v52 = vsel %vm343_vm4, %v427_v15, %v4696_v38 }
  0x4f   : > { %v630_v49 = vmul.f32 %v629_v40, %v627_v57  ;;  %v710_v59 = vadd.s32 %v709_v30, %v705_v26  ;;  %v4770_v3 = vshrl.u32 %v456_v14, 5  ;;  %v461_v29 = vshll.u32 %v6729_v31, %v458_v43 }
  0x50   : > { %v464_v63 = vshll.u32 %v6720_v33, %v458_v43  ;;  %v416_v41 = vor.u32 %v415_v56, %v414_v45  ;;  %v419_v0 = vshll.u32 %v418_v58, 23  ;;  %v462_v4 = vshrl.u32 %v6720_v33, %v459_v53 }
  0x51   : > { %v631_v61 = vxor.u32 2147483648, %v630_v49  ;;  %v711_v6 = vadd.s32 536870912, %v710_v59  ;;  %v465_v8 = vshrl.u32 %v6718_v35, %v459_v53  ;;  %v467_v38 = vshll.u32 %v6718_v35, %v458_v43 }
  0x52   : > { %v468_v10 = vshrl.u32 %v6716_v37, %v459_v53  ;;  %v420_v16 = vor.u32 4788187, %v419_v0  ;;  %v423_v28 = vcvt.s32.f32 %v416_v41  ;;  %v470_v9 = vshll.u32 %v6716_v37, %v458_v43  ;;  %v4842_v0 = vld [vmem:[%s4571_s11 + $0x28] sm:$0xff] }
  0x53   : > { %v632_v7 = vsel %vm549_vm13, %v631_v61, %v630_v49  ;;  %v4783_v17 = vshrl.u32 %v711_v6, 30  ;;  %v471_v18 = vshrl.u32 %v6769_v39, %v459_v53  ;;  %vm476_vm9 = vcmp.lt.s32.totalorder %v4770_v3, 1 }
  0x54   : > { %v635_v12 = vsel %vm4705_vm2, %v4574_v1, %v632_v7  ;;  %v421_v19 = vand.u32 2147483647, %v420_v16  ;;  %v463_v21 = vor.u32 %v462_v4, %v461_v29  ;;  %v466_v23 = vor.u32 %v465_v8, %v464_v63 }
  0x55   : > { %4431 = vcosq.f32 %v635_v12  ;;  %v713_v62 = vshll.u32 %v4783_v17, 30  ;;  %v472_v32 = vor.u32 %v471_v18, %v470_v9  ;;  %v473_v50 = vshll.u32 %v6769_v39, %v458_v43 }
  0x56   : > { %4433 = vsinq.f32 %v635_v12  ;;  %v474_v22 = vshrl.u32 %v6727_v47, %v459_v53  ;;  %vm642_vm10 = vcmp.eq.s32.totalorder %v4758_v51, 0  ;;  %v424_v34 = vmul.f32 %v423_v28, %v421_v19 }
  0x57   : > { %v4792_v11 = vsub.s32 %v710_v59, %v713_v62  ;;  %v460_v27 = vshrl.u32 %v6729_v31, %v459_v53  ;;  %v469_v40 = vor.u32 %v468_v10, %v467_v38  ;;  %vm641_vm11 = vcmp.lt.s32.totalorder %v4758_v51, 2 }
  0x58   : > { %vm645_vm12 = vcmp.eq.s32.totalorder %v4758_v51, 2  ;;  %v4799_v14 = vsel %vm4763_vm8, 0, %v428_v52  ;;  %vm478_vm13 = vcmp.lt.s32.totalorder %v4770_v3, 3  ;;  %vm479_vm14 = vcmp.lt.s32.totalorder %v4770_v3, 4 }
  0x59   : > { %vm6796_vm15 = vweird.f32 %v4574_v1  ;;  %v425_v15 = vxor.u32 2147483648, %v424_v34  ;;  %v716_v26 = vsub.s32 0, %v4792_v11  ;;  %v475_v57 = vor.u32 %v474_v22, %v473_v50 }
  0x5a   : > { %v481_v60 = vsel %vm479_vm14, %v469_v40, 2102212464  ;;  %vm477_vm0 = vcmp.lt.s32.totalorder %v4770_v3, 2  ;;  %v484_v42 = vsel %vm476_vm9, %v463_v21, %v466_v23  ;;  %v485_v43 = vsel %vm479_vm14, %v472_v32, 920167782 }
  0x5b   : > { %v492_v44 = vshll.u32 %v452_v48, 8  ;;  %v426_v45 = vsel %vm343_vm4, %v425_v15, %v424_v34  ;;  %v4815_v46 = vand.u32 3, %v4799_v14  ;;  %v4229_v49 = vmin.u32 %v716_v26, %v4792_v11 }
  0x5c   : > { %v480_v30 = vsel %vm476_vm9, %v460_v27, %v463_v21  ;;  %v429_v53 = vsel %vm4763_vm8, %v4577_v2, %v426_v45  ;;  %v482_v56 = vsel %vm478_vm13, %v466_v23, %v481_v60  ;;  %v486_v48 = vsel %vm478_vm13, %v469_v40, %v485_v43 }
  0x5d   : > { %v488_v58 = vsel %vm476_vm9, %v466_v23, %v469_v40  ;;  %4435 = vcosq.f32 %v429_v53  ;;  %v718_v52 = vclz %v4229_v49  ;;  %v487_v59 = vsel %vm477_vm0, %v484_v42, %v486_v48 }
  0x5e   : > { %v489_v61 = vsel %vm479_vm14, %v475_v57, 1326507024  ;;  %4437 = vsinq.f32 %v429_v53  ;;  %v4837_v63 = vmul.u32.u64.low %v492_v44, %v487_v59  ;;  %v4838_v41 = vmul.u32.u64.high %v492_v44, %v487_v59, %v4837_v63  ;;  %v4884_v57 = vld [vmem:[%s4571_s11 + $0x20] sm:$0xff] }
  0x5f   : > { %v4833_v29 = vpop.eup %4431  ;;  %v490_v55 = vsel %vm478_vm13, %v472_v32, %v489_v61  ;;  %v4230_v7 = vadd.s32 4294967294, %v718_v52  ;;  %v483_v8 = vsel %vm477_vm0, %v480_v30, %v482_v56  ;;  %v706_v12 = vadd.s32 %v4736_v24, %v4733_v20  ;;  %6806 = vst [vmem:[#allocation6_spill] sm:$0xff] %v4884_v57 }
  0x60   : > { %6804 = vst [vmem:[#allocation4_spill] sm:$0xff] %v4833_v29  ;;  %v4844_v6 = vpop.eup %4433  ;;  %v6703_v4 = vxor.u32 2147483648, %v4833_v29  ;;  %v491_v38 = vsel %vm477_vm0, %v488_v58, %v490_v55  ;;  %v736_v18 = vsub.s32 4, %v4783_v17  ;;  %v859_v3 = vand.u32 2139095040, %v4842_v0 }
  0x61   : > { %6805 = vst [vmem:[#allocation5_spill] sm:$0xff] %v4844_v6  ;;  %v6704_v10 = vxor.u32 2147483648, %v4844_v6  ;;  %v4854_v16 = vmul.u32.u64.low %v492_v44, %v491_v38  ;;  %v4855_v28 = vmul.u32.u64.high %v492_v44, %v491_v38, %v4854_v16  ;;  %vm4231_vm1 = vcmp.lt.s32.totalorder %v4230_v7, 0 }
  0x62   : > { %v647_v9 = vsel %vm645_vm12, %v6703_v4, %v4844_v6  ;;  %vm6797_vm2 = vweird.f32 %v4577_v2  ;;  %v721_v24 = vsel %vm4231_vm1, 0, %v4230_v7  ;;  %v499_v19 = vmul.u32 %v492_v44, %v483_v8 }
  0x63   : > { %v644_v20 = vsel %vm642_vm10, %v4833_v29, %v6704_v10  ;;  %v502_v62 = vadd.s32 1, %v4838_v41  ;;  %v722_v23 = vsub.s32 32, %v721_v24  ;;  %v723_v32 = vshll.u32 %v4792_v11, %v721_v24 }
  0x64   : > { %v648_v21 = vsel %vm641_vm11, %v644_v20, %v647_v9  ;;  %v726_v50 = vsub.s32 4294967266, %v721_v24  ;;  %vm501_vm3 = vc.u32 %v4855_v28, %v4837_v63  ;;  %v856_v34 = vand.u32 2147483647, %v4842_v0 }
  0x65   : > { %v649_v22 = vsel %vm6796_vm15, nan, %v648_v21  ;;  %v860_v27 = vshrl.u32 %v859_v3, 23  ;;  %vm652_vm4 = vcmp.lt.s32.totalorder %v4582_v5, 0  ;;  %v724_v40 = vshrl.u32 %v706_v12, %v722_v23 }
  0x66   : > { %3666 = vperm.xlu1 %4430, %v649_v22   ;;  %v727_v51 = vadd.s32 127, %v726_v50  ;;  %v503_v15 = vsel %vm501_vm3, %v502_v62, %v4838_v41  ;;  %vm435_vm5 = vcmp.lt.s32.totalorder %v4815_v46, 2  ;;  %vm436_vm6 = vcmp.eq.s32.totalorder %v4815_v46, 0 }
  0x67   : > { %v504_v11 = vadd.s32 %v503_v15, %v499_v19  ;;  %v4236_v26 = vadd.s32 4294967169, %v860_v27  ;;  %v4886_v60 = vpop.eup %4435  ;;  %vm439_vm7 = vcmp.eq.s32.totalorder %v4815_v46, 2  ;;  %v725_v42 = vor.u32 %v724_v40, %v723_v32 }
  0x68   : > { %6807 = vst [vmem:[#allocation7_spill] sm:$0xff] %v4886_v60  ;;  %v728_v43 = vshll.u32 %v727_v51, 23  ;;  %v737_v44 = vsel %vm652_vm4, %v736_v18, %v4783_v17  ;;  %v4892_v45 = vpop.eup %4437  ;;  %v6705_v49 = vxor.u32 2147483648, %v4886_v60  ;;  %v863_v53 = vand.u32 8388607, %v856_v34 }
  0x69   : > { %6808 = vst [vmem:[#allocation8_spill] sm:$0xff] %v4892_v45  ;;  %v505_v30 = vadd.s32 536870912, %v504_v11  ;;  %v866_v56 = vadd.s32 1, %v4236_v26  ;;  %v6706_v48 = vxor.u32 2147483648, %v4892_v45  ;;  %v732_v52 = vcvt.s32.f32 %v725_v42 }
  0x6a   : > { %v729_v58 = vor.u32 4788187, %v728_v43  ;;  %v756_v59 = vand.u32 2139095040, %v4884_v57  ;;  %v441_v61 = vsel %vm439_vm7, %v6705_v49, %v4892_v45  ;;  %vm4904_vm8 = vcmp.le.f32.partialorder %v650_v25, 0.7853982 }
  0x6b   : > { %v4908_v55 = vshrl.u32 %v505_v30, 30  ;;  %vm867_vm9 = vcmp.gt.s32.totalorder %v866_v56, 0  ;;  %v438_v41 = vsel %vm436_vm6, %v4886_v60, %v6706_v48  ;;  %v4917_v8 = vsel %vm4904_vm8, 0, %v737_v44 }
  0x6c   : > { %v730_v7 = vand.u32 2147483647, %v729_v58  ;;  %v868_v38 = vsel %vm867_vm9, %v866_v56, 0  ;;  %v442_v25 = vsel %vm435_vm5, %v438_v41, %v441_v61  ;;  %v864_v16 = vor.u32 8388608, %v863_v53 }
  0x6d   : > { %v507_v12 = vshll.u32 %v4908_v55, 30  ;;  %v443_v9 = vsel %vm6797_vm2, nan, %v442_v25  ;;  %v870_v3 = vand.u32 31, %v868_v38  ;;  %v757_v20 = vshrl.u32 %v756_v59, 23 }
  0x6e   : > { %v733_v18 = vmul.f32 %v732_v52, %v730_v7  ;;  %3656 = vperm.xlu0 %4429, %v443_v9   ;;  %v4925_v24 = vand.u32 3, %v4917_v8  ;;  %v500_v19 = vadd.s32 %v4837_v63, %v4855_v28  ;;  %v4931_v46 = vshrl.u32 %v868_v38, 5 }
  0x6f   : > { %v4929_v62 = vsub.s32 %v504_v11, %v507_v12  ;;  %v871_v23 = vsub.s32 32, %v870_v3  ;;  %v873_v32 = vshll.u32 %v6729_v31, %v870_v3  ;;  %v753_v50 = vand.u32 2147483647, %v4884_v57 }
  0x70   : > { %v734_v21 = vxor.u32 2147483648, %v733_v18  ;;  %v530_v27 = vsub.s32 4, %v4908_v55  ;;  %v876_v40 = vshll.u32 %v6720_v33, %v870_v3  ;;  %v4938_v51 = vshll.u32 %v864_v16, 8 }
  0x71   : > { %v510_v22 = vsub.s32 0, %v4929_v62  ;;  %vm446_vm10 = vcmp.lt.s32.totalorder %v4655_v54, 0  ;;  %v874_v28 = vshrl.u32 %v6720_v33, %v871_v23  ;;  %v877_v15 = vshrl.u32 %v6718_v35, %v871_v23 }
  0x72   : > { %v735_v63 = vsel %vm652_vm4, %v734_v21, %v733_v18  ;;  %v4232_v11 = vadd.s32 4294967169, %v757_v20  ;;  %v879_v43 = vshll.u32 %v6718_v35, %v870_v3  ;;  %vm888_vm11 = vcmp.lt.s32.totalorder %v4931_v46, 1 }
  0x73   : > { %v738_v26 = vsel %vm4904_vm8, %v4582_v5, %v735_v63  ;;  %v4221_v42 = vmin.u32 %v510_v22, %v4929_v62  ;;  %v872_v44 = vshrl.u32 %v6729_v31, %v871_v23  ;;  %v875_v30 = vor.u32 %v874_v28, %v873_v32 }
  0x74   : > { %4439 = vcosq.f32 %v738_v26  ;;  %v878_v53 = vor.u32 %v877_v15, %v876_v40  ;;  %v880_v58 = vshrl.u32 %v6716_v37, %v871_v23  ;;  %v882_v52 = vshll.u32 %v6716_v37, %v870_v3 }
  0x75   : > { %4441 = vsinq.f32 %v738_v26  ;;  %v512_v56 = vclz %v4221_v42  ;;  %vm748_vm12 = vcmp.eq.s32.totalorder %v4925_v24, 2  ;;  %v883_v59 = vshrl.u32 %v6769_v39, %v871_v23 }
  0x76   : > { %v885_v61 = vshll.u32 %v6769_v39, %v870_v3  ;;  %v886_v17 = vshrl.u32 %v6727_v47, %v871_v23  ;;  %vm889_vm13 = vcmp.lt.s32.totalorder %v4931_v46, 2  ;;  %vm745_vm14 = vcmp.eq.s32.totalorder %v4925_v24, 0 }
  0x77   : > { %v4222_v41 = vadd.s32 4294967294, %v512_v56  ;;  %v881_v7 = vor.u32 %v880_v58, %v879_v43  ;;  %vm890_vm0 = vcmp.lt.s32.totalorder %v4931_v46, 3  ;;  %vm891_vm1 = vcmp.lt.s32.totalorder %v4931_v46, 4 }
  0x78   : > { %v884_v38 = vor.u32 %v883_v59, %v882_v52  ;;  %v887_v25 = vor.u32 %v886_v17, %v885_v61  ;;  %v892_v12 = vsel %vm888_vm11, %v872_v44, %v875_v30  ;;  %v896_v16 = vsel %vm888_vm11, %v875_v30, %v878_v53 }
  0x79   : > { %vm742_vm3 = vweird.f32 %v4582_v5  ;;  %vm4969_vm4 = vcmp.le.f32.partialorder %v444_v13, 0.7853982  ;;  %vm4223_vm5 = vcmp.lt.s32.totalorder %v4222_v41, 0  ;;  %v893_v18 = vsel %vm891_vm1, %v881_v7, 2102212464 }
  0x7a   : > { %v900_v3 = vsel %vm888_vm11, %v878_v53, %v881_v7  ;;  %v763_v20 = vadd.s32 1, %v4232_v11  ;;  %v515_v21 = vsel %vm4223_vm5, 0, %v4222_v41  ;;  %v894_v23 = vsel %vm890_vm0, %v878_v53, %v893_v18 }
  0x7b   : > { %v897_v32 = vsel %vm891_vm1, %v884_v38, 920167782  ;;  %v901_v22 = vsel %vm891_vm1, %v887_v25, 1326507024  ;;  %v516_v40 = vsub.s32 32, %v515_v21  ;;  %v517_v63 = vshll.u32 %v4929_v62, %v515_v21 }
  0x7c   : > { %v520_v28 = vsub.s32 4294967266, %v515_v21  ;;  %v531_v13 = vsel %vm446_vm10, %v530_v27, %v4908_v55  ;;  %v895_v15 = vsel %vm889_vm13, %v892_v12, %v894_v23  ;;  %v898_v11 = vsel %vm890_vm0, %v881_v7, %v897_v32 }
  0x7d   : > { %v902_v26 = vsel %vm890_vm0, %v884_v38, %v901_v22  ;;  %vm764_vm6 = vcmp.gt.s32.totalorder %v763_v20, 0  ;;  %v518_v42 = vshrl.u32 %v500_v19, %v516_v40  ;;  %v899_v62 = vsel %vm889_vm13, %v896_v16, %v898_v11 }
  0x7e   : > { %v521_v43 = vadd.s32 127, %v520_v28  ;;  %v903_v44 = vsel %vm889_vm13, %v900_v3, %v902_v26  ;;  %v4991_v30 = vpop.eup %4439  ;;  %v4998_v53 = vmul.u32.u64.low %v4938_v51, %v899_v62  ;;  %v4999_v56 = vmul.u32.u64.high %v4938_v51, %v899_v62, %v4998_v53 }
  0x7f   : > { %v4994_v55 = vmul.u32.u64.low %v4938_v51, %v903_v44  ;;  %v4995_v27 = vmul.u32.u64.high %v4938_v51, %v903_v44, %v4994_v55  ;;  %v5002_v58 = vpop.eup %4441  ;;  %v6709_v19 = vxor.u32 2147483648, %v4991_v30  ;;  %v519_v52 = vor.u32 %v518_v42, %v517_v63 }
  0x80   : > { %v522_v59 = vshll.u32 %v521_v43, 23  ;;  %v765_v61 = vsel %vm764_vm6, %v763_v20, 0  ;;  %vm744_vm7 = vcmp.lt.s32.totalorder %v4925_v24, 2  ;;  %v6710_v46 = vxor.u32 2147483648, %v5002_v58 }
  0x81   : > { %v760_v17 = vand.u32 8388607, %v753_v50  ;;  %v767_v41 = vand.u32 31, %v765_v61  ;;  %v750_v7 = vsel %vm748_vm12, %v6709_v19, %v5002_v58  ;;  %v526_v25 = vcvt.s32.f32 %v519_v52 }
  0x82   : > { %v523_v38 = vor.u32 4788187, %v522_v59  ;;  %v911_v12 = vmul.u32 %v4938_v51, %v895_v15  ;;  %v747_v16 = vsel %vm745_vm14, %v4991_v30, %v6710_v46  ;;  %v5022_v18 = vsel %vm4969_vm4, 0, %v531_v13 }
  0x83   : > { %vm913_vm8 = vc.u32 %v4995_v27, %v4998_v53  ;;  %v914_v3 = vadd.s32 1, %v4999_v56  ;;  %v751_v20 = vsel %vm744_vm7, %v747_v16, %v750_v7  ;;  %v766_v23 = vshrl.u32 %v765_v61, 5 }
  0x84   : > { %v524_v21 = vand.u32 2147483647, %v523_v38  ;;  %v768_v32 = vsub.s32 32, %v767_v41  ;;  %v752_v51 = vsel %vm742_vm3, nan, %v751_v20  ;;  %v770_v24 = vshll.u32 %v6729_v31, %v767_v41 }
  0x85   : > { %v915_v22 = vsel %vm913_vm8, %v914_v3, %v4999_v56  ;;  %v773_v40 = vshll.u32 %v6720_v33, %v767_v41  ;;  %3671 = vperm.xlu1 %4430, %v752_v51   ;;  %v776_v15 = vshll.u32 %v6718_v35, %v767_v41  ;;  %v779_v42 = vshll.u32 %v6716_v37, %v767_v41 }
  0x86   : > { %v527_v63 = vmul.f32 %v526_v25, %v524_v21  ;;  %v916_v28 = vadd.s32 %v915_v22, %v911_v12  ;;  %v771_v13 = vshrl.u32 %v6720_v33, %v768_v32  ;;  %v774_v11 = vshrl.u32 %v6718_v35, %v768_v32 }
  0x87   : > { %v777_v26 = vshrl.u32 %v6716_v37, %v768_v32  ;;  %v780_v43 = vshrl.u32 %v6769_v39, %v768_v32  ;;  %v761_v55 = vor.u32 8388608, %v760_v17  ;;  %v782_v56 = vshll.u32 %v6769_v39, %v767_v41 }
  0x88   : > { %v528_v62 = vxor.u32 2147483648, %v527_v63  ;;  %v917_v44 = vadd.s32 536870912, %v916_v28  ;;  %v772_v52 = vor.u32 %v771_v13, %v770_v24  ;;  %v775_v59 = vor.u32 %v774_v11, %v773_v40 }
  0x89   : > { %v781_v61 = vor.u32 %v780_v43, %v779_v42  ;;  %v783_v7 = vshrl.u32 %v6727_v47, %v768_v32  ;;  %v778_v12 = vor.u32 %v777_v26, %v776_v15  ;;  %vm785_vm9 = vcmp.lt.s32.totalorder %v766_v23, 1  ;;  %v5059_v26 = vld [vmem:[%s4571_s11 + $0x38] sm:$0xff] }
  0x8a   : > { %v529_v38 = vsel %vm446_vm10, %v528_v62, %v527_v63  ;;  %v5042_v25 = vshrl.u32 %v917_v44, 30  ;;  %v769_v17 = vshrl.u32 %v6729_v31, %v768_v32  ;;  %vm787_vm11 = vcmp.lt.s32.totalorder %v766_v23, 3  ;;  %6813 = vst [vmem:[#allocation9_spill] sm:$0xff] %v5059_v26 }
  0x8b   : > { %v532_v16 = vsel %vm4969_vm4, %v4655_v54, %v529_v38  ;;  %vm788_vm12 = vcmp.lt.s32.totalorder %v766_v23, 4  ;;  %v784_v3 = vor.u32 %v783_v7, %v782_v56  ;;  %vm786_vm13 = vcmp.lt.s32.totalorder %v766_v23, 2 }
  0x8c   : > { %4443 = vcosq.f32 %v532_v16  ;;  %v919_v41 = vshll.u32 %v5042_v25, 30  ;;  %v793_v20 = vsel %vm785_vm9, %v772_v52, %v775_v59  ;;  %v794_v21 = vsel %vm788_vm12, %v781_v61, 920167782 }
  0x8d   : > { %4445 = vsinq.f32 %v532_v16  ;;  %v801_v51 = vshll.u32 %v761_v55, 8  ;;  %v790_v9 = vsel %vm788_vm12, %v778_v12, 2102212464  ;;  %v795_v24 = vsel %vm787_vm11, %v778_v12, %v794_v21 }
  0x8e   : > { %v920_v22 = vsub.s32 %v916_v28, %v919_v41  ;;  %v537_v32 = vand.u32 3, %v5022_v18  ;;  %v796_v40 = vsel %vm786_vm13, %v793_v20, %v795_v24  ;;  %v789_v13 = vsel %vm785_vm9, %v769_v17, %v772_v52 }
  0x8f   : > { %v797_v15 = vsel %vm785_vm9, %v775_v59, %v778_v12  ;;  %v798_v11 = vsel %vm788_vm12, %v784_v3, 1326507024  ;;  %v791_v42 = vsel %vm787_vm11, %v775_v59, %v790_v9  ;;  %v1065_v56 = vand.u32 2139095040, %v5059_v26 }
  0x90   : > { %v922_v63 = vsub.s32 0, %v920_v22  ;;  %v799_v28 = vsel %vm787_vm11, %v781_v61, %v798_v11  ;;  %v5063_v43 = vmul.u32.u64.low %v801_v51, %v796_v40  ;;  %v5064_v62 = vmul.u32.u64.high %v801_v51, %v796_v40, %v5063_v43 }
  0x91   : > { %v800_v55 = vsel %vm786_vm13, %v797_v15, %v799_v28  ;;  %v792_v7 = vsel %vm786_vm13, %v789_v13, %v791_v42  ;;  %vm536_vm10 = vweird.f32 %v4655_v54  ;;  %vm538_vm14 = vcmp.lt.s32.totalorder %v537_v32, 2 }
  0x92   : > { %v4237_v44 = vmin.u32 %v922_v63, %v920_v22  ;;  %v5070_v38 = vmul.u32.u64.low %v801_v51, %v800_v55  ;;  %v5071_v12 = vmul.u32.u64.high %v801_v51, %v800_v55, %v5070_v38  ;;  %v811_v59 = vadd.s32 1, %v5064_v62 }
  0x93   : > { %v1066_v61 = vshrl.u32 %v1065_v56, 23  ;;  %vm539_vm0 = vcmp.eq.s32.totalorder %v537_v32, 0  ;;  %vm542_vm1 = vcmp.eq.s32.totalorder %v537_v32, 2  ;;  %v912_v17 = vadd.s32 %v4998_v53, %v4995_v27 }
  0x94   : > { %v924_v52 = vclz %v4237_v44  ;;  %v808_v20 = vmul.u32 %v801_v51, %v792_v7  ;;  %v1062_v21 = vand.u32 2147483647, %v5059_v26  ;;  %v942_v40 = vsub.s32 4, %v5042_v25 }
  0x95   : > { %v4244_v9 = vadd.s32 4294967169, %v1066_v61  ;;  %vm810_vm5 = vc.u32 %v5071_v12, %v5063_v43  ;;  %vm858_vm7 = vcmp.lt.s32.totalorder %v4842_v0, 0  ;;  %vm5103_vm8 = vcmp.le.f32.partialorder %v856_v34, 0.7853982 }
  0x96   : > { %v5075_v16 = vpop.eup %4443  ;;  %v4238_v41 = vadd.s32 4294967294, %v924_v52  ;;  %v812_v63 = vsel %vm810_vm5, %v811_v59, %v5064_v62  ;;  %v1069_v55 = vand.u32 8388607, %v1062_v21 }
  0x97   : > { %v5079_v3 = vpop.eup %4445  ;;  %v6711_v23 = vxor.u32 2147483648, %v5075_v16  ;;  %v1072_v13 = vadd.s32 1, %v4244_v9  ;;  %v813_v44 = vadd.s32 %v812_v63, %v808_v20 }
  0x98   : > { %v6712_v24 = vxor.u32 2147483648, %v5079_v3  ;;  %vm4239_vm4 = vcmp.lt.s32.totalorder %v4238_v41, 0 }
  0x99   : > { %v544_v27 = vsel %vm542_vm1, %v6711_v23, %v5079_v3  ;;  %v927_v53 = vsel %vm4239_vm4, 0, %v4238_v41  ;;  %vm1073_vm6 = vcmp.gt.s32.totalorder %v1072_v13, 0  ;;  %v814_v38 = vadd.s32 536870912, %v813_v44 }
  0x9a   : > { %v541_v51 = vsel %vm539_vm0, %v5075_v16, %v6712_v24  ;;  %v928_v15 = vsub.s32 32, %v927_v53  ;;  %v929_v11 = vshll.u32 %v920_v22, %v927_v53  ;;  %v932_v42 = vsub.s32 4294967266, %v927_v53 }
  0x9b   : > { %v545_v28 = vsel %vm538_vm14, %v541_v51, %v544_v27  ;;  %v1074_v7 = vsel %vm1073_vm6, %v1072_v13, 0  ;;  %v5110_v41 = vshrl.u32 %v814_v38, 30  ;;  %v1070_v53 = vor.u32 8388608, %v1069_v55  ;;  %v5113_v13 = vld [vmem:[%s4571_s11 + $0x30] sm:$0xff] }
  0x9c   : > { %v546_v56 = vsel %vm536_vm10, nan, %v545_v28  ;;  %v930_v62 = vshrl.u32 %v912_v17, %v928_v15  ;;  %v933_v52 = vadd.s32 127, %v932_v42  ;;  %v1076_v59 = vand.u32 31, %v1074_v7  ;;  %6816 = vst [vmem:[#allocation10_spill] sm:$0xff] %v5113_v13 }
  0x9d   : > { %3661 = vperm.xlu0 %4429, %v546_v56   ;;  %v943_v17 = vsel %vm858_vm7, %v942_v40, %v5042_v25  ;;  %v1075_v63 = vshrl.u32 %v1074_v7, 5  ;;  %v816_v51 = vshll.u32 %v5110_v41, 30  ;;  %vm948_vm1 = vweird.f32 %v4842_v0 }
  0x9e   : > { %v931_v22 = vor.u32 %v930_v62, %v929_v11  ;;  %v934_v32 = vshll.u32 %v933_v52, 23  ;;  %v1077_v20 = vsub.s32 32, %v1076_v59  ;;  %v1079_v34 = vshll.u32 %v6729_v31, %v1076_v59 }
  0x9f   : > { %v1082_v11 = vshll.u32 %v6720_v33, %v1076_v59  ;;  %v1088_v40 = vshll.u32 %v6716_v37, %v1076_v59  ;;  %v5122_v56 = vsub.s32 %v813_v44, %v816_v51  ;;  %v1085_v55 = vshll.u32 %v6718_v35, %v1076_v59 }
  0xa0   : > { %v935_v9 = vor.u32 4788187, %v934_v32  ;;  %v938_v27 = vcvt.s32.f32 %v931_v22  ;;  %v1080_v15 = vshrl.u32 %v6720_v33, %v1077_v20  ;;  %v1083_v25 = vshrl.u32 %v6718_v35, %v1077_v20 }
  0xa1   : > { %v1089_v28 = vshrl.u32 %v6769_v39, %v1077_v20  ;;  %v1086_v62 = vshrl.u32 %v6716_v37, %v1077_v20  ;;  %v962_v52 = vand.u32 2139095040, %v5113_v13  ;;  %v5129_v38 = vsel %vm5103_vm8, 0, %v943_v17 }
  0xa2   : > { %v936_v42 = vand.u32 2147483647, %v935_v9  ;;  %v1091_v22 = vshll.u32 %v6769_v39, %v1076_v59  ;;  %v5132_v32 = vshll.u32 %v1070_v53, 8  ;;  %v819_v9 = vsub.s32 0, %v5122_v56 }
  0xa3   : > { %v1081_v4 = vor.u32 %v1080_v15, %v1079_v34  ;;  %v1084_v44 = vor.u32 %v1083_v25, %v1082_v11  ;;  %v1092_v51 = vshrl.u32 %v6727_v47, %v1077_v20  ;;  %v1078_v49 = vshrl.u32 %v6729_v31, %v1077_v20 }
  0xa4   : > { %v939_v7 = vmul.f32 %v938_v27, %v936_v42  ;;  %v1090_v48 = vor.u32 %v1089_v28, %v1088_v40  ;;  %vm1094_vm9 = vcmp.lt.s32.totalorder %v1075_v63, 1  ;;  %v4233_v27 = vmin.u32 %v819_v9, %v5122_v56 }
  0xa5   : > { %v1087_v42 = vor.u32 %v1086_v62, %v1085_v55  ;;  %vm1095_vm11 = vcmp.lt.s32.totalorder %v1075_v63, 2  ;;  %v963_v17 = vshrl.u32 %v962_v52, 23  ;;  %v1093_v53 = vor.u32 %v1092_v51, %v1091_v22 }
  0xa6   : > { %v940_v10 = vxor.u32 2147483648, %v939_v7  ;;  %vm1096_vm12 = vcmp.lt.s32.totalorder %v1075_v63, 3  ;;  %vm1097_vm13 = vcmp.lt.s32.totalorder %v1075_v63, 4  ;;  %v821_v15 = vclz %v4233_v27 }
  0xa7   : > { %v1099_v11 = vsel %vm1097_vm13, %v1087_v42, 2102212464  ;;  %v1102_v20 = vsel %vm1094_vm9, %v1081_v4, %v1084_v44  ;;  %v809_v25 = vadd.s32 %v5063_v43, %v5071_v12  ;;  %v1098_v40 = vsel %vm1094_vm9, %v1078_v49, %v1081_v4 }
  0xa8   : > { %v941_v59 = vsel %vm858_vm7, %v940_v10, %v939_v7  ;;  %v1103_v28 = vsel %vm1097_vm13, %v1090_v48, 920167782  ;;  %v4234_v10 = vadd.s32 4294967294, %v821_v15  ;;  %v1106_v62 = vsel %vm1094_vm9, %v1084_v44, %v1087_v42 }
  0xa9   : > { %v944_v34 = vsel %vm5103_vm8, %v4842_v0, %v941_v59  ;;  %v1104_v55 = vsel %vm1096_vm12, %v1087_v42, %v1103_v28  ;;  %v1100_v61 = vsel %vm1096_vm12, %v1084_v44, %v1099_v11  ;;  %v1107_v7 = vsel %vm1097_vm13, %v1093_v53, 1326507024 }
  0xaa   : > { %4447 = vcosq.f32 %v944_v34  ;;  %v1105_v52 = vsel %vm1095_vm11, %v1102_v20, %v1104_v55  ;;  %v4240_v22 = vadd.s32 4294967169, %v963_v17  ;;  %vm4235_vm14 = vcmp.lt.s32.totalorder %v4234_v10, 0 }
  0xab   : > { %4449 = vsinq.f32 %v944_v34  ;;  %v1108_v9 = vsel %vm1096_vm12, %v1090_v48, %v1107_v7  ;;  %v5153_v43 = vmul.u32.u64.low %v5132_v32, %v1105_v52  ;;  %v5154_v12 = vmul.u32.u64.high %v5132_v32, %v1105_v52, %v5153_v43 }
  0xac   : > { %v949_v4 = vand.u32 3, %v5129_v38  ;;  %v824_v49 = vsel %vm4235_vm14, 0, %v4234_v10  ;;  %v1109_v51 = vsel %vm1095_vm11, %v1106_v62, %v1108_v9  ;;  %v969_v27 = vadd.s32 1, %v4240_v22 }
  0xad   : > { %v825_v42 = vsub.s32 32, %v824_v49  ;;  %v826_v44 = vshll.u32 %v5122_v56, %v824_v49  ;;  %v829_v59 = vsub.s32 4294967266, %v824_v49  ;;  %v1101_v17 = vsel %vm1095_vm11, %v1098_v40, %v1100_v61 }
  0xae   : > { %v5162_v53 = vmul.u32.u64.low %v5132_v32, %v1109_v51  ;;  %v5163_v48 = vmul.u32.u64.high %v5132_v32, %v1109_v51, %v5162_v53  ;;  %v6722_v34 = vand.u32 2147483647, %v5113_v13  ;;  %vm970_vm0 = vcmp.gt.s32.totalorder %v969_v27, 0 }
  0xaf   : > { %v827_v15 = vshrl.u32 %v809_v25, %v825_v42  ;;  %v830_v11 = vadd.s32 127, %v829_v59  ;;  %v1120_v20 = vadd.s32 1, %v5154_v12  ;;  %v971_v28 = vsel %vm970_vm0, %v969_v27, 0 }
  0xb0   : > { %vm755_vm4 = vcmp.lt.s32.totalorder %v4884_v57, 0  ;;  %v1117_v56 = vmul.u32 %v5132_v32, %v1101_v17  ;;  %v973_v63 = vand.u32 31, %v971_v28  ;;  %vm950_vm5 = vcmp.lt.s32.totalorder %v949_v4, 2 }
  0xb1   : > { %vm951_vm6 = vcmp.eq.s32.totalorder %v949_v4, 0  ;;  %vm5172_vm7 = vcmp.le.f32.partialorder %v753_v50, 0.7853982  ;;  %v828_v25 = vor.u32 %v827_v15, %v826_v44  ;;  %v831_v10 = vshll.u32 %v830_v11, 23 }
  0xb2   : > { %vm954_vm8 = vcmp.eq.s32.totalorder %v949_v4, 2  ;;  %vm1119_vm9 = vc.u32 %v5163_v48, %v5153_v43  ;;  %v966_v32 = vand.u32 8388607, %v6722_v34  ;;  %v974_v62 = vsub.s32 32, %v973_v63 }
  0xb3   : > { %v832_v50 = vor.u32 4788187, %v831_v10  ;;  %v835_v7 = vcvt.s32.f32 %v828_v25  ;;  %v1121_v22 = vsel %vm1119_vm9, %v1120_v20, %v5154_v12  ;;  %v839_v49 = vsub.s32 4, %v5110_v41 }
  0xb4   : > { %v5176_v55 = vpop.eup %4447  ;;  %v1122_v51 = vadd.s32 %v1121_v22, %v1117_v56  ;;  %v5188_v27 = vshrl.u32 %v971_v28, 5  ;;  %v976_v59 = vshll.u32 %v6729_v31, %v973_v63  ;;  %v977_v17 = vshrl.u32 %v6720_v33, %v974_v62 }
  0xb5   : > { %v5182_v61 = vpop.eup %4449  ;;  %v6707_v52 = vxor.u32 2147483648, %v5176_v55  ;;  %v833_v44 = vand.u32 2147483647, %v832_v50  ;;  %v979_v15 = vshll.u32 %v6720_v33, %v973_v63  ;;  %v980_v11 = vshrl.u32 %v6718_v35, %v974_v62 }
  0xb6   : > { %v6708_v9 = vxor.u32 2147483648, %v5182_v61  ;;  %v1123_v53 = vadd.s32 536870912, %v1122_v51  ;;  %v982_v56 = vshll.u32 %v6718_v35, %v973_v63  ;;  %v983_v25 = vshrl.u32 %v6716_v37, %v974_v62 }
  0xb7   : > { %v956_v42 = vsel %vm954_vm8, %v6707_v52, %v5182_v61  ;;  %v836_v28 = vmul.f32 %v835_v7, %v833_v44  ;;  %v985_v22 = vshll.u32 %v6716_v37, %v973_v63  ;;  %v986_v52 = vshrl.u32 %v6769_v39, %v974_v62 }
  0xb8   : > { %v953_v12 = vsel %vm951_vm6, %v5176_v55, %v6708_v9  ;;  %v5206_v50 = vshrl.u32 %v1123_v53, 30  ;;  %v967_v19 = vor.u32 8388608, %v966_v32  ;;  %v988_v4 = vshll.u32 %v6769_v39, %v973_v63 }
  0xb9   : > { %v957_v20 = vsel %vm950_vm5, %v953_v12, %v956_v42  ;;  %v837_v9 = vxor.u32 2147483648, %v836_v28  ;;  %v989_v7 = vshrl.u32 %v6727_v47, %v974_v62  ;;  %v840_v42 = vsel %vm755_vm4, %v839_v49, %v5110_v41 }
  0xba   : > { %v958_v10 = vsel %vm948_vm1, nan, %v957_v20  ;;  %v1125_v44 = vshll.u32 %v5206_v50, 30  ;;  %v975_v12 = vshrl.u32 %v6729_v31, %v974_v62  ;;  %v978_v53 = vor.u32 %v977_v17, %v976_v59  ;;  %v5218_v20 = vld [vmem:[%s4571_s11 + $0x48] sm:$0xff] }
  0xbb   : > { %3681 = vperm.xlu1 %4430, %v958_v10   ;;  %6819 = vst [vmem:[#allocation11_spill] sm:$0xff] %v5218_v20  ;;  %v838_v10 = vsel %vm755_vm4, %v837_v9, %v836_v28  ;;  %v981_v46 = vor.u32 %v980_v11, %v979_v15  ;;  %v984_v32 = vor.u32 %v983_v25, %v982_v56  ;;  %vm991_vm11 = vcmp.lt.s32.totalorder %v5188_v27, 1 }
  0xbc   : > { %v987_v23 = vor.u32 %v986_v52, %v985_v22  ;;  %v841_v63 = vsel %vm5172_vm7, %v4884_v57, %v838_v10  ;;  %v5225_v24 = vsub.s32 %v1122_v51, %v1125_v44  ;;  %vm994_vm12 = vcmp.lt.s32.totalorder %v5188_v27, 4 }
  0xbd   : > { %v5231_v41 = vsel %vm5172_vm7, 0, %v840_v42  ;;  %4451 = vcosq.f32 %v841_v63  ;;  %v990_v62 = vor.u32 %v989_v7, %v988_v4  ;;  %v1271_v9 = vand.u32 2139095040, %v5218_v20 }
  0xbe   : > { %6820 = vst [vmem:[#allocation12_spill] sm:$0xff] %v5231_v41  ;;  %4453 = vsinq.f32 %v841_v63  ;;  %v1128_v52 = vsub.s32 0, %v5225_v24  ;;  %vm993_vm13 = vcmp.lt.s32.totalorder %v5188_v27, 3  ;;  %v996_v49 = vsel %vm994_vm12, %v984_v32, 2102212464 }
  0xbf   : > { %vm992_vm14 = vcmp.lt.s32.totalorder %v5188_v27, 2  ;;  %v999_v51 = vsel %vm991_vm11, %v978_v53, %v981_v46  ;;  %v1000_v40 = vsel %vm994_vm12, %v987_v23, 920167782  ;;  %v1007_v59 = vshll.u32 %v967_v19, 8 }
  0xc0   : > { %v846_v17 = vand.u32 3, %v5231_v41  ;;  %v4245_v15 = vmin.u32 %v1128_v52, %v5225_v24  ;;  %v995_v11 = vsel %vm991_vm11, %v975_v12, %v978_v53  ;;  %v1003_v28 = vsel %vm991_vm11, %v981_v46, %v984_v32 }
  0xc1   : > { %v997_v56 = vsel %vm993_vm13, %v981_v46, %v996_v49  ;;  %v1001_v25 = vsel %vm993_vm13, %v984_v32, %v1000_v40  ;;  %v1004_v22 = vsel %vm994_vm12, %v990_v62, 1326507024  ;;  %v1272_v19 = vshrl.u32 %v1271_v9, 23 }
  0xc2   : > { %vm6761_vm0 = vweird.f32 %v4884_v57  ;;  %v1130_v4 = vclz %v4245_v15  ;;  %v1002_v7 = vsel %vm992_vm14, %v999_v51, %v1001_v25  ;;  %v1005_v42 = vsel %vm993_vm13, %v987_v23, %v1004_v22 }
  0xc3   : > { %v1006_v44 = vsel %vm992_vm14, %v1003_v28, %v1005_v42  ;;  %v5262_v46 = vmul.u32.u64.low %v1007_v59, %v1002_v7  ;;  %v5263_v12 = vmul.u32.u64.high %v1007_v59, %v1002_v7, %v5262_v46  ;;  %v4252_v53 = vadd.s32 4294967169, %v1272_v19 }
  0xc4   : > { %v4246_v10 = vadd.s32 4294967294, %v1130_v4  ;;  %v998_v32 = vsel %vm992_vm14, %v995_v11, %v997_v56  ;;  %v5268_v63 = vmul.u32.u64.low %v1007_v59, %v1006_v44  ;;  %v5269_v62 = vmul.u32.u64.high %v1007_v59, %v1006_v44, %v5268_v63 }
  0xc5   : > { %vm848_vm4 = vcmp.eq.s32.totalorder %v846_v17, 0  ;;  %vm851_vm5 = vcmp.eq.s32.totalorder %v846_v17, 2  ;;  %vm1064_vm6 = vcmp.lt.s32.totalorder %v5059_v26, 0  ;;  %v1278_v23 = vadd.s32 1, %v4252_v53 }
  0xc6   : > { %v1118_v9 = vadd.s32 %v5153_v43, %v5163_v48  ;;  %vm4247_vm7 = vcmp.lt.s32.totalorder %v4246_v10, 0  ;;  %v1148_v52 = vsub.s32 4, %v5206_v50  ;;  %v6715_v49 = vand.u32 2147483647, %v5218_v20 }
  0xc7   : > { %v5276_v51 = vpop.eup %4451  ;;  %v1133_v27 = vsel %vm4247_vm7, 0, %v4246_v10  ;;  %v1014_v40 = vmul.u32 %v1007_v59, %v998_v32  ;;  %v1017_v15 = vadd.s32 1, %v5263_v12  ;;  %vm1279_vm8 = vcmp.gt.s32.totalorder %v1278_v23, 0 }
  0xc8   : > { %6821 = vst [vmem:[#allocation13_spill] sm:$0xff] %v5276_v51  ;;  %v5279_v11 = vpop.eup %4453  ;;  %v6713_v28 = vxor.u32 2147483648, %v5276_v51  ;;  %vm5284_vm9 = vcmp.le.f32.partialorder %v1062_v21, 0.7853982  ;;  %v1134_v48 = vsub.s32 32, %v1133_v27  ;;  %v1135_v56 = vshll.u32 %v5225_v24, %v1133_v27 }
  0xc9   : > { %6822 = vst [vmem:[#allocation14_spill] sm:$0xff] %v5279_v11  ;;  %v1138_v25 = vsub.s32 4294967266, %v1133_v27  ;;  %vm847_vm11 = vcmp.lt.s32.totalorder %v846_v17, 2  ;;  %v6714_v59 = vxor.u32 2147483648, %v5279_v11  ;;  %vm1016_vm12 = vc.u32 %v5269_v62, %v5262_v46 }
  0xca   : > { %v1280_v22 = vsel %vm1279_vm8, %v1278_v23, 0  ;;  %v853_v19 = vsel %vm851_vm5, %v6713_v28, %v5279_v11  ;;  %v1136_v21 = vshrl.u32 %v1118_v9, %v1134_v48  ;;  %v1018_v7 = vsel %vm1016_vm12, %v1017_v15, %v5263_v12 }
  0xcb   : > { %v1139_v4 = vadd.s32 127, %v1138_v25  ;;  %v850_v24 = vsel %vm848_vm4, %v5276_v51, %v6714_v59  ;;  %v1019_v42 = vadd.s32 %v1018_v7, %v1014_v40  ;;  %v1275_v44 = vand.u32 8388607, %v6715_v49 }
  0xcc   : > { %v1282_v53 = vand.u32 31, %v1280_v22  ;;  %v854_v10 = vsel %vm847_vm11, %v850_v24, %v853_v19  ;;  %v1137_v32 = vor.u32 %v1136_v21, %v1135_v56  ;;  %v1149_v23 = vsel %vm1064_vm6, %v1148_v52, %v5206_v50  ;;  %v5318_v21 = vld [vmem:[%s4571_s11 + $0x40] sm:$0xff] }
  0xcd   : > { %v1140_v63 = vshll.u32 %v1139_v4, 23  ;;  %v855_v12 = vsel %vm6761_vm0, nan, %v854_v10  ;;  %v1020_v9 = vadd.s32 536870912, %v1019_v42  ;;  %v5308_v27 = vshrl.u32 %v1280_v22, 5  ;;  %6825 = vst [vmem:[#allocation15_spill] sm:$0xff] %v5318_v21 }
  0xce   : > { %v1283_v17 = vsub.s32 32, %v1282_v53  ;;  %3676 = vperm.xlu0 %4429, %v855_v12   ;;  %v1144_v15 = vcvt.s32.f32 %v1137_v32  ;;  %v1285_v48 = vshll.u32 %v6729_v31, %v1282_v53  ;;  %v1288_v56 = vshll.u32 %v6720_v33, %v1282_v53 }
  0xcf   : > { %v1141_v40 = vor.u32 4788187, %v1140_v63  ;;  %v5312_v25 = vshrl.u32 %v1020_v9, 30  ;;  %v1291_v52 = vshll.u32 %v6718_v35, %v1282_v53  ;;  %v1294_v7 = vshll.u32 %v6716_v37, %v1282_v53 }
  0xd0   : > { %v1286_v19 = vshrl.u32 %v6720_v33, %v1283_v17  ;;  %v1289_v50 = vshrl.u32 %v6718_v35, %v1283_v17  ;;  %v1292_v4 = vshrl.u32 %v6716_v37, %v1283_v17  ;;  %v1295_v24 = vshrl.u32 %v6769_v39, %v1283_v17 }
  0xd1   : > { %v1142_v22 = vand.u32 2147483647, %v1141_v40  ;;  %v5325_v10 = vsel %vm5284_vm9, 0, %v1149_v23  ;;  %v1022_v32 = vshll.u32 %v5312_v25, 30  ;;  %v1276_v63 = vor.u32 8388608, %v1275_v44 }
  0xd2   : > { %v1284_v9 = vshrl.u32 %v6729_v31, %v1283_v17  ;;  %v1297_v28 = vshll.u32 %v6769_v39, %v1282_v53  ;;  %v1168_v40 = vand.u32 2139095040, %v5318_v21  ;;  %v1287_v49 = vor.u32 %v1286_v19, %v1285_v48 }
  0xd3   : > { %v1145_v12 = vmul.f32 %v1144_v15, %v1142_v22  ;;  %v5331_v59 = vsub.s32 %v1019_v42, %v1022_v32  ;;  %v1290_v37 = vor.u32 %v1289_v50, %v1288_v56  ;;  %v1298_v35 = vshrl.u32 %v6727_v47, %v1283_v17 }
  0xd4   : > { %v1293_v34 = vor.u32 %v1292_v4, %v1291_v52  ;;  %v1296_v23 = vor.u32 %v1295_v24, %v1294_v7  ;;  %vm1300_vm13 = vcmp.lt.s32.totalorder %v5308_v27, 1  ;;  %vm961_vm14 = vcmp.lt.s32.totalorder %v5113_v13, 0 }
  0xd5   : > { %v1146_v33 = vxor.u32 2147483648, %v1145_v12  ;;  %v1025_v44 = vsub.s32 0, %v5331_v59  ;;  %vm1301_vm4 = vcmp.lt.s32.totalorder %v5308_v27, 2  ;;  %vm1303_vm5 = vcmp.lt.s32.totalorder %v5308_v27, 4 }
  0xd6   : > { %v1316_v53 = vshll.u32 %v1276_v63, 8  ;;  %v1299_v15 = vor.u32 %v1298_v35, %v1297_v28  ;;  %vm1302_vm7 = vcmp.lt.s32.totalorder %v5308_v27, 3  ;;  %v1305_v17 = vsel %vm1303_vm5, %v1293_v34, 2102212464 }
  0xd7   : > { %v1147_v42 = vsel %vm1064_vm6, %v1146_v33, %v1145_v12  ;;  %v4241_v56 = vmin.u32 %v1025_v44, %v5331_v59  ;;  %v1304_v19 = vsel %vm1300_vm13, %v1284_v9, %v1287_v49  ;;  %v1308_v50 = vsel %vm1300_vm13, %v1287_v49, %v1290_v37 }
  0xd8   : > { %v1150_v48 = vsel %vm5284_vm9, %v5059_v26, %v1147_v42  ;;  %v6826_v33 = vand.u32 2147483647, %v5113_v13  ;;  %v1306_v28 = vsel %vm1302_vm7, %v1290_v37, %v1305_v17  ;;  %v1309_v43 = vsel %vm1303_vm5, %v1296_v23, 920167782 }
  0xd9   : > { %4455 = vcosq.f32 %v1150_v48  ;;  %v1169_v52 = vshrl.u32 %v1168_v40, 23  ;;  %v1027_v22 = vclz %v4241_v56  ;;  %v1045_v4 = vsub.s32 4, %v5312_v25 }
  0xda   : > { %vm5354_vm6 = vcmp.le.f32.partialorder %v6826_v33, 0.7853982  ;;  %4457 = vsinq.f32 %v1150_v48  ;;  %v1310_v49 = vsel %vm1302_vm7, %v1293_v34, %v1309_v43  ;;  %v1307_v7 = vsel %vm1301_vm4, %v1304_v19, %v1306_v28 }
  0xdb   : > { %v1311_v24 = vsel %vm1301_vm4, %v1308_v50, %v1310_v49  ;;  %v1312_v32 = vsel %vm1300_vm13, %v1290_v37, %v1293_v34  ;;  %v1313_v63 = vsel %vm1303_vm5, %v1299_v15, 1326507024  ;;  %v4242_v12 = vadd.s32 4294967294, %v1027_v22  ;;  %v5395_v22 = vld [vmem:[%s4571_s11 + $0x58] sm:$0xff] }
  0xdc   : > { %v1314_v9 = vsel %vm1302_vm7, %v1296_v23, %v1313_v63  ;;  %v5375_v40 = vmul.u32.u64.low %v1316_v53, %v1311_v24  ;;  %v5376_v44 = vmul.u32.u64.high %v1316_v53, %v1311_v24, %v5375_v40  ;;  %v1155_v42 = vand.u32 3, %v5325_v10  ;;  %6829 = vst [vmem:[#allocation16_spill] sm:$0xff] %v5395_v22 }
  0xdd   : > { %v1315_v17 = vsel %vm1301_vm4, %v1312_v32, %v1314_v9  ;;  %v6724_v48 = vand.u32 2147483647, %v5318_v21  ;;  %v4248_v37 = vadd.s32 4294967169, %v1169_v52  ;;  %vm1154_vm8 = vweird.f32 %v5059_v26 }
  0xde   : > { %v1015_v34 = vadd.s32 %v5262_v46, %v5269_v62  ;;  %vm4243_vm9 = vcmp.lt.s32.totalorder %v4242_v12, 0  ;;  %v5386_v23 = vmul.u32.u64.low %v1316_v53, %v1315_v17  ;;  %v5387_v15 = vmul.u32.u64.high %v1316_v53, %v1315_v17, %v5386_v23 }
  0xdf   : > { %v1030_v56 = vsel %vm4243_vm9, 0, %v4242_v12  ;;  %v1046_v19 = vsel %vm961_vm14, %v1045_v4, %v5312_v25  ;;  %v1323_v27 = vmul.u32 %v1316_v53, %v1307_v7  ;;  %v1175_v50 = vadd.s32 1, %v4248_v37 }
  0xe0   : > { %v1031_v33 = vsub.s32 32, %v1030_v56  ;;  %v1032_v28 = vshll.u32 %v5331_v59, %v1030_v56  ;;  %v1035_v43 = vsub.s32 4294967266, %v1030_v56  ;;  %v1326_v52 = vadd.s32 1, %v5376_v44 }
  0xe1   : > { %vm1157_vm11 = vcmp.eq.s32.totalorder %v1155_v42, 0  ;;  %vm1160_vm12 = vcmp.eq.s32.totalorder %v1155_v42, 2  ;;  %vm1176_vm13 = vcmp.gt.s32.totalorder %v1175_v50, 0  ;;  %v6726_v46 = vand.u32 2147483647, %v5395_v22 }
  0xe2   : > { %v1033_v62 = vshrl.u32 %v1015_v34, %v1031_v33  ;;  %v1036_v49 = vadd.s32 127, %v1035_v43  ;;  %v5400_v25 = vsel %vm5354_vm6, 0, %v1046_v19  ;;  %vm1325_vm4 = vc.u32 %v5387_v15, %v5375_v40 }
  0xe3   : > { %6830 = vst [vmem:[#allocation17_spill] sm:$0xff] %v5400_v25  ;;  %v5404_v59 = vpop.eup %4455  ;;  %v1327_v53 = vsel %vm1325_vm4, %v1326_v52, %v5376_v44  ;;  %v1172_v4 = vand.u32 8388607, %v6724_v48  ;;  %v1177_v7 = vsel %vm1176_vm13, %v1175_v50, 0  ;;  %v1477_v24 = vand.u32 2139095040, %v5395_v22 }
  0xe4   : > { %v5410_v32 = vpop.eup %4457  ;;  %v6723_v63 = vxor.u32 2147483648, %v5404_v59  ;;  %v1034_v12 = vor.u32 %v1033_v62, %v1032_v28  ;;  %v1037_v9 = vshll.u32 %v1036_v49, 23  ;;  %v1328_v17 = vadd.s32 %v1327_v53, %v1323_v27 }
  0xe5   : > { %vm1156_vm5 = vcmp.lt.s32.totalorder %v1155_v42, 2  ;;  %v6725_v37 = vxor.u32 2147483648, %v5410_v32  ;;  %v5415_v34 = vand.u32 3, %v5400_v25  ;;  %v1179_v44 = vand.u32 31, %v1177_v7 }
  0xe6   : > { %v1162_v23 = vsel %vm1160_vm12, %v6723_v63, %v5410_v32  ;;  %v1038_v56 = vor.u32 4788187, %v1037_v9  ;;  %v1041_v19 = vcvt.s32.f32 %v1034_v12  ;;  %v1329_v50 = vadd.s32 536870912, %v1328_v17 }
  0xe7   : > { %v1159_v27 = vsel %vm1157_vm11, %v5404_v59, %v6725_v37  ;;  %v1173_v33 = vor.u32 8388608, %v1172_v4  ;;  %v1180_v28 = vsub.s32 32, %v1179_v44  ;;  %v5427_v43 = vand.u32 8388607, %v6726_v46 }
  0xe8   : > { %v1163_v52 = vsel %vm1156_vm5, %v1159_v27, %v1162_v23  ;;  %v1039_v62 = vand.u32 2147483647, %v1038_v56  ;;  %v5429_v49 = vshrl.u32 %v1329_v50, 30  ;;  %v1478_v53 = vshrl.u32 %v1477_v24, 23 }
  0xe9   : > { %v1164_v12 = vsel %vm1154_vm8, nan, %v1163_v52  ;;  %v1178_v9 = vshrl.u32 %v1177_v7, 5  ;;  %v1182_v63 = vshll.u32 %v6729_v31, %v1179_v44  ;;  %v6831_v48 = vmov 2475754826  }
  0xea   : > { %v1183_v42 = vshrl.u32 %v6831_v48, %v1180_v28  ;;  %3691 = vperm.xlu1 %4430, %v1164_v12   ;;  %v1042_v4 = vmul.f32 %v1041_v19, %v1039_v62  ;;  %v1331_v37 = vshll.u32 %v5429_v49, 30  ;;  %v1185_v46 = vshll.u32 %v6831_v48, %v1179_v44 }
  0xeb   : > { %v6832_v47 = vmov 2131351028   ;;  %v6833_v50 = vmov 2102212464   ;;  %v1192_v7 = vshrl.u32 %v6769_v39, %v1180_v28  ;;  %v5444_v57 = vshll.u32 %v1173_v33, 8 }
  0xec   : > { %v1186_v23 = vshrl.u32 %v6832_v47, %v1180_v28  ;;  %v1188_v56 = vshll.u32 %v6832_v47, %v1179_v44  ;;  %v1189_v24 = vshrl.u32 %v6833_v50, %v1180_v28  ;;  %v1191_v27 = vshll.u32 %v6833_v50, %v1179_v44 }
  0xed   : > { %v1043_v52 = vxor.u32 2147483648, %v1042_v4  ;;  %v5442_v31 = vsub.s32 %v1328_v17, %v1331_v37  ;;  %v4260_v19 = vadd.s32 4294967169, %v1478_v53  ;;  %v6834_v62 = vmov 683565275  }
  0xee   : > { %v1181_v12 = vshrl.u32 %v6834_v62, %v1180_v28  ;;  %v1184_v1 = vor.u32 %v1183_v42, %v1182_v63  ;;  %v1194_v51 = vshll.u32 %v6769_v39, %v1179_v44  ;;  %v6835_v11 = vmov 1326507024  }
  0xef   : > { %v1195_v2 = vshrl.u32 %v6835_v11, %v1180_v28  ;;  %v1044_v29 = vsel %vm961_vm14, %v1043_v52, %v1042_v4  ;;  %v1334_v6 = vsub.s32 0, %v5442_v31  ;;  %v1187_v25 = vor.u32 %v1186_v23, %v1185_v46 }
  0xf0   : > { %v1193_v60 = vor.u32 %v1192_v7, %v1191_v27  ;;  %v1047_v17 = vsel %vm5354_vm6, %v5113_v13, %v1044_v29  ;;  %v1190_v37 = vor.u32 %v1189_v24, %v1188_v56  ;;  %vm1197_vm7 = vcmp.lt.s32.totalorder %v1178_v9, 1 }
  0xf1   : > { %v1196_v33 = vor.u32 %v1195_v2, %v1194_v51  ;;  %4459 = vcosq.f32 %v1047_v17  ;;  %v4253_v63 = vmin.u32 %v1334_v6, %v5442_v31  ;;  %vm1199_vm9 = vcmp.lt.s32.totalorder %v1178_v9, 3 }
  0xf2   : > { %v1484_v44 = vadd.s32 1, %v4260_v19  ;;  %4461 = vsinq.f32 %v1047_v17  ;;  %vm1198_vm11 = vcmp.lt.s32.totalorder %v1178_v9, 2  ;;  %vm1200_vm12 = vcmp.lt.s32.totalorder %v1178_v9, 4 }
  0xf3   : > { %v1201_v28 = vsel %vm1197_vm7, %v1181_v12, %v1184_v1  ;;  %v1336_v53 = vclz %v4253_v63  ;;  %v1202_v42 = vsel %vm1200_vm12, %v1190_v37, 2102212464  ;;  %v1205_v46 = vsel %vm1197_vm7, %v1184_v1, %v1187_v25 }
  0xf4   : > { %v1206_v4 = vsel %vm1200_vm12, %v1193_v60, 920167782  ;;  %v1203_v23 = vsel %vm1199_vm9, %v1187_v25, %v1202_v42  ;;  %v1209_v35 = vsel %vm1197_vm7, %v1187_v25, %v1190_v37  ;;  %v1210_v2 = vsel %vm1200_vm12, %v1196_v33, 1326507024 }
  0xf5   : > { %v1207_v29 = vsel %vm1199_vm9, %v1190_v37, %v1206_v4  ;;  %v1324_v51 = vadd.s32 %v5375_v40, %v5387_v15  ;;  %v4254_v6 = vadd.s32 4294967294, %v1336_v53  ;;  %v1211_v24 = vsel %vm1199_vm9, %v1193_v60, %v1210_v2 }
  0xf6   : > { %v1208_v56 = vsel %vm1198_vm11, %v1205_v46, %v1207_v29  ;;  %v1204_v27 = vsel %vm1198_vm11, %v1201_v28, %v1203_v23  ;;  %v1212_v7 = vsel %vm1198_vm11, %v1209_v35, %v1211_v24  ;;  %vm1485_vm6 = vcmp.gt.s32.totalorder %v1484_v44, 0 }
  0xf7   : > { %v5465_v1 = vmul.u32.u64.low %v5444_v57, %v1208_v56  ;;  %v5466_v52 = vmul.u32.u64.high %v5444_v57, %v1208_v56, %v5465_v1  ;;  %vm4255_vm14 = vcmp.lt.s32.totalorder %v4254_v6, 0  ;;  %vm6760_vm13 = vweird.f32 %v5113_v13 }
  0xf8   : > { %v5470_v25 = vmul.u32.u64.low %v5444_v57, %v1212_v7  ;;  %v5471_v19 = vmul.u32.u64.high %v5444_v57, %v1212_v7, %v5470_v25  ;;  %vm1053_vm4 = vcmp.lt.s32.totalorder %v5415_v34, 2  ;;  %v1339_v60 = vsel %vm4255_vm14, 0, %v4254_v6 }
  0xf9   : > { %v1486_v40 = vsel %vm1485_vm6, %v1484_v44, 0  ;;  %v1340_v15 = vsub.s32 32, %v1339_v60  ;;  %v1341_v9 = vshll.u32 %v5442_v31, %v1339_v60  ;;  %v1344_v12 = vsub.s32 4294967266, %v1339_v60 }
  0xfa   : > { %v1220_v17 = vmul.u32 %v5444_v57, %v1204_v27  ;;  %vm1054_vm5 = vcmp.eq.s32.totalorder %v5415_v34, 0  ;;  %vm1057_vm7 = vcmp.eq.s32.totalorder %v5415_v34, 2  ;;  %vm1270_vm9 = vcmp.lt.s32.totalorder %v5218_v20, 0 }
  0xfb   : > { %v1223_v37 = vadd.s32 1, %v5466_v52  ;;  %v1488_v33 = vand.u32 31, %v1486_v40  ;;  %v5481_v63 = vpop.eup %4459  ;;  %v1342_v28 = vshrl.u32 %v1324_v51, %v1340_v15  ;;  %v1345_v53 = vadd.s32 127, %v1344_v12 }
  0xfc   : > { %6836 = vst [vmem:[#allocation18_spill] sm:$0xff] %v5481_v63  ;;  %vm1222_vm11 = vc.u32 %v5471_v19, %v5465_v1  ;;  %v1482_v31 = vor.u32 8388608, %v5427_v43  ;;  %v5486_v44 = vpop.eup %4461  ;;  %v6745_v57 = vxor.u32 2147483648, %v5481_v63  ;;  %v1354_v42 = vsub.s32 4, %v5429_v49 }
  0xfd   : > { %6837 = vst [vmem:[#allocation19_spill] sm:$0xff] %v5486_v44  ;;  %v1224_v46 = vsel %vm1222_vm11, %v1223_v37, %v5466_v52  ;;  %v1489_v4 = vsub.s32 32, %v1488_v33  ;;  %v6746_v23 = vxor.u32 2147483648, %v5486_v44  ;;  %v1343_v29 = vor.u32 %v1342_v28, %v1341_v9 }
  0xfe   : > { %v1346_v35 = vshll.u32 %v1345_v53, 23  ;;  %v1225_v2 = vadd.s32 %v1224_v46, %v1220_v17  ;;  %v1059_v43 = vsel %vm1057_vm7, %v6745_v57, %v5486_v44  ;;  %v5497_v51 = vshrl.u32 %v1486_v40, 5 }
  0xff   : > { %v1491_v6 = vshll.u32 %v6834_v62, %v1488_v33  ;;  %v1492_v56 = vshrl.u32 %v6831_v48, %v1489_v4  ;;  %v1056_v24 = vsel %vm1054_vm5, %v5481_v63, %v6746_v23  ;;  %v1350_v7 = vcvt.s32.f32 %v1343_v29 }
 0x100   : > { %v1347_v27 = vor.u32 4788187, %v1346_v35  ;;  %v1226_v52 = vadd.s32 536870912, %v1225_v2  ;;  %v1060_v25 = vsel %vm1053_vm4, %v1056_v24, %v1059_v43  ;;  %v1494_v60 = vshll.u32 %v6831_v48, %v1488_v33 }
 0x101   : > { %v1495_v40 = vshrl.u32 %v6832_v47, %v1489_v4  ;;  %v1497_v15 = vshll.u32 %v6832_v47, %v1488_v33  ;;  %v1061_v9 = vsel %vm6760_vm13, nan, %v1060_v25  ;;  %v1498_v37 = vshrl.u32 %v6833_v50, %v1489_v4 }
 0x102   : > { %v1348_v12 = vand.u32 2147483647, %v1347_v27  ;;  %v5513_v17 = vshrl.u32 %v1226_v52, 30  ;;  %3686 = vperm.xlu0 %4429, %v1061_v9   ;;  %v6838_v28 = vand.u32 2147483647, %v5218_v20  ;;  %v1500_v53 = vshll.u32 %v6833_v50, %v1488_v33 }
 0x103   : > { %v1501_v46 = vshrl.u32 %v6769_v39, %v1489_v4  ;;  %v5524_v29 = vshll.u32 %v1482_v31, 8  ;;  %v1355_v43 = vsel %vm1270_vm9, %v1354_v42, %v5429_v49  ;;  %v1503_v27 = vshll.u32 %v6769_v39, %v1488_v33 }
 0x104   : > { %vm5518_vm12 = vcmp.le.f32.partialorder %v6838_v28, 0.7853982  ;;  %v1351_v35 = vmul.f32 %v1350_v7, %v1348_v12  ;;  %v1228_v24 = vshll.u32 %v5513_v17, 30  ;;  %v1493_v52 = vor.u32 %v1492_v56, %v1491_v6 }
 0x105   : > { %v1496_v25 = vor.u32 %v1495_v40, %v1494_v60  ;;  %v1502_v9 = vor.u32 %v1501_v46, %v1500_v53  ;;  %v1504_v28 = vshrl.u32 %v6835_v11, %v1489_v4  ;;  %v1499_v13 = vor.u32 %v1498_v37, %v1497_v15  ;;  %v5567_v37 = vld [vmem:[%s4571_s11 + $0x50] sm:$0xff] }
 0x106   : > { %v1352_v57 = vxor.u32 2147483648, %v1351_v35  ;;  %v5532_v23 = vsub.s32 %v1225_v2, %v1228_v24  ;;  %vm1506_vm14 = vcmp.lt.s32.totalorder %v5497_v51, 1  ;;  %v5537_v31 = vsel %vm5518_vm12, 0, %v1355_v43  ;;  %6841 = vst [vmem:[#allocation20_spill] sm:$0xff] %v5567_v37 }
 0x107   : > { %v1490_v49 = vshrl.u32 %v6834_v62, %v1489_v4  ;;  %vm1508_vm6 = vcmp.lt.s32.totalorder %v5497_v51, 3  ;;  %vm1509_vm4 = vcmp.lt.s32.totalorder %v5497_v51, 4  ;;  %v1505_v2 = vor.u32 %v1504_v28, %v1503_v27 }
 0x108   : > { %v1353_v33 = vsel %vm1270_vm9, %v1352_v57, %v1351_v35  ;;  %v1231_v42 = vsub.s32 0, %v5532_v23  ;;  %v1511_v6 = vsel %vm1509_vm4, %v1499_v13, 2102212464  ;;  %vm1507_vm5 = vcmp.lt.s32.totalorder %v5497_v51, 2 }
 0x109   : > { %v1356_v56 = vsel %vm5518_vm12, %v5218_v20, %v1353_v33  ;;  %v1514_v4 = vsel %vm1506_vm14, %v1493_v52, %v1496_v25  ;;  %v1515_v7 = vsel %vm1509_vm4, %v1502_v9, 920167782  ;;  %v5556_v57 = vand.u32 3, %v5537_v31 }
 0x10a   : > { %4463 = vcosq.f32 %v1356_v56  ;;  %vm1167_vm7 = vcmp.lt.s32.totalorder %v5318_v21, 0  ;;  %v4249_v60 = vmin.u32 %v1231_v42, %v5532_v23  ;;  %v1510_v40 = vsel %vm1506_vm14, %v1490_v49, %v1493_v52 }
 0x10b   : > { %4465 = vsinq.f32 %v1356_v56  ;;  %v1512_v15 = vsel %vm1508_vm6, %v1496_v25, %v1511_v6  ;;  %v1516_v12 = vsel %vm1508_vm6, %v1499_v13, %v1515_v7  ;;  %v1518_v46 = vsel %vm1506_vm14, %v1496_v25, %v1499_v13 }
 0x10c   : > { %v1233_v34 = vclz %v4249_v60  ;;  %v1517_v53 = vsel %vm1507_vm5, %v1514_v4, %v1516_v12  ;;  %v1519_v35 = vsel %vm1509_vm4, %v1505_v2, 1326507024  ;;  %v1251_v43 = vsub.s32 4, %v5513_v17  ;;  %v5604_v4 = vld [vmem:[%s4571_s11 + $0x68] sm:$0xff] }
 0x10d   : > { %v1520_v24 = vsel %vm1508_vm6, %v1502_v9, %v1519_v35  ;;  %v5579_v27 = vmul.u32.u64.low %v5524_v29, %v1517_v53  ;;  %v5580_v52 = vmul.u32.u64.high %v5524_v29, %v1517_v53, %v5579_v27  ;;  %v1513_v49 = vsel %vm1507_vm5, %v1510_v40, %v1512_v15 }
 0x10e   : > { %v4250_v28 = vadd.s32 4294967294, %v1233_v34  ;;  %v1521_v13 = vsel %vm1507_vm5, %v1518_v46, %v1520_v24  ;;  %v1374_v25 = vand.u32 2139095040, %v5567_v37  ;;  %vm1360_vm9 = vweird.f32 %v5218_v20 }
 0x10f   : > { %v6842_v33 = vand.u32 2147483647, %v5318_v21  ;;  %v5596_v42 = vmul.u32.u64.low %v5524_v29, %v1521_v13  ;;  %v5597_v2 = vmul.u32.u64.high %v5524_v29, %v1521_v13, %v5596_v42  ;;  %v6750_v6 = vand.u32 2147483647, %v5567_v37 }
 0x110   : > { %vm1362_vm12 = vcmp.lt.s32.totalorder %v5556_v57, 2  ;;  %v1221_v51 = vadd.s32 %v5465_v1, %v5471_v19  ;;  %vm4251_vm14 = vcmp.lt.s32.totalorder %v4250_v28, 0  ;;  %v1375_v56 = vshrl.u32 %v1374_v25, 23 }
 0x111   : > { %vm5591_vm11 = vcmp.le.f32.partialorder %v6842_v33, 0.7853982  ;;  %v1236_v7 = vsel %vm4251_vm14, 0, %v4250_v28  ;;  %v1252_v60 = vsel %vm1167_vm7, %v1251_v43, %v5513_v17  ;;  %v1529_v40 = vmul.u32 %v5524_v29, %v1513_v49 }
 0x112   : > { %v1532_v15 = vadd.s32 1, %v5580_v52  ;;  %v1237_v12 = vsub.s32 32, %v1236_v7  ;;  %v1238_v34 = vshll.u32 %v5532_v23, %v1236_v7  ;;  %v1241_v53 = vsub.s32 4294967266, %v1236_v7 }
 0x113   : > { %v4256_v46 = vadd.s32 4294967169, %v1375_v56  ;;  %vm1366_vm6 = vcmp.eq.s32.totalorder %v5556_v57, 2  ;;  %vm1531_vm4 = vc.u32 %v5597_v2, %v5579_v27  ;;  %v1378_v1 = vand.u32 8388607, %v6750_v6 }
 0x114   : > { %v1683_v19 = vand.u32 2139095040, %v5604_v4  ;;  %v5618_v17 = vpop.eup %4463  ;;  %v1239_v29 = vshrl.u32 %v1221_v51, %v1237_v12  ;;  %v1242_v35 = vadd.s32 127, %v1241_v53  ;;  %v1533_v43 = vsel %vm1531_vm4, %v1532_v15, %v5580_v52 }
 0x115   : > { %6845 = vst [vmem:[#allocation21_spill] sm:$0xff] %v5618_v17  ;;  %v1381_v24 = vadd.s32 1, %v4256_v46  ;;  %v5621_v23 = vpop.eup %4465  ;;  %vm1363_vm5 = vcmp.eq.s32.totalorder %v5556_v57, 0  ;;  %v6748_v28 = vxor.u32 2147483648, %v5618_v17  ;;  %v5627_v49 = vsel %vm5591_vm11, 0, %v1252_v60 }
 0x116   : > { %6846 = vst [vmem:[#allocation22_spill] sm:$0xff] %v5627_v49  ;;  %v1534_v13 = vadd.s32 %v1533_v43, %v1529_v40  ;;  %v6749_v25 = vxor.u32 2147483648, %v5621_v23  ;;  %v1240_v33 = vor.u32 %v1239_v29, %v1238_v34  ;;  %v1243_v42 = vshll.u32 %v1242_v35, 23 }
 0x117   : > { %vm1382_vm14 = vcmp.gt.s32.totalorder %v1381_v24, 0  ;;  %v1368_v52 = vsel %vm1366_vm6, %v6748_v28, %v5621_v23  ;;  %v1684_v7 = vshrl.u32 %v1683_v19, 23  ;;  %v1379_v12 = vor.u32 8388608, %v1378_v1 }
 0x118   : > { %v1535_v51 = vadd.s32 536870912, %v1534_v13  ;;  %v1383_v56 = vsel %vm1382_vm14, %v1381_v24, 0  ;;  %v1365_v60 = vsel %vm1363_vm5, %v5618_v17, %v6749_v25  ;;  %v1244_v15 = vor.u32 4788187, %v1243_v42 }
 0x119   : > { %v1247_v40 = vcvt.s32.f32 %v1240_v33  ;;  %v1369_v34 = vsel %vm1362_vm12, %v1365_v60, %v1368_v52  ;;  %v1385_v46 = vand.u32 31, %v1383_v56  ;;  %v5645_v43 = vand.u32 3, %v5627_v49 }
 0x11a   : > { %v5640_v53 = vshrl.u32 %v1535_v51, 30  ;;  %v1370_v29 = vsel %vm1360_vm9, nan, %v1369_v34  ;;  %v1245_v35 = vand.u32 2147483647, %v1244_v15  ;;  %v4268_v1 = vadd.s32 4294967169, %v1684_v7 }
 0x11b   : > { %3701 = vperm.xlu1 %4430, %v1370_v29   ;;  %v1386_v24 = vsub.s32 32, %v1385_v46  ;;  %v1388_v57 = vshll.u32 %v6834_v62, %v1385_v46  ;;  %v1391_v52 = vshll.u32 %v6831_v48, %v1385_v46  ;;  %v5651_v51 = vshll.u32 %v1379_v12, 8 }
 0x11c   : > { %v1537_v19 = vshll.u32 %v5640_v53, 30  ;;  %v1248_v42 = vmul.f32 %v1247_v40, %v1245_v35  ;;  %v1384_v15 = vshrl.u32 %v1383_v56, 5  ;;  %v1394_v29 = vshll.u32 %v6832_v47, %v1385_v46 }
 0x11d   : > { %v1389_v34 = vshrl.u32 %v6831_v48, %v1386_v24  ;;  %v1392_v25 = vshrl.u32 %v6832_v47, %v1386_v24  ;;  %v1395_v6 = vshrl.u32 %v6833_v50, %v1386_v24  ;;  %v1397_v7 = vshll.u32 %v6833_v50, %v1385_v46 }
 0x11e   : > { %v5653_v60 = vsub.s32 %v1534_v13, %v1537_v19  ;;  %v1249_v28 = vxor.u32 2147483648, %v1248_v42  ;;  %v1387_v35 = vshrl.u32 %v6834_v62, %v1386_v24  ;;  %v1398_v12 = vshrl.u32 %v6769_v39, %v1386_v24 }
 0x11f   : > { %v1690_v13 = vadd.s32 1, %v4268_v1  ;;  %v1390_v19 = vor.u32 %v1389_v34, %v1388_v57  ;;  %v1393_v33 = vor.u32 %v1392_v25, %v1391_v52  ;;  %v1400_v63 = vshll.u32 %v6769_v39, %v1385_v46 }
 0x120   : > { %v1540_v40 = vsub.s32 0, %v5653_v60  ;;  %v1250_v56 = vsel %vm1167_vm7, %v1249_v28, %v1248_v42  ;;  %v1396_v20 = vor.u32 %v1395_v6, %v1394_v29  ;;  %vm1403_vm12 = vcmp.lt.s32.totalorder %v1384_v15, 1 }
 0x121   : > { %v1253_v44 = vsel %vm5591_vm11, %v5318_v21, %v1250_v56  ;;  %v1399_v45 = vor.u32 %v1398_v12, %v1397_v7  ;;  %v1401_v41 = vshrl.u32 %v6835_v11, %v1386_v24  ;;  %vm1404_vm6 = vcmp.lt.s32.totalorder %v1384_v15, 2 }
 0x122   : > { %v4261_v49 = vmin.u32 %v1540_v40, %v5653_v60  ;;  %4467 = vcosq.f32 %v1253_v44  ;;  %vm1405_vm7 = vcmp.lt.s32.totalorder %v1384_v15, 3  ;;  %vm1406_vm4 = vcmp.lt.s32.totalorder %v1384_v15, 4 }
 0x123   : > { %4469 = vsinq.f32 %v1253_v44  ;;  %v1402_v28 = vor.u32 %v1401_v41, %v1400_v63  ;;  %v1407_v25 = vsel %vm1403_vm12, %v1387_v35, %v1390_v19  ;;  %v1408_v46 = vsel %vm1406_vm4, %v1396_v20, 2102212464 }
 0x124   : > { %v1542_v1 = vclz %v4261_v49  ;;  %v1411_v9 = vsel %vm1403_vm12, %v1390_v19, %v1393_v33  ;;  %vm1260_vm11 = vcmp.eq.s32.totalorder %v5645_v43, 0  ;;  %v1409_v6 = vsel %vm1405_vm7, %v1393_v33, %v1408_v46 }
 0x125   : > { %v1412_v57 = vsel %vm1406_vm4, %v1399_v45, 920167782  ;;  %v1415_v52 = vsel %vm1403_vm12, %v1393_v33, %v1396_v20  ;;  %vm1259_vm5 = vcmp.lt.s32.totalorder %v5645_v43, 2  ;;  %v1530_v44 = vadd.s32 %v5579_v27, %v5597_v2 }
 0x126   : > { %v4262_v42 = vadd.s32 4294967294, %v1542_v1  ;;  %v1413_v41 = vsel %vm1405_vm7, %v1396_v20, %v1412_v57  ;;  %v1416_v63 = vsel %vm1406_vm4, %v1402_v28, 1326507024  ;;  %vm1691_vm14 = vcmp.gt.s32.totalorder %v1690_v13, 0 }
 0x127   : > { %vm6795_vm13 = vweird.f32 %v5318_v21  ;;  %v1410_v49 = vsel %vm1404_vm6, %v1407_v25, %v1409_v6  ;;  %v1414_v24 = vsel %vm1404_vm6, %v1411_v9, %v1413_v41  ;;  %v1417_v34 = vsel %vm1405_vm7, %v1399_v45, %v1416_v63 }
 0x128   : > { %vm4263_vm0 = vcmp.lt.s32.totalorder %v4262_v42, 0  ;;  %v1418_v33 = vsel %vm1404_vm6, %v1415_v52, %v1417_v34  ;;  %v5686_v7 = vmul.u32.u64.low %v5651_v51, %v1414_v24  ;;  %v5687_v40 = vmul.u32.u64.high %v5651_v51, %v1414_v24, %v5686_v7 }
 0x129   : > { %v1545_v29 = vsel %vm4263_vm0, 0, %v4262_v42  ;;  %v1692_v35 = vsel %vm1691_vm14, %v1690_v13, 0  ;;  %vm1263_vm12 = vcmp.eq.s32.totalorder %v5645_v43, 2  ;;  %vm1476_vm0 = vcmp.lt.s32.totalorder %v5395_v22, 0 }
 0x12a   : > { %v1546_v20 = vsub.s32 32, %v1545_v29  ;;  %v1547_v27 = vshll.u32 %v5653_v60, %v1545_v29  ;;  %v1550_v2 = vsub.s32 4294967266, %v1545_v29  ;;  %v1694_v45 = vand.u32 31, %v1692_v35 }
 0x12b   : > { %v5693_v12 = vmul.u32.u64.low %v5651_v51, %v1418_v33  ;;  %v5694_v56 = vmul.u32.u64.high %v5651_v51, %v1418_v33, %v5693_v12  ;;  %v1560_v1 = vsub.s32 4, %v5640_v53  ;;  %v6847_v28 = vand.u32 2147483647, %v5604_v4 }
 0x12c   : > { %v1548_v15 = vshrl.u32 %v1530_v44, %v1546_v20  ;;  %v1551_v19 = vadd.s32 127, %v1550_v2  ;;  %v5700_v46 = vpop.eup %4467  ;;  %v1426_v60 = vmul.u32 %v5651_v51, %v1410_v49  ;;  %v1429_v13 = vadd.s32 1, %v5687_v40 }
 0x12d   : > { %v1687_v25 = vand.u32 8388607, %v6847_v28  ;;  %6848 = vst [vmem:[#allocation23_spill] sm:$0xff] %v5700_v46  ;;  %v5704_v9 = vshrl.u32 %v1692_v35, 5  ;;  %v1695_v42 = vsub.s32 32, %v1694_v45  ;;  %v5706_v6 = vpop.eup %4469  ;;  %v6762_v57 = vxor.u32 2147483648, %v5700_v46 }
 0x12e   : > { %6849 = vst [vmem:[#allocation24_spill] sm:$0xff] %v5706_v6  ;;  %v6850_v52 = vand.u32 2147483647, %v5395_v22  ;;  %v1549_v41 = vor.u32 %v1548_v15, %v1547_v27  ;;  %v1552_v63 = vshll.u32 %v1551_v19, 23  ;;  %v1697_v24 = vshll.u32 %v6834_v62, %v1694_v45 }
 0x12f   : > { %v6763_v51 = vxor.u32 2147483648, %v5706_v6  ;;  %vm1428_vm7 = vc.u32 %v5694_v56, %v5686_v7  ;;  %v1700_v49 = vshll.u32 %v6831_v48, %v1694_v45  ;;  %v1703_v34 = vshll.u32 %v6832_v47, %v1694_v45 }
 0x130   : > { %vm5711_vm6 = vcmp.le.f32.partialorder %v6850_v52, 0.7853982  ;;  %v1265_v29 = vsel %vm1263_vm12, %v6762_v57, %v5706_v6  ;;  %v1553_v33 = vor.u32 4788187, %v1552_v63  ;;  %v1556_v20 = vcvt.s32.f32 %v1549_v41 }
 0x131   : > { %v1430_v27 = vsel %vm1428_vm7, %v1429_v13, %v5687_v40  ;;  %v1262_v2 = vsel %vm1260_vm11, %v5700_v46, %v6763_v51  ;;  %v1698_v12 = vshrl.u32 %v6831_v48, %v1695_v42  ;;  %v1701_v15 = vshrl.u32 %v6832_v47, %v1695_v42 }
 0x132   : > { %v1431_v35 = vadd.s32 %v1430_v27, %v1426_v60  ;;  %v1266_v19 = vsel %vm1259_vm5, %v1262_v2, %v1265_v29  ;;  %v1554_v28 = vand.u32 2147483647, %v1553_v33  ;;  %v1704_v52 = vshrl.u32 %v6833_v50, %v1695_v42 }
 0x133   : > { %v1706_v41 = vshll.u32 %v6833_v50, %v1694_v45  ;;  %v1267_v40 = vsel %vm6795_vm13, nan, %v1266_v19  ;;  %v1688_v63 = vor.u32 8388608, %v1687_v25  ;;  %v1699_v57 = vor.u32 %v1698_v12, %v1697_v24 }
 0x134   : > { %v1432_v13 = vadd.s32 536870912, %v1431_v35  ;;  %3696 = vperm.xlu0 %4429, %v1267_v40   ;;  %v1557_v60 = vmul.f32 %v1556_v20, %v1554_v28  ;;  %v1702_v27 = vor.u32 %v1701_v15, %v1700_v49  ;;  %v1707_v51 = vshrl.u32 %v6769_v39, %v1695_v42 }
 0x135   : > { %v1709_v46 = vshll.u32 %v6769_v39, %v1694_v45  ;;  %v1561_v43 = vsel %vm1476_vm0, %v1560_v1, %v5640_v53  ;;  %v1710_v33 = vshrl.u32 %v6835_v11, %v1695_v42  ;;  %vm1712_vm4 = vcmp.lt.s32.totalorder %v5704_v9, 1 }
 0x136   : > { %v1433_v29 = vshrl.u32 %v1432_v13, 30  ;;  %v1558_v2 = vxor.u32 2147483648, %v1557_v60  ;;  %v1705_v19 = vor.u32 %v1704_v52, %v1703_v34  ;;  %v1708_v25 = vor.u32 %v1707_v51, %v1706_v41  ;;  %v5785_v13 = vld [vmem:[%s4571_s11 + $0x60] sm:$0xff] }
 0x137   : > { %vm1715_vm11 = vcmp.lt.s32.totalorder %v5704_v9, 4  ;;  %vm1713_vm5 = vcmp.lt.s32.totalorder %v5704_v9, 2  ;;  %vm1714_vm14 = vcmp.lt.s32.totalorder %v5704_v9, 3  ;;  %v5750_v45 = vshll.u32 %v1688_v63, 8 }
 0x138   : > { %v1434_v24 = vshll.u32 %v1433_v29, 30  ;;  %v1559_v53 = vsel %vm1476_vm0, %v1558_v2, %v1557_v60  ;;  %v1711_v1 = vor.u32 %v1710_v33, %v1709_v46  ;;  %v1720_v49 = vsel %vm1712_vm4, %v1699_v57, %v1702_v27 }
 0x139   : > { %v1721_v51 = vsel %vm1715_vm11, %v1708_v25, 920167782  ;;  %v1562_v34 = vsel %vm5711_vm6, %v5395_v22, %v1559_v53  ;;  %v1696_v12 = vshrl.u32 %v6834_v62, %v1695_v42  ;;  %v5766_v15 = vsel %vm5711_vm6, 0, %v1561_v43 }
 0x13a   : > { %v5761_v20 = vsub.s32 %v1431_v35, %v1434_v24  ;;  %4471 = vcosq.f32 %v1562_v34  ;;  %v1717_v46 = vsel %vm1715_vm11, %v1705_v19, 2102212464  ;;  %v1722_v28 = vsel %vm1714_vm14, %v1705_v19, %v1721_v51  ;;  %v5806_v51 = vld [vmem:[%s4571_s11 + $0x78] sm:$0xff] }
 0x13b   : > { %4473 = vsinq.f32 %v1562_v34  ;;  %v1723_v35 = vsel %vm1713_vm5, %v1720_v49, %v1722_v28  ;;  %v1724_v42 = vsel %vm1712_vm4, %v1702_v27, %v1705_v19  ;;  %v1725_v44 = vsel %vm1715_vm11, %v1711_v1, 1326507024 }
 0x13c   : > { %v1437_v52 = vsub.s32 0, %v5761_v20  ;;  %v5780_v41 = vmul.u32.u64.low %v5750_v45, %v1723_v35  ;;  %v5781_v40 = vmul.u32.u64.high %v5750_v45, %v1723_v35, %v5780_v41  ;;  %v1567_v63 = vand.u32 3, %v5766_v15 }
 0x13d   : > { %v1716_v43 = vsel %vm1712_vm4, %v1696_v12, %v1699_v57  ;;  %v1718_v33 = vsel %vm1714_vm14, %v1702_v27, %v1717_v46  ;;  %v1726_v2 = vsel %vm1714_vm14, %v1708_v25, %v1725_v44  ;;  %vm1566_vm12 = vweird.f32 %v5395_v22 }
 0x13e   : > { %v4257_v60 = vmin.u32 %v1437_v52, %v5761_v20  ;;  %v6853_v19 = vand.u32 2147483647, %v5567_v37  ;;  %v1457_v1 = vsub.s32 4, %v1433_v29  ;;  %v1727_v49 = vsel %vm1713_vm5, %v1724_v42, %v1726_v2 }
 0x13f   : > { %v1580_v57 = vand.u32 2139095040, %v5785_v13  ;;  %v1719_v27 = vsel %vm1713_vm5, %v1716_v43, %v1718_v33  ;;  %v5811_v25 = vmul.u32.u64.low %v5750_v45, %v1727_v49  ;;  %v5812_v34 = vmul.u32.u64.high %v5750_v45, %v1727_v49, %v5811_v25 }
 0x140   : > { %vm5798_vm0 = vcmp.le.f32.partialorder %v6853_v19, 0.7853982  ;;  %v1439_v53 = vclz %v4257_v60  ;;  %v6768_v12 = vand.u32 2147483647, %v5785_v13  ;;  %vm1568_vm6 = vcmp.lt.s32.totalorder %v1567_v63, 2 }
 0x141   : > { %vm1373_vm7 = vcmp.lt.s32.totalorder %v5567_v37, 0  ;;  %v1581_v28 = vshrl.u32 %v1580_v57, 23  ;;  %vm1569_vm4 = vcmp.eq.s32.totalorder %v1567_v63, 0  ;;  %vm1572_vm11 = vcmp.eq.s32.totalorder %v1567_v63, 2 }
 0x142   : > { %v4258_v46 = vadd.s32 4294967294, %v1439_v53  ;;  %v1738_v52 = vadd.s32 1, %v5781_v40  ;;  %v1889_v35 = vand.u32 2139095040, %v5806_v51  ;;  %v1427_v9 = vadd.s32 %v5686_v7, %v5694_v56 }
 0x143   : > { %v1735_v42 = vmul.u32 %v5750_v45, %v1719_v27  ;;  %v4264_v44 = vadd.s32 4294967169, %v1581_v28  ;;  %v1458_v33 = vsel %vm1373_vm7, %v1457_v1, %v1433_v29  ;;  %vm1737_vm14 = vc.u32 %v5812_v34, %v5780_v41 }
 0x144   : > { %vm4259_vm5 = vcmp.lt.s32.totalorder %v4258_v46, 0  ;;  %v5821_v60 = vpop.eup %4471  ;;  %v1584_v2 = vand.u32 8388607, %v6768_v12  ;;  %v1739_v57 = vsel %vm1737_vm14, %v1738_v52, %v5781_v40  ;;  %v1890_v29 = vshrl.u32 %v1889_v35, 23 }
 0x145   : > { %6856 = vst [vmem:[#allocation25_spill] sm:$0xff] %v5821_v60  ;;  %v1442_v43 = vsel %vm4259_vm5, 0, %v4258_v46  ;;  %v5829_v19 = vpop.eup %4473  ;;  %v6766_v7 = vxor.u32 2147483648, %v5821_v60  ;;  %v1587_v27 = vadd.s32 1, %v4264_v44  ;;  %v1740_v28 = vadd.s32 %v1739_v57, %v1735_v42 }
 0x146   : > { %6857 = vst [vmem:[#allocation26_spill] sm:$0xff] %v5829_v19  ;;  %v1443_v56 = vsub.s32 32, %v1442_v43  ;;  %v1444_v45 = vshll.u32 %v5761_v20, %v1442_v43  ;;  %v1447_v53 = vsub.s32 4294967266, %v1442_v43  ;;  %v6767_v49 = vxor.u32 2147483648, %v5829_v19 }
 0x147   : > { %v1574_v1 = vsel %vm1572_vm11, %v6766_v7, %v5829_v19  ;;  %v5845_v43 = vsel %vm5798_vm0, 0, %v1458_v33  ;;  %vm1588_vm5 = vcmp.gt.s32.totalorder %v1587_v27, 0  ;;  %v1741_v44 = vadd.s32 536870912, %v1740_v28 }
 0x148   : > { %v1445_v25 = vshrl.u32 %v1427_v9, %v1443_v56  ;;  %v1448_v46 = vadd.s32 127, %v1447_v53  ;;  %v1571_v20 = vsel %vm1569_vm4, %v5821_v60, %v6767_v49  ;;  %6858 = vst [vmem:[#allocation27_spill] sm:$0xff] %v5845_v43  ;;  %v1585_v56 = vor.u32 8388608, %v1584_v2 }
 0x149   : > { %v1575_v40 = vsel %vm1568_vm6, %v1571_v20, %v1574_v1  ;;  %v1589_v42 = vsel %vm1588_vm5, %v1587_v27, 0  ;;  %v4276_v53 = vadd.s32 4294967169, %v1890_v29  ;;  %v5850_v49 = vshrl.u32 %v1741_v44, 30 }
 0x14a   : > { %v1446_v52 = vor.u32 %v1445_v25, %v1444_v45  ;;  %v1449_v35 = vshll.u32 %v1448_v46, 23  ;;  %v1576_v9 = vsel %vm1566_vm12, nan, %v1575_v40  ;;  %v5853_v33 = vand.u32 3, %v5845_v43 }
 0x14b   : > { %3711 = vperm.xlu1 %4430, %v1576_v9   ;;  %v1591_v12 = vand.u32 31, %v1589_v42  ;;  %v1736_v45 = vadd.s32 %v5780_v41, %v5812_v34  ;;  %v1743_v1 = vshll.u32 %v5850_v49, 30  ;;  %v6776_v25 = vand.u32 2147483647, %v5806_v51 }
 0x14c   : > { %v1450_v57 = vor.u32 4788187, %v1449_v35  ;;  %v1453_v7 = vcvt.s32.f32 %v1446_v52  ;;  %v5860_v29 = vshll.u32 %v1585_v56, 8  ;;  %v1896_v46 = vadd.s32 1, %v4276_v53 }
 0x14d   : > { %v1592_v2 = vsub.s32 32, %v1591_v12  ;;  %v1594_v27 = vshll.u32 %v6834_v62, %v1591_v12  ;;  %v5862_v40 = vsub.s32 %v1740_v28, %v1743_v1  ;;  %v1590_v52 = vshrl.u32 %v1589_v42, 5 }
 0x14e   : > { %v1451_v63 = vand.u32 2147483647, %v1450_v57  ;;  %v1597_v35 = vshll.u32 %v6831_v48, %v1591_v12  ;;  %v1600_v34 = vshll.u32 %v6832_v47, %v1591_v12  ;;  %v1603_v9 = vshll.u32 %v6833_v50, %v1591_v12 }
 0x14f   : > { %v1595_v44 = vshrl.u32 %v6831_v48, %v1592_v2  ;;  %v1598_v41 = vshrl.u32 %v6832_v47, %v1592_v2  ;;  %v1746_v39 = vsub.s32 0, %v5862_v40  ;;  %v1601_v56 = vshrl.u32 %v6833_v50, %v1592_v2 }
 0x150   : > { %v1454_v20 = vmul.f32 %v1453_v7, %v1451_v63  ;;  %v5873_v7 = vand.u32 8388607, %v6776_v25  ;;  %v1593_v28 = vshrl.u32 %v6834_v62, %v1592_v2  ;;  %v6859_v53 = vmov 920167782  }
 0x151   : > { %v1596_v42 = vor.u32 %v1595_v44, %v1594_v27  ;;  %v1604_v63 = vshrl.u32 %v6859_v53, %v1592_v2  ;;  %vm1897_vm6 = vcmp.gt.s32.totalorder %v1896_v46, 0  ;;  %v4269_v21 = vmin.u32 %v1746_v39, %v5862_v40 }
 0x152   : > { %v1455_v57 = vxor.u32 2147483648, %v1454_v20  ;;  %v1599_v6 = vor.u32 %v1598_v41, %v1597_v35  ;;  %v1606_v43 = vshll.u32 %v6859_v53, %v1591_v12  ;;  %v1602_v25 = vor.u32 %v1601_v56, %v1600_v34 }
 0x153   : > { %v1605_v60 = vor.u32 %v1604_v63, %v1603_v9  ;;  %vm1609_vm4 = vcmp.lt.s32.totalorder %v1590_v52, 1  ;;  %v1748_v27 = vclz %v4269_v21  ;;  %v1607_v44 = vshrl.u32 %v6835_v11, %v1592_v2 }
 0x154   : > { %v1456_v1 = vsel %vm1373_vm7, %v1455_v57, %v1454_v20  ;;  %vm1610_vm11 = vcmp.lt.s32.totalorder %v1590_v52, 2  ;;  %vm1611_vm14 = vcmp.lt.s32.totalorder %v1590_v52, 3  ;;  %vm1612_vm7 = vcmp.lt.s32.totalorder %v1590_v52, 4 }
 0x155   : > { %v1459_v22 = vsel %vm5798_vm0, %v5567_v37, %v1456_v1  ;;  %v1613_v20 = vsel %vm1609_vm4, %v1593_v28, %v1596_v42  ;;  %v4270_v39 = vadd.s32 4294967294, %v1748_v27  ;;  %v1608_v35 = vor.u32 %v1607_v44, %v1606_v43 }
 0x156   : > { %4475 = vcosq.f32 %v1459_v22  ;;  %v1614_v41 = vsel %vm1612_vm7, %v1602_v25, 2102212464  ;;  %v1617_v12 = vsel %vm1609_vm4, %v1596_v42, %v1599_v6  ;;  %v1618_v24 = vsel %vm1612_vm7, %v1605_v60, 920167782 }
 0x157   : > { %4477 = vsinq.f32 %v1459_v22  ;;  %v1615_v57 = vsel %vm1611_vm14, %v1599_v6, %v1614_v41  ;;  %v1621_v1 = vsel %vm1609_vm4, %v1599_v6, %v1602_v25  ;;  %v1894_v34 = vor.u32 8388608, %v5873_v7 }
 0x158   : > { %vm4271_vm0 = vcmp.lt.s32.totalorder %v4270_v39, 0  ;;  %v1619_v21 = vsel %vm1611_vm14, %v1602_v25, %v1618_v24  ;;  %v1622_v9 = vsel %vm1612_vm7, %v1608_v35, 1326507024  ;;  %v1898_v2 = vsel %vm1897_vm6, %v1896_v46, 0 }
 0x159   : > { %v1751_v22 = vsel %vm4271_vm0, 0, %v4270_v39  ;;  %v1616_v56 = vsel %vm1610_vm11, %v1613_v20, %v1615_v57  ;;  %v1620_v28 = vsel %vm1610_vm11, %v1617_v12, %v1619_v21  ;;  %v1623_v43 = vsel %vm1611_vm14, %v1605_v60, %v1622_v9 }
 0x15a   : > { %v1752_v42 = vsub.s32 32, %v1751_v22  ;;  %v1753_v63 = vshll.u32 %v5862_v40, %v1751_v22  ;;  %v1756_v27 = vsub.s32 4294967266, %v1751_v22  ;;  %v1624_v6 = vsel %vm1610_vm11, %v1621_v1, %v1623_v43 }
 0x15b   : > { %v5895_v7 = vmul.u32.u64.low %v5860_v29, %v1624_v6  ;;  %v5896_v44 = vmul.u32.u64.high %v5860_v29, %v1624_v6, %v5895_v7  ;;  %v5899_v25 = vmul.u32.u64.low %v5860_v29, %v1620_v28  ;;  %v5900_v46 = vmul.u32.u64.high %v5860_v29, %v1620_v28, %v5899_v25 }
 0x15c   : > { %vm6784_vm5 = vweird.f32 %v5567_v37  ;;  %v1754_v20 = vshrl.u32 %v1736_v45, %v1752_v42  ;;  %v1757_v39 = vadd.s32 127, %v1756_v27  ;;  %v1900_v60 = vand.u32 31, %v1898_v2 }
 0x15d   : > { %vm1465_vm6 = vcmp.lt.s32.totalorder %v5853_v33, 2  ;;  %vm1466_vm4 = vcmp.eq.s32.totalorder %v5853_v33, 0  ;;  %vm1469_vm11 = vcmp.eq.s32.totalorder %v5853_v33, 2  ;;  %vm1682_vm14 = vcmp.lt.s32.totalorder %v5604_v4, 0 }
 0x15e   : > { %v6861_v52 = vand.u32 2147483647, %v5604_v4  ;;  %v1755_v41 = vor.u32 %v1754_v20, %v1753_v63  ;;  %v1758_v45 = vshll.u32 %v1757_v39, 23  ;;  %v1632_v12 = vmul.u32 %v5860_v29, %v1616_v56 }
 0x15f   : > { %v1901_v57 = vsub.s32 32, %v1900_v60  ;;  %vm1634_vm0 = vc.u32 %v5896_v44, %v5899_v25  ;;  %v1635_v21 = vadd.s32 1, %v5900_v46  ;;  %v5923_v9 = vshll.u32 %v1894_v34, 8 }
 0x160   : > { %v5908_v40 = vpop.eup %4475  ;;  %vm5912_vm7 = vcmp.le.f32.partialorder %v6861_v52, 0.7853982  ;;  %v1759_v28 = vor.u32 4788187, %v1758_v45  ;;  %v1762_v43 = vcvt.s32.f32 %v1755_v41  ;;  %v1903_v42 = vshll.u32 %v6834_v62, %v1900_v60 }
 0x161   : > { %6860 = vst [vmem:[#allocation28_spill] sm:$0xff] %v5908_v40  ;;  %v5917_v24 = vpop.eup %4477  ;;  %v6779_v1 = vxor.u32 2147483648, %v5908_v40  ;;  %v1636_v56 = vsel %vm1634_vm0, %v1635_v21, %v5900_v46  ;;  %v1904_v63 = vshrl.u32 %v6831_v48, %v1901_v57  ;;  %v1906_v34 = vshll.u32 %v6831_v48, %v1900_v60 }
 0x162   : > { %6864 = vst [vmem:[#allocation29_spill] sm:$0xff] %v5917_v24  ;;  %v6782_v22 = vxor.u32 2147483648, %v5917_v24  ;;  %v1760_v6 = vand.u32 2147483647, %v1759_v28  ;;  %v1637_v7 = vadd.s32 %v1636_v56, %v1632_v12  ;;  %v1907_v20 = vshrl.u32 %v6832_v47, %v1901_v57 }
 0x163   : > { %v1471_v29 = vsel %vm1469_vm11, %v6779_v1, %v5917_v24  ;;  %v1766_v52 = vsub.s32 4, %v5850_v49  ;;  %v1899_v46 = vshrl.u32 %v1898_v2, 5  ;;  %v1909_v41 = vshll.u32 %v6832_v47, %v1900_v60 }
 0x164   : > { %v1468_v27 = vsel %vm1466_vm4, %v5908_v40, %v6782_v22  ;;  %v1763_v21 = vmul.f32 %v1762_v43, %v1760_v6  ;;  %v1638_v1 = vadd.s32 536870912, %v1637_v7  ;;  %v1910_v24 = vshrl.u32 %v6833_v50, %v1901_v57  ;;  %v5949_v22 = vld [vmem:[%s4571_s11 + $0x70] sm:$0xff]  ;;  %s6402_s11 = scalar_lea.vmem %s6702_s8, %s4210_s30 }
 0x165   : > { %v1472_v39 = vsel %vm1465_vm6, %v1468_v27, %v1471_v29  ;;  %v1905_v12 = vor.u32 %v1904_v63, %v1903_v42  ;;  %v1912_v28 = vshll.u32 %v6833_v50, %v1900_v60  ;;  %v1913_v33 = vshrl.u32 %v6859_v53, %v1901_v57 }
 0x166   : > { %v1473_v45 = vsel %vm6784_vm5, nan, %v1472_v39  ;;  %v1915_v29 = vshll.u32 %v6859_v53, %v1900_v60  ;;  %v1764_v2 = vxor.u32 2147483648, %v1763_v21  ;;  %v5954_v56 = vshrl.u32 %v1638_v1, 30 }
 0x167   : > { %3706 = vperm.xlu0 %4429, %v1473_v45   ;;  %v1908_v27 = vor.u32 %v1907_v20, %v1906_v34  ;;  %v1916_v39 = vshrl.u32 %v6835_v11, %v1901_v57  ;;  %v1767_v43 = vsel %vm1682_vm14, %v1766_v52, %v5850_v49  ;;  %v1914_v6 = vor.u32 %v1913_v33, %v1912_v28 }
 0x168   : > { %vm1918_vm6 = vcmp.lt.s32.totalorder %v1899_v46, 1  ;;  %v1786_v42 = vand.u32 2139095040, %v5949_v22  ;;  %v1765_v63 = vsel %vm1682_vm14, %v1764_v2, %v1763_v21  ;;  %v1640_v45 = vshll.u32 %v5954_v56, 30 }
 0x169   : > { %v1911_v60 = vor.u32 %v1910_v24, %v1909_v41  ;;  %vm1921_vm4 = vcmp.lt.s32.totalorder %v1899_v46, 4  ;;  %v1768_v1 = vsel %vm5912_vm7, %v5604_v4, %v1765_v63  ;;  %v1902_v34 = vshrl.u32 %v6834_v62, %v1901_v57 }
 0x16a   : > { %v1917_v20 = vor.u32 %v1916_v39, %v1915_v29  ;;  %vm1920_vm11 = vcmp.lt.s32.totalorder %v1899_v46, 3  ;;  %4479 = vcosq.f32 %v1768_v1  ;;  %v1641_v49 = vsub.s32 %v1637_v7, %v1640_v45 }
 0x16b   : > { %vm1919_vm0 = vcmp.lt.s32.totalorder %v1899_v46, 2  ;;  %v1926_v52 = vsel %vm1918_vm6, %v1905_v12, %v1908_v27  ;;  %v5971_v21 = vsel %vm5912_vm7, 0, %v1767_v43  ;;  %4481 = vsinq.f32 %v1768_v1 }
 0x16c   : > { %v1923_v24 = vsel %vm1921_vm4, %v1911_v60, 2102212464  ;;  %v1927_v41 = vsel %vm1921_vm4, %v1914_v6, 920167782  ;;  %v1643_v28 = vsub.s32 0, %v1641_v49  ;;  %v1930_v29 = vsel %vm1918_vm6, %v1908_v27, %v1911_v60 }
 0x16d   : > { %v1928_v33 = vsel %vm1920_vm11, %v1911_v60, %v1927_v41  ;;  %v1931_v7 = vsel %vm1921_vm4, %v1917_v20, 1326507024  ;;  %v1787_v2 = vshrl.u32 %v1786_v42, 23  ;;  %v1773_v39 = vand.u32 3, %v5971_v21 }
 0x16e   : > { %v1929_v57 = vsel %vm1919_vm0, %v1926_v52, %v1928_v33  ;;  %v4265_v35 = vmin.u32 %v1643_v28, %v1641_v49  ;;  %v1922_v43 = vsel %vm1918_vm6, %v1902_v34, %v1905_v12  ;;  %v1924_v63 = vsel %vm1920_vm11, %v1908_v27, %v1923_v24 }
 0x16f   : > { %v1932_v45 = vsel %vm1920_vm11, %v1914_v6, %v1931_v7  ;;  %v5984_v1 = vmul.u32.u64.low %v5923_v9, %v1929_v57  ;;  %v5985_v37 = vmul.u32.u64.high %v5923_v9, %v1929_v57, %v5984_v1  ;;  %v4272_v52 = vadd.s32 4294967169, %v1787_v2 }
 0x170   : > { %v1645_v41 = vclz %v4265_v35  ;;  %v1933_v60 = vsel %vm1919_vm0, %v1930_v29, %v1932_v45  ;;  %v1925_v42 = vsel %vm1919_vm0, %v1922_v43, %v1924_v63  ;;  %vm1772_vm14 = vweird.f32 %v5604_v4 }
 0x171   : > { %v5991_v20 = vmul.u32.u64.low %v5923_v9, %v1933_v60  ;;  %v5992_v28 = vmul.u32.u64.high %v5923_v9, %v1933_v60, %v5991_v20  ;;  %v1793_v12 = vadd.s32 1, %v4272_v52  ;;  %v6786_v6 = vand.u32 2147483647, %v5949_v22 }
 0x172   : > { %v4266_v27 = vadd.s32 4294967294, %v1645_v41  ;;  %vm1774_vm7 = vcmp.lt.s32.totalorder %v1773_v39, 2  ;;  %vm1778_vm6 = vcmp.eq.s32.totalorder %v1773_v39, 2  ;;  %v1944_v34 = vadd.s32 1, %v5985_v37 }
 0x173   : > { %vm1794_vm4 = vcmp.gt.s32.totalorder %v1793_v12, 0  ;;  %v1633_v46 = vadd.s32 %v5899_v25, %v5896_v44  ;;  %v1941_v33 = vmul.u32 %v5923_v9, %v1925_v42  ;;  %vm1775_vm0 = vcmp.eq.s32.totalorder %v1773_v39, 0 }
 0x174   : > { %v5997_v24 = vpop.eup %4479  ;;  %vm4267_vm11 = vcmp.lt.s32.totalorder %v4266_v27, 0  ;;  %v1795_v57 = vsel %vm1794_vm4, %v1793_v12, 0  ;;  %vm1943_vm5 = vc.u32 %v5992_v28, %v5984_v1  ;;  %v1790_v9 = vand.u32 8388607, %v6786_v6 }
 0x175   : > { %v6002_v29 = vpop.eup %4481  ;;  %v6785_v7 = vxor.u32 2147483648, %v5997_v24  ;;  %v1648_v2 = vsel %vm4267_vm11, 0, %v4266_v27  ;;  %v1945_v25 = vsel %vm1943_vm5, %v1944_v34, %v5985_v37  ;;  %v1797_v52 = vand.u32 31, %v1795_v57 }
 0x176   : > { %v6787_v35 = vxor.u32 2147483648, %v6002_v29  ;;  %v1649_v43 = vsub.s32 32, %v1648_v2  ;;  %v1650_v63 = vshll.u32 %v1641_v49, %v1648_v2  ;;  %v1653_v45 = vsub.s32 4294967266, %v1648_v2 }
 0x177   : > { %v1780_v44 = vsel %vm1778_vm6, %v6785_v7, %v6002_v29  ;;  %v1946_v20 = vadd.s32 %v1945_v25, %v1941_v33  ;;  %vm1579_vm4 = vcmp.lt.s32.totalorder %v5785_v13, 0  ;;  %v1798_v12 = vsub.s32 32, %v1797_v52 }
 0x178   : > { %v1777_v41 = vsel %vm1775_vm0, %v5997_v24, %v6787_v35  ;;  %v1651_v60 = vshrl.u32 %v1633_v46, %v1649_v43  ;;  %v1654_v42 = vadd.s32 127, %v1653_v45  ;;  %v1800_v27 = vshll.u32 %v6834_v62, %v1797_v52 }
 0x179   : > { %v1781_v49 = vsel %vm1774_vm7, %v1777_v41, %v1780_v44  ;;  %v1947_v7 = vadd.s32 536870912, %v1946_v20  ;;  %v1791_v6 = vor.u32 8388608, %v1790_v9  ;;  %v1801_v35 = vshrl.u32 %v6831_v48, %v1798_v12 }
 0x17a   : > { %v1782_v37 = vsel %vm1772_vm14, nan, %v1781_v49  ;;  %v1652_v34 = vor.u32 %v1651_v60, %v1650_v63  ;;  %v1655_v2 = vshll.u32 %v1654_v42, 23  ;;  %v1803_v46 = vshll.u32 %v6831_v48, %v1797_v52 }
 0x17b   : > { %3721 = vperm.xlu1 %4430, %v1782_v37   ;;  %v1804_v39 = vshrl.u32 %v6832_v47, %v1798_v12  ;;  %v6026_v45 = vshrl.u32 %v1947_v7, 30  ;;  %v1796_v44 = vshrl.u32 %v1795_v57, 5  ;;  %v1806_v25 = vshll.u32 %v6832_v47, %v1797_v52 }
 0x17c   : > { %v1656_v33 = vor.u32 4788187, %v1655_v2  ;;  %v1659_v43 = vcvt.s32.f32 %v1652_v34  ;;  %v1807_v41 = vshrl.u32 %v6833_v50, %v1798_v12  ;;  %v1809_v63 = vshll.u32 %v6833_v50, %v1797_v52 }
 0x17d   : > { %v1810_v60 = vshrl.u32 %v6859_v53, %v1798_v12  ;;  %v6865_v9 = vand.u32 2147483647, %v5785_v13  ;;  %v1949_v49 = vshll.u32 %v6026_v45, 30  ;;  %v1802_v7 = vor.u32 %v1801_v35, %v1800_v27 }
 0x17e   : > { %v1657_v48 = vand.u32 2147483647, %v1656_v33  ;;  %v1805_v37 = vor.u32 %v1804_v39, %v1803_v46  ;;  %v1812_v47 = vshll.u32 %v6859_v53, %v1797_v52  ;;  %v1813_v34 = vshrl.u32 %v6835_v11, %v1798_v12 }
 0x17f   : > { %vm6034_vm5 = vcmp.le.f32.partialorder %v6865_v9, 0.7853982  ;;  %v1811_v57 = vor.u32 %v1810_v60, %v1809_v63  ;;  %v1663_v50 = vsub.s32 4, %v5954_v56  ;;  %v1950_v40 = vsub.s32 %v1946_v20, %v1949_v49 }
 0x180   : > { %v1660_v2 = vmul.f32 %v1659_v43, %v1657_v48  ;;  %vm1815_vm7 = vcmp.lt.s32.totalorder %v1796_v44, 1  ;;  %v1799_v9 = vshrl.u32 %v6834_v62, %v1798_v12  ;;  %v1808_v19 = vor.u32 %v1807_v41, %v1806_v25 }
 0x181   : > { %vm1818_vm6 = vcmp.lt.s32.totalorder %v1796_v44, 4  ;;  %v1831_v26 = vshll.u32 %v1791_v6, 8  ;;  %v1952_v17 = vsub.s32 0, %v1950_v40  ;;  %vm1816_vm11 = vcmp.lt.s32.totalorder %v1796_v44, 2 }
 0x182   : > { %v1661_v33 = vxor.u32 2147483648, %v1660_v2  ;;  %vm1817_vm0 = vcmp.lt.s32.totalorder %v1796_v44, 3  ;;  %v1814_v35 = vor.u32 %v1813_v34, %v1812_v47  ;;  %v1820_v27 = vsel %vm1818_vm6, %v1808_v19, 2102212464 }
 0x183   : > { %v1823_v53 = vsel %vm1815_vm7, %v1802_v7, %v1805_v37  ;;  %v1824_v11 = vsel %vm1818_vm6, %v1811_v57, 920167782  ;;  %v1664_v62 = vsel %vm1579_vm4, %v1663_v50, %v5954_v56  ;;  %v4277_v20 = vmin.u32 %v1952_v17, %v1950_v40 }
 0x184   : > { %v1662_v52 = vsel %vm1579_vm4, %v1661_v33, %v1660_v2  ;;  %v1819_v12 = vsel %vm1815_vm7, %v1799_v9, %v1802_v7  ;;  %v1825_v46 = vsel %vm1817_vm0, %v1808_v19, %v1824_v11  ;;  %v1827_v39 = vsel %vm1815_vm7, %v1805_v37, %v1808_v19 }
 0x185   : > { %v1665_v6 = vsel %vm6034_vm5, %v5785_v13, %v1662_v52  ;;  %v1954_v43 = vclz %v4277_v20  ;;  %v1821_v25 = vsel %vm1817_vm0, %v1805_v37, %v1820_v27  ;;  %v1826_v41 = vsel %vm1816_vm11, %v1823_v53, %v1825_v46 }
 0x186   : > { %4483 = vcosq.f32 %v1665_v6  ;;  %v1828_v56 = vsel %vm1818_vm6, %v1814_v35, 1326507024  ;;  %v6060_v17 = vmul.u32.u64.low %v1831_v26, %v1826_v41  ;;  %v6061_v63 = vmul.u32.u64.high %v1831_v26, %v1826_v41, %v6060_v17 }
 0x187   : > { %4485 = vsinq.f32 %v1665_v6  ;;  %v6066_v60 = vsel %vm6034_vm5, 0, %v1664_v62  ;;  %v4278_v48 = vadd.s32 4294967294, %v1954_v43  ;;  %v1829_v19 = vsel %vm1817_vm0, %v1811_v57, %v1828_v56 }
 0x188   : > { %v1822_v49 = vsel %vm1816_vm11, %v1819_v12, %v1821_v25  ;;  %v1830_v7 = vsel %vm1816_vm11, %v1827_v39, %v1829_v19  ;;  %v1942_v37 = vadd.s32 %v5984_v1, %v5992_v28  ;;  %v1670_v2 = vand.u32 3, %v6066_v60 }
 0x189   : > { %vm4279_vm4 = vcmp.lt.s32.totalorder %v4278_v48, 0  ;;  %v6073_v47 = vmul.u32.u64.low %v1831_v26, %v1830_v7  ;;  %v6074_v34 = vmul.u32.u64.high %v1831_v26, %v1830_v7, %v6073_v47  ;;  %v1841_v42 = vadd.s32 1, %v6061_v63 }
 0x18a   : > { %v1957_v50 = vsel %vm4279_vm4, 0, %v4278_v48  ;;  %v1838_v57 = vmul.u32 %v1831_v26, %v1822_v49  ;;  %vm1675_vm7 = vcmp.eq.s32.totalorder %v1670_v2, 2  ;;  %vm1671_vm6 = vcmp.lt.s32.totalorder %v1670_v2, 2 }
 0x18b   : > { %v1958_v9 = vsub.s32 32, %v1957_v50  ;;  %v1959_v33 = vshll.u32 %v1950_v40, %v1957_v50  ;;  %v1962_v35 = vsub.s32 4294967266, %v1957_v50  ;;  %vm1840_vm5 = vc.u32 %v6074_v34, %v6060_v17 }
 0x18c   : > { %v1842_v1 = vsel %vm1840_vm5, %v1841_v42, %v6061_v63  ;;  %vm1672_vm11 = vcmp.eq.s32.totalorder %v1670_v2, 0  ;;  %vm1669_vm0 = vweird.f32 %v5785_v13  ;;  %vm1888_vm4 = vcmp.lt.s32.totalorder %v5806_v51, 0 }
 0x18d   : > { %v1960_v27 = vshrl.u32 %v1942_v37, %v1958_v9  ;;  %v1963_v53 = vadd.s32 127, %v1962_v35  ;;  %v1843_v52 = vadd.s32 %v1842_v1, %v1838_v57  ;;  %v1972_v19 = vsub.s32 4, %v6026_v45 }
 0x18e   : > { %v6868_v49 = vand.u32 2147483647, %v5806_v51  ;;  %v2186_v47 = vadd.s32 3, %v5022_v18  ;;  %v2394_v57 = vadd.s32 3, %v4917_v8  ;;  %v6869_v8 = vxor.u32 2147483648, %v5079_v3 }
 0x18f   : > { %v1961_v44 = vor.u32 %v1960_v27, %v1959_v33  ;;  %v1964_v11 = vshll.u32 %v1963_v53, 23  ;;  %v1844_v12 = vadd.s32 536870912, %v1843_v52  ;;  %v1973_v42 = vsel %vm1888_vm4, %v1972_v19, %v6026_v45 }
 0x190   : > { %v6081_v28 = vpop.eup %4483  ;;  %vm1887_vm5 = vcmp.le.f32.partialorder %v6868_v49, 0.7853982  ;;  %v2187_v35 = vand.u32 3, %v2186_v47  ;;  %v2395_v18 = vand.u32 3, %v2394_v57  ;;  %v1839_v45 = vadd.s32 %v6060_v17, %v6074_v34 }
 0x191   : > { %v6083_v62 = vpop.eup %4485  ;;  %v1676_v40 = vxor.u32 2147483648, %v6081_v28  ;;  %v1965_v20 = vor.u32 4788187, %v1964_v11  ;;  %v1968_v6 = vcvt.s32.f32 %v1961_v44  ;;  %v6094_v25 = vshrl.u32 %v1844_v12, 30 }
 0x192   : > { %v1673_v26 = vxor.u32 2147483648, %v6083_v62  ;;  %v6107_v27 = vsel %vm1887_vm5, 0, %v1973_v42  ;;  %v2602_v11 = vadd.s32 3, %v5129_v38  ;;  %vm2188_vm13 = vcmp.lt.s32.totalorder %v2187_v35, 2 }
 0x193   : > { %v1677_v46 = vsel %vm1675_vm7, %v1676_v40, %v6083_v62  ;;  %v1966_v43 = vand.u32 2147483647, %v1965_v20  ;;  %v1846_v48 = vshll.u32 %v6094_v25, 30  ;;  %vm2189_vm7 = vcmp.eq.s32.totalorder %v2187_v35, 0 }
 0x194   : > { %v1674_v39 = vsel %vm1672_vm11, %v6081_v28, %v1673_v26  ;;  %v1979_v44 = vand.u32 3, %v6107_v27  ;;  %v2191_v20 = vsel %vm2189_vm7, %v5075_v16, %v6869_v8  ;;  %v2082_v17 = vadd.s32 3, %v4799_v14 }
 0x195   : > { %v1678_v41 = vsel %vm1671_vm6, %v1674_v39, %v1677_v46  ;;  %v1969_v63 = vmul.f32 %v1968_v6, %v1966_v43  ;;  %v1847_v37 = vsub.s32 %v1843_v52, %v1846_v48  ;;  %vm2192_vm6 = vcmp.eq.s32.totalorder %v2187_v35, 2 }
 0x196   : > { %v1679_v56 = vsel %vm1669_vm0, nan, %v1678_v41  ;;  %v6870_v39 = vxor.u32 2147483648, %v5075_v16  ;;  %vm1984_vm15 = vcmp.eq.s32.totalorder %v1979_v44, 2  ;;  %vm2397_vm2 = vcmp.eq.s32.totalorder %v2395_v18, 0 }
 0x197   : > { %3716 = vperm.xlu0 %4429, %v1679_v56   ;;  %v1970_v7 = vxor.u32 2147483648, %v1969_v63  ;;  %v1849_v50 = vsub.s32 0, %v1847_v37  ;;  %v2603_v56 = vand.u32 3, %v2602_v11  ;;  %vm1981_vm7 = vcmp.eq.s32.totalorder %v1979_v44, 0 }
 0x198   : > { %v2194_v43 = vsel %vm2192_vm6, %v6870_v39, %v5079_v3  ;;  %v2810_v16 = vadd.s32 3, %v5325_v10  ;;  %vm2396_vm6 = vcmp.lt.s32.totalorder %v2395_v18, 2  ;;  %v6871_v47 = vxor.u32 2147483648, %v5002_v58 }
 0x199   : > { %v1971_v2 = vsel %vm1888_vm4, %v1970_v7, %v1969_v63  ;;  %v4273_v33 = vmin.u32 %v1849_v50, %v1847_v37  ;;  %vm1978_vm4 = vweird.f32 %v5806_v51  ;;  %v2195_v19 = vsel %vm2188_vm13, %v2191_v20, %v2194_v43 }
 0x19a   : > { %v1974_v9 = vsel %vm1887_vm5, %v5806_v51, %v1971_v2  ;;  %vm1980_vm5 = vcmp.lt.s32.totalorder %v1979_v44, 2  ;;  %v2399_v2 = vsel %vm2397_vm2, %v4991_v30, %v6871_v47  ;;  %v6872_v10 = vxor.u32 2147483648, %v4991_v30 }
 0x19b   : > { %4487 = vcosq.f32 %v1974_v9  ;;  %v1851_v53 = vclz %v4273_v33  ;;  %vm2605_vm13 = vcmp.eq.s32.totalorder %v2603_v56, 0  ;;  %v2811_v57 = vand.u32 3, %v2810_v16 }
 0x19c   : > { %4489 = vsinq.f32 %v1974_v9  ;;  %vm1785_vm2 = vcmp.lt.s32.totalorder %v5949_v22, 0  ;;  %v3434_v11 = vadd.s32 3, %v5971_v21  ;;  %v6874_v20 = vxor.u32 2147483648, %v5176_v55 }
 0x19d   : > { %v4274_v1 = vadd.s32 4294967294, %v1851_v53  ;;  %v3018_v53 = vadd.s32 3, %v5537_v31  ;;  %v2290_v43 = vadd.s32 3, %v4748_v36  ;;  %v6878_v5 = vxor.u32 2147483648, %v5410_v32 }
 0x19f   : > { %vm4275_vm11 = vcmp.lt.s32.totalorder %v4274_v1, 0  ;;  %v3019_v21 = vand.u32 3, %v3018_v53 }
 0x1a0   : > { %v1854_v52 = vsel %vm4275_vm11, 0, %v4274_v1  ;;  %vm2400_vm11 = vcmp.eq.s32.totalorder %v2395_v18, 2  ;;  %v6169_v18 = vand.u32 3, %v2082_v17  ;;  %v3435_v17 = vand.u32 3, %v3434_v11 }
 0x1a1   : > { %v1855_v6 = vsub.s32 32, %v1854_v52  ;;  %v1856_v12 = vshll.u32 %v1847_v37, %v1854_v52  ;;  %v1859_v46 = vsub.s32 4294967266, %v1854_v52  ;;  %v1869_v37 = vsub.s32 4, %v6094_v25 }
 0x1a2   : > { %v2402_v50 = vsel %vm2400_vm11, %v6872_v10, %v5002_v58  ;;  %v2196_v58 = vsel %vm536_vm10, nan, %v2195_v19  ;;  %v6873_v52 = vxor.u32 2147483648, %v5182_v61  ;;  %vm2813_vm11 = vcmp.eq.s32.totalorder %v2811_v57, 0 }
 0x1a3   : > { %v1857_v34 = vshrl.u32 %v1839_v45, %v1855_v6  ;;  %v1860_v41 = vadd.s32 127, %v1859_v46  ;;  %v1870_v45 = vsel %vm1785_vm2, %v1869_v37, %v6094_v25  ;;  %v2403_v44 = vsel %vm2396_vm6, %v2399_v2, %v2402_v50 }
 0x1a4   : > { %v2607_v8 = vsel %vm2605_vm13, %v5176_v55, %v6873_v52  ;;  %v3330_v6 = vadd.s32 3, %v6066_v60  ;;  %v2404_v39 = vsel %vm742_vm3, nan, %v2403_v44  ;;  %v3226_v60 = vadd.s32 3, %v5766_v15 }
 0x1a5   : > { %v6121_v38 = vpop.eup %4487  ;;  %v1858_v49 = vor.u32 %v1857_v34, %v1856_v12  ;;  %v1861_v14 = vshll.u32 %v1860_v41, 23  ;;  %v6875_v12 = vand.u32 2147483647, %v5949_v22  ;;  %vm2812_vm6 = vcmp.lt.s32.totalorder %v2811_v57, 2 }
 0x1a6   : > { %v6123_v63 = vpop.eup %4489  ;;  %v1985_v48 = vxor.u32 2147483648, %v6121_v38  ;;  %v2815_v41 = vsel %vm2813_vm11, %v5404_v59, %v6878_v5  ;;  %v3331_v36 = vand.u32 3, %v3330_v6  ;;  %vm3021_vm3 = vcmp.eq.s32.totalorder %v3019_v21, 0 }
 0x1a7   : > { %v1982_v3 = vxor.u32 2147483648, %v6123_v63  ;;  %v1862_v9 = vor.u32 4788187, %v1861_v14  ;;  %v1865_v33 = vcvt.s32.f32 %v1858_v49  ;;  %vm6165_vm10 = vcmp.le.f32.partialorder %v6875_v12, 0.7853982 }
 0x1a8   : > { %v1986_v7 = vsel %vm1984_vm15, %v1985_v48, %v6123_v63  ;;  %vm2608_vm15 = vcmp.eq.s32.totalorder %v2603_v56, 2  ;;  %v6176_v55 = vsel %vm6165_vm10, 0, %v1870_v45  ;;  %vm3436_vm13 = vcmp.lt.s32.totalorder %v3435_v17, 2 }
 0x1a9   : > { %v1983_v42 = vsel %vm1981_vm7, %v6121_v38, %v1982_v3  ;;  %v1863_v30 = vand.u32 2147483647, %v1862_v9  ;;  %v2610_v54 = vsel %vm2608_vm15, %v6874_v20, %v5182_v61  ;;  %vm2816_vm7 = vcmp.eq.s32.totalorder %v2811_v57, 2 }
 0x1aa   : > { %v1987_v35 = vsel %vm1980_vm5, %v1983_v42, %v1986_v7  ;;  %vm2604_vm5 = vcmp.lt.s32.totalorder %v2603_v56, 2  ;;  %v6879_v56 = vxor.u32 2147483648, %v5404_v59  ;;  %vm3024_vm15 = vcmp.eq.s32.totalorder %v3019_v21, 2 }
 0x1ab   : > { %v1988_v1 = vsel %vm1978_vm4, nan, %v1987_v35  ;;  %v1866_v31 = vmul.f32 %v1865_v33, %v1863_v30  ;;  %v2611_v61 = vsel %vm2604_vm5, %v2607_v8, %v2610_v54  ;;  %vm3437_vm5 = vcmp.eq.s32.totalorder %v3435_v17, 0  ;;  %v6889_v30 = vld [vmem:[#allocation25_spill] sm:$0xff]  ;;  %v6893_v8 = vld [vmem:[#allocation7_spill] sm:$0xff] }
 0x1ac   : > { %3731 = vperm.xlu1 %4430, %v1988_v1   ;;  %v2818_v16 = vsel %vm2816_vm7, %v6879_v56, %v5410_v32  ;;  %v3227_v15 = vand.u32 3, %v3226_v60  ;;  %v6880_v49 = vxor.u32 2147483648, %v6002_v29  ;;  %v6881_v7 = vxor.u32 2147483648, %v5997_v24  ;;  %v6887_v1 = vld [vmem:[#allocation26_spill] sm:$0xff] }
 0x1ad   : > { %v1867_v46 = vxor.u32 2147483648, %v1866_v31  ;;  %v2612_v59 = vsel %vm948_vm1, nan, %v2611_v61  ;;  %vm3333_vm11 = vcmp.eq.s32.totalorder %v3331_v36, 0  ;;  %v2819_v47 = vsel %vm2812_vm6, %v2815_v41, %v2818_v16  ;;  %v6898_v16 = vld [vmem:[#allocation5_spill] sm:$0xff] }
 0x1ae   : > { %v3439_v14 = vsel %vm3437_vm5, %v5997_v24, %v6880_v49  ;;  %v3335_v10 = vsel %vm3333_vm11, %v6081_v28, %v1673_v26  ;;  %vm3336_vm7 = vcmp.eq.s32.totalorder %v3331_v36, 2  ;;  %vm3020_vm5 = vcmp.lt.s32.totalorder %v3019_v21, 2  ;;  %v6900_v49 = vld [vmem:[#allocation4_spill] sm:$0xff] }
 0x1af   : > { %v1868_v34 = vsel %vm1785_vm2, %v1867_v46, %v1866_v31  ;;  %vm3440_vm2 = vcmp.eq.s32.totalorder %v3435_v17, 2  ;;  %v6882_v24 = vxor.u32 2147483648, %v5621_v23  ;;  %v3338_v4 = vsel %vm3336_vm7, %v1676_v40, %v6083_v62  ;;  %v6886_v62 = vld [vmem:[#allocation12_spill] sm:$0xff]  ;;  %v6896_v17 = vld [vmem:[#allocation17_spill] sm:$0xff] }
 0x1b0   : > { %3785 = vperm.xlu1 %4430, %v2196_v58   ;;  %v1871_v19 = vsel %vm6165_vm10, %v5949_v22, %v1868_v34  ;;  %v3442_v37 = vsel %vm3440_vm2, %v6881_v7, %v6002_v29  ;;  %vm3332_vm10 = vcmp.lt.s32.totalorder %v3331_v36, 2  ;;  %v6883_v29 = vld [vmem:[#allocation21_spill] sm:$0xff]  ;;  %vm3229_vm1 = vcmp.eq.s32.totalorder %v3227_v15, 0  ;;  %v6891_v31 = vld [vmem:[#allocation8_spill] sm:$0xff] }
 0x1b1   : > { %4491 = vcosq.f32 %v1871_v19  ;;  %v3443_v32 = vsel %vm3436_vm13, %v3439_v14, %v3442_v37  ;;  %v3023_v0 = vsel %vm3021_vm3, %v6883_v29, %v6882_v24  ;;  %v6884_v50 = vxor.u32 2147483648, %v6883_v29  ;;  %v6903_v29 = vld [vmem:[#allocation3_spill] sm:$0xff] }
 0x1b2   : > { %4493 = vsinq.f32 %v1871_v19  ;;  %v6202_v2 = vsel %vm1772_vm14, nan, %v3443_v32  ;;  %vm3232_vm14 = vcmp.eq.s32.totalorder %v3227_v15, 2  ;;  %v3339_v26 = vsel %vm3332_vm10, %v3335_v10, %v3338_v4  ;;  %v6902_v10 = vld [vmem:[#allocation22_spill] sm:$0xff] }
 0x1b3   : > { %v3026_v42 = vsel %vm3024_vm15, %v6884_v50, %v5621_v23  ;;  %v3642_v9 = vadd.s32 3, %v6107_v27  ;;  %v1876_v33 = vand.u32 3, %v6176_v55  ;;  %v2820_v57 = vsel %vm1154_vm8, nan, %v2819_v47  ;;  %v6905_v4 = vld [vmem:[#allocation14_spill] sm:$0xff] }
 0x1b4   : > { %3795 = vperm.xlu1 %4430, %v2404_v39   ;;  %v6224_v53 = vsel %vm1669_vm0, nan, %v3339_v26  ;;  %vm2085_vm6 = vcmp.eq.s32.totalorder %v6169_v18, 0  ;;  %vm2088_vm3 = vcmp.eq.s32.totalorder %v6169_v18, 2  ;;  %v2291_v23 = vand.u32 3, %v2290_v43 }
 0x1b5   : > { %v3027_v28 = vsel %vm3020_vm5, %v3023_v0, %v3026_v42  ;;  %v2498_v40 = vadd.s32 3, %v6886_v62  ;;  %vm3228_vm13 = vcmp.lt.s32.totalorder %v3227_v15, 2  ;;  %v6888_v27 = vxor.u32 2147483648, %v6887_v1 }
 0x1b6   : > { %v6890_v45 = vxor.u32 2147483648, %v6889_v30  ;;  %vm1875_vm8 = vweird.f32 %v5949_v22  ;;  %vm2084_vm0 = vcmp.lt.s32.totalorder %v6169_v18, 2  ;;  %v3643_v13 = vand.u32 3, %v3642_v9 }
 0x1b7   : > { %v3231_v58 = vsel %vm3229_vm1, %v6889_v30, %v6888_v27  ;;  %vm1881_vm15 = vcmp.eq.s32.totalorder %v1876_v33, 2  ;;  %v6892_v52 = vxor.u32 2147483648, %v6891_v31  ;;  %v6894_v54 = vxor.u32 2147483648, %v6893_v8  ;;  %v6914_v27 = vld [vmem:[#allocation18_spill] sm:$0xff] }
 0x1b8   : > { %3805 = vperm.xlu1 %4430, %v2612_v59   ;;  %v3234_v44 = vsel %vm3232_vm14, %v6890_v45, %v6887_v1  ;;  %v3028_v25 = vsel %vm1360_vm9, nan, %v3027_v28  ;;  %vm1878_vm2 = vcmp.eq.s32.totalorder %v1876_v33, 0  ;;  %vm2293_vm10 = vcmp.eq.s32.totalorder %v2291_v23, 0 }
 0x1b9   : > { %v2087_v20 = vsel %vm2085_vm6, %v6893_v8, %v6892_v52  ;;  %v2090_v6 = vsel %vm2088_vm3, %v6894_v54, %v6891_v31  ;;  %v3235_v39 = vsel %vm3228_vm13, %v3231_v58, %v3234_v44  ;;  %vm1877_vm11 = vcmp.lt.s32.totalorder %v1876_v33, 2  ;;  %v6909_v33 = vld [vmem:[#allocation27_spill] sm:$0xff]  ;;  %v6916_v44 = vld [vmem:[#allocation6_spill] sm:$0xff]  ;;  %v6918_v31 = vld [vmem:[#allocation24_spill] sm:$0xff] }
 0x1ba   : > { %vm2296_vm7 = vcmp.eq.s32.totalorder %v2291_v23, 2  ;;  %v2499_v61 = vand.u32 3, %v2498_v40  ;;  %v2706_v34 = vadd.s32 3, %v6896_v17  ;;  %vm3645_vm9 = vcmp.eq.s32.totalorder %v3643_v13, 0  ;;  %v6912_v40 = vld [vmem:[#allocation19_spill] sm:$0xff] }
 0x1bb   : > { %v6237_v11 = vpop.eup %4491  ;;  %vm3648_vm5 = vcmp.eq.s32.totalorder %v3643_v13, 2  ;;  %v2091_v41 = vsel %vm2084_vm0, %v2087_v20, %v2090_v6  ;;  %v3236_v19 = vsel %vm1566_vm12, nan, %v3235_v39  ;;  %vm2292_vm1 = vcmp.lt.s32.totalorder %v2291_v23, 2  ;;  %v6920_v8 = vld [vmem:[#allocation23_spill] sm:$0xff] }
 0x1bc   : > { %3815 = vperm.xlu1 %4430, %v2820_v57   ;;  %v6247_v21 = vpop.eup %4493  ;;  %v1882_v46 = vxor.u32 2147483648, %v6237_v11  ;;  %v6899_v15 = vxor.u32 2147483648, %v6898_v16  ;;  %v6901_v7 = vxor.u32 2147483648, %v6900_v49  ;;  %vm3644_vm14 = vcmp.lt.s32.totalorder %v3643_v13, 2  ;;  %v6910_v57 = vld [vmem:[#allocation2_spill] sm:$0xff] }
 0x1bd   : > { %v1879_v43 = vxor.u32 2147483648, %v6247_v21  ;;  %v3647_v18 = vsel %vm3645_vm9, %v6121_v38, %v1982_v3  ;;  %v3650_v32 = vsel %vm3648_vm5, %v1985_v48, %v6123_v63  ;;  %vm2501_vm12 = vcmp.eq.s32.totalorder %v2499_v61, 0  ;;  %v6907_v3 = vld [vmem:[#allocation13_spill] sm:$0xff] }
 0x1be   : > { %v1883_v60 = vsel %vm1881_vm15, %v1882_v46, %v6247_v21  ;;  %v2295_v14 = vsel %vm2293_vm10, %v6900_v49, %v6899_v15  ;;  %v2298_v37 = vsel %vm2296_vm7, %v6901_v7, %v6898_v16  ;;  %vm2504_vm6 = vcmp.eq.s32.totalorder %v2499_v61, 2 }
 0x1bf   : > { %v1880_v5 = vsel %vm1878_vm2, %v6237_v11, %v1879_v43  ;;  %v2707_v47 = vand.u32 3, %v2706_v34  ;;  %v2914_v24 = vadd.s32 3, %v6902_v10  ;;  %vm6904_vm3 = vweird.f32 %v6903_v29  ;;  %v6926_v34 = vld [vmem:[#allocation28_spill] sm:$0xff] }
 0x1c0   : > { %3825 = vperm.xlu1 %4430, %v3028_v25   ;;  %v1884_v56 = vsel %vm1877_vm11, %v1880_v5, %v1883_v60  ;;  %v2092_v0 = vsel %vm6904_vm3, nan, %v2091_v41  ;;  %v2299_v50 = vsel %vm2292_vm1, %v2295_v14, %v2298_v37  ;;  %v3651_v42 = vsel %vm3644_vm14, %v3647_v18, %v3650_v32  ;;  %v6922_v25 = vld [vmem:[#allocation10_spill] sm:$0xff]  ;;  %v6924_v60 = vld [vmem:[#allocation29_spill] sm:$0xff]  ;;  %v6329_v18 = vpop.permute.xlu1 %3666 }
 0x1c1   : > { %v1885_v59 = vsel %vm1875_vm8, nan, %v1884_v56  ;;  %vm2500_vm13 = vcmp.lt.s32.totalorder %v2499_v61, 2  ;;  %v6906_v26 = vxor.u32 2147483648, %v6905_v4  ;;  %v6908_v38 = vxor.u32 2147483648, %v6907_v3  ;;  %v6928_v56 = vld [vmem:[#allocation15_spill] sm:$0xff] }
 0x1c2   : > { %3726 = vperm.xlu0 %4429, %v1885_v59   ;;  %vm2709_vm0 = vcmp.eq.s32.totalorder %v2707_v47, 0  ;;  %vm2712_vm15 = vcmp.eq.s32.totalorder %v2707_v47, 2  ;;  %v2915_v48 = vand.u32 3, %v2914_v24  ;;  %v3122_v35 = vadd.s32 3, %v6909_v33  ;;  %v6333_v24 = vpop.permute.xlu0 %3656 }
 0x1c3   : > { %v2503_v9 = vsel %vm2501_vm12, %v6907_v3, %v6906_v26  ;;  %v2506_v63 = vsel %vm2504_vm6, %v6908_v38, %v6905_v4  ;;  %vm6911_vm2 = vweird.f32 %v6910_v57  ;;  %v3652_v28 = vsel %vm1978_vm4, nan, %v3651_v42  ;;  %v3777_v42 = vld [vmem:[%s6696_s2] sm:$0x3] }
 0x1c4   : > { %3835 = vperm.xlu1 %4430, %v3236_v19   ;;  %v2300_v23 = vsel %vm6911_vm2, nan, %v2299_v50  ;;  %v2507_v62 = vsel %vm2500_vm13, %v2503_v9, %v2506_v63  ;;  %vm2708_vm10 = vcmp.lt.s32.totalorder %v2707_v47, 2  ;;  %v6913_v1 = vxor.u32 2147483648, %v6912_v40  ;;  %v3672_v32 = vpop.permute.xlu1 %3671  ;;  %v3653_v4 = vld [vmem:[%s6695_s1] sm:$0x3] }
 0x1c5   : > { %v6915_v58 = vxor.u32 2147483648, %v6914_v27  ;;  %vm2917_vm11 = vcmp.eq.s32.totalorder %v2915_v48, 0  ;;  %vm2920_vm7 = vcmp.eq.s32.totalorder %v2915_v48, 2  ;;  %vm6917_vm9 = vweird.f32 %v6916_v44  ;;  %v3933_v63 = vld [vmem:[%s6697_s3] sm:$0x3] }
 0x1c6   : > { %3780 = vperm.xlu0 %4429, %v2092_v0   ;;  %v2711_v30 = vsel %vm2709_vm0, %v6914_v27, %v6913_v1  ;;  %v2508_v13 = vsel %vm6917_vm9, nan, %v2507_v62  ;;  %vm2916_vm4 = vcmp.lt.s32.totalorder %v2915_v48, 2  ;;  %v6919_v52 = vxor.u32 2147483648, %v6918_v31  ;;  %v6372_v57 = vld [vmem:[%s6698_s4] ss:$0 sm:$0xff] }
 0x1c7   : > { %v2714_v45 = vsel %vm2712_vm15, %v6915_v58, %v6912_v40  ;;  %v6921_v54 = vxor.u32 2147483648, %v6920_v8  ;;  %v3538_v12 = vadd.s32 3, %v6176_v55  ;;  %vm6923_vm14 = vweird.f32 %v6922_v25  ;;  %v6930_v55 = vld [vmem:[#allocation20_spill] sm:$0xff]  ;;  %v6390_v44 = vld [vmem:[%s6700_s6] ss:$0 sm:$0xff] }
 0x1c8   : > { %3845 = vperm.xlu1 %4430, %v6202_v2   ;;  %v3123_v2 = vand.u32 3, %v3122_v35  ;;  %v2715_v51 = vsel %vm2708_vm10, %v2711_v30, %v2714_v45  ;;  %v2919_v20 = vsel %vm2917_vm11, %v6920_v8, %v6919_v52  ;;  %v6925_v17 = vxor.u32 2147483648, %v6924_v60  ;;  %v3682_v47 = vpop.permute.xlu1 %3681  ;;  %v6367_v35 = vld [vmem:[%s6699_s5] ss:$0 sm:$0xff] }
 0x1c9   : > { %v2922_v6 = vsel %vm2920_vm7, %v6921_v54, %v6918_v31  ;;  %v2716_v39 = vsel %vm6923_vm14, nan, %v2715_v51  ;;  %v6927_v41 = vxor.u32 2147483648, %v6926_v34  ;;  %v3539_v19 = vand.u32 3, %v3538_v12 }
 0x1ca   : > { %3790 = vperm.xlu0 %4429, %v2300_v23   ;;  %vm3125_vm5 = vcmp.eq.s32.totalorder %v3123_v2, 0  ;;  %vm3128_vm1 = vcmp.eq.s32.totalorder %v3123_v2, 2  ;;  %v2923_v61 = vsel %vm2916_vm4, %v2919_v20, %v2922_v6  ;;  %vm3124_vm12 = vcmp.lt.s32.totalorder %v3123_v2, 2 }
 0x1cb   : > { %v3127_v5 = vsel %vm3125_vm5, %v6926_v34, %v6925_v17  ;;  %v3130_v36 = vsel %vm3128_vm1, %v6927_v41, %v6924_v60  ;;  %vm6929_vm6 = vweird.f32 %v6928_v56  ;;  %vm3541_vm3 = vcmp.eq.s32.totalorder %v3539_v19, 0 }
 0x1cc   : > { %3855 = vperm.xlu1 %4430, %v3652_v28   ;;  %v2924_v16 = vsel %vm6929_vm6, nan, %v2923_v61  ;;  %v3131_v15 = vsel %vm3124_vm12, %v3127_v5, %v3130_v36  ;;  %vm3544_vm13 = vcmp.eq.s32.totalorder %v3539_v19, 2  ;;  %vm6931_vm0 = vweird.f32 %v6930_v55  ;;  %v6331_v10 = vpop.permute.xlu1 %3691 }
 0x1cd   : > { %v3132_v49 = vsel %vm6931_vm0, nan, %v3131_v15  ;;  %vm3540_vm15 = vcmp.lt.s32.totalorder %v3539_v19, 2  ;;  %v3543_v14 = vsel %vm3541_vm3, %v6237_v11, %v1879_v43  ;;  %v3546_v7 = vsel %vm3544_vm13, %v1882_v46, %v6247_v21  ;;  %v3662_v11 = vpop.permute.xlu0 %3661 }
 0x1ce   : > { %3800 = vperm.xlu0 %4429, %v2508_v13   ;;  %v3547_v37 = vsel %vm3540_vm15, %v3543_v14, %v3546_v7  ;;  %v3735_v46 = vlaneseq  ;;  %v4018_v62 = vmul.f32 %v6372_v57, %v3662_v11  ;;  %vm4095_vm2 = vcmask 72704  }
 0x1cf   : > { %v3548_v59 = vsel %vm1875_vm8, nan, %v3547_v37  ;;  %vm3978_vm8 = vcmask 785408   ;;  %v4022_v17 = vmul.f32 %v6372_v57, %v3682_v47 }
 0x1d0   : > { %v6335_v43 = vpop.permute.xlu1 %3701  ;;  %v3736_v29 = vshrl.u32 %v3735_v46, 7 }
 0x1d2   : > { %3810 = vperm.xlu0 %4429, %v2716_v39   ;;  %v3737_v0 = vsub.s32 0, %v3736_v29  ;;  %v3741_v50 = vsub.s32 1, %v3736_v29  ;;  %v4020_v39 = vmul.f32 %v6372_v57, %v3672_v32 }
 0x1d4   : > { %v6337_v21 = vpop.permute.xlu1 %3711  ;;  %v6353_v9 = vrot.slane %v3777_v42, %v3737_v0  ;;  %v6355_v38 = vrot.slane %v3777_v42, %v3741_v50  ;;  %v6360_v48 = vrot.slane %v3653_v4, %v3737_v0  ;;  %v6362_v33 = vrot.slane %v3653_v4, %v3741_v50 }
 0x1d5   : > { %v6377_v40 = vrot.slane %v3933_v63, %v3737_v0  ;;  %v6380_v27 = vrot.slane %v3933_v63, %v3741_v50  ;;  %v4024_v63 = vmul.f32 %v6372_v57, %v6331_v10 }
 0x1d6   : > { %3820 = vperm.xlu0 %4429, %v2924_v16   ;;  %v3747_v23 = vmul.f32 %v6360_v48, %v3662_v11  ;;  %v3748_v28 = vmul.f32 %v6362_v33, %v3662_v11  ;;  %v3751_v52 = vmul.f32 %v6360_v48, %v3672_v32  ;;  %v3752_v25 = vmul.f32 %v6362_v33, %v3672_v32 }
 0x1d7   : > { %v3755_v5 = vmul.f32 %v6360_v48, %v3682_v47  ;;  %v3756_v41 = vmul.f32 %v6362_v33, %v3682_v47  ;;  %v3759_v11 = vmul.f32 %v6360_v48, %v6331_v10  ;;  %v3760_v4 = vmul.f32 %v6362_v33, %v6331_v10 }
 0x1da   : > { %3830 = vperm.xlu0 %4429, %v3132_v49  }
 0x1de   : > { %3840 = vperm.xlu0 %4429, %v6224_v53   ;;  %v6339_v53 = vpop.permute.xlu0 %3676 }
 0x1e2   : > { %3850 = vperm.xlu0 %4429, %v3548_v59   ;;  %v6349_v26 = vpop.permute.xlu0 %3686 }
 0x1e6   : > { %v6385_v2 = vpop.permute.xlu0 %3696 }
 0x1ea   : > { %v6421_v36 = vpop.permute.xlu0 %3706 }
 0x1fa   : > { %v6341_v22 = vpop.permute.xlu1 %3721 }
 0x22b   : > { %v6351_v3 = vpop.permute.xlu1 %3731 }
 0x22f   : > { %v3786_v1 = vpop.permute.xlu1 %3785 }
 0x230   : > { %v3871_v30 = vmul.f32 %v6353_v9, %v3786_v1  ;;  %v3872_v58 = vmul.f32 %v6355_v38, %v3786_v1  ;;  %v4041_v45 = vmul.f32 %v6367_v35, %v3786_v1  ;;  %v6450_v1 = vmul.f32 %v6372_v57, %v6329_v18 }
 0x232   : > { %v3903_v13 = vadd.f32 %v3871_v30, %v3747_v23  ;;  %v3904_v51 = vadd.f32 %v3872_v58, %v3748_v28  ;;  %v4057_v31 = vadd.f32 %v4041_v45, %v4018_v62  ;;  %v6444_v23 = vpop.permute.xlu0 %3716  ;;  %v6454_v30 = vmul.f32 %v6372_v57, %v6333_v24 }
 0x233   : > { %v3796_v8 = vpop.permute.xlu1 %3795  ;;  %v4026_v58 = vmul.f32 %v6372_v57, %v6335_v43  ;;  %v3763_v45 = vmul.f32 %v6360_v48, %v6335_v43 }
 0x234   : > { %v3947_v20 = vadd.f32 %v6377_v40, %v3903_v13  ;;  %v3948_v54 = vadd.f32 %v6380_v27, %v3904_v51  ;;  %v4080_v6 = vadd.f32 %v6390_v44, %v4057_v31  ;;  %v3875_v12 = vmul.f32 %v6353_v9, %v3796_v8 }
 0x235   : > { %v3876_v61 = vmul.f32 %v6355_v38, %v3796_v8  ;;  %v4043_v60 = vmul.f32 %v6367_v35, %v3796_v8  ;;  %v3764_v13 = vmul.f32 %v6362_v33, %v6335_v43  ;;  %v6477_v43 = vmul.f32 %v6372_v57, %v6349_v26 }
 0x236   : > { %3980 = vst [vmem:[%s6395_s28 + $0x10] sm:$0xff] %v3947_v20  ;;  %3981 = vst.msk [vmem:[%s6395_s28 + $0x18] sm:$0xff] %vm3978_vm8, %v3948_v54  ;;  %v3907_v34 = vadd.f32 %v3875_v12, %v3751_v52  ;;  %v6473_v12 = vmul.f32 %v6372_v57, %v6339_v53 }
 0x237   : > { %4097 = vst.msk [vmem:[%s6402_s11 + $0x8] sm:$0xff] %vm4095_vm2, %v4080_v6  ;;  %v3908_v19 = vadd.f32 %v3876_v61, %v3752_v25  ;;  %v4059_v56 = vadd.f32 %v4043_v60, %v4020_v39  ;;  %v3806_v16 = vpop.permute.xlu1 %3805  ;;  %v6483_v61 = vmul.f32 %v6360_v48, %v6329_v18 }
 0x238   : > { %v3951_v15 = vadd.f32 %v6377_v40, %v3907_v34  ;;  %v3879_v55 = vmul.f32 %v6353_v9, %v3806_v16  ;;  %v3880_v49 = vmul.f32 %v6355_v38, %v3806_v16  ;;  %v4045_v14 = vmul.f32 %v6367_v35, %v3806_v16 }
 0x239   : > { %v3952_v7 = vadd.f32 %v6380_v27, %v3908_v19  ;;  %v4082_v37 = vadd.f32 %v6390_v44, %v4059_v56  ;;  %v3746_v19 = vmul.f32 %v6362_v33, %v6333_v24  ;;  %v6496_v56 = vmul.f32 %v6360_v48, %v6339_v53 }
 0x23a   : > { %3984 = vst [vmem:[%s6395_s28 + $0x30] sm:$0xff] %v3951_v15  ;;  %v3911_v59 = vadd.f32 %v3879_v55, %v3755_v5  ;;  %v3912_v32 = vadd.f32 %v3880_v49, %v3756_v41  ;;  %v4061_v47 = vadd.f32 %v4045_v14, %v4022_v17  ;;  %v6488_v5 = vmul.f32 %v6362_v33, %v6329_v18 }
 0x23b   : > { %3985 = vst.msk [vmem:[%s6395_s28 + $0x38] sm:$0xff] %vm3978_vm8, %v3952_v7  ;;  %v3816_v46 = vpop.permute.xlu1 %3815  ;;  %v3745_v41 = vmul.f32 %v6360_v48, %v6333_v24  ;;  %v6506_v18 = vmul.f32 %v6362_v33, %v6339_v53  ;;  %v3767_v24 = vmul.f32 %v6360_v48, %v6337_v21  ;;  %v3768_v55 = vmul.f32 %v6362_v33, %v6337_v21 }
 0x23c   : > { %4099 = vst.msk [vmem:[%s6402_s11 + $0x18] sm:$0xff] %vm4095_vm2, %v4082_v37  ;;  %v3955_v29 = vadd.f32 %v6377_v40, %v3911_v59  ;;  %v3956_v0 = vadd.f32 %v6380_v27, %v3912_v32  ;;  %v4084_v50 = vadd.f32 %v6390_v44, %v4061_v47  ;;  %v3883_v42 = vmul.f32 %v6353_v9, %v3816_v46 }
 0x23d   : > { %v3884_v28 = vmul.f32 %v6355_v38, %v3816_v46  ;;  %v4047_v62 = vmul.f32 %v6367_v35, %v3816_v46  ;;  %v4028_v53 = vmul.f32 %v6372_v57, %v6337_v21  ;;  %v3771_v32 = vmul.f32 %v6360_v48, %v6341_v22 }
 0x23e   : > { %3988 = vst [vmem:[%s6395_s28 + $0x50] sm:$0xff] %v3955_v29  ;;  %3989 = vst.msk [vmem:[%s6395_s28 + $0x58] sm:$0xff] %vm3978_vm8, %v3956_v0  ;;  %v3915_v10 = vadd.f32 %v3883_v42, %v3759_v11  ;;  %v3772_v47 = vmul.f32 %v6362_v33, %v6341_v22  ;;  %v4030_v46 = vmul.f32 %v6372_v57, %v6341_v22 }
 0x23f   : > { %4101 = vst.msk [vmem:[%s6402_s11 + $0x28] sm:$0xff] %vm4095_vm2, %v4084_v50  ;;  %v3916_v51 = vadd.f32 %v3884_v28, %v3760_v4  ;;  %v4063_v31 = vadd.f32 %v4047_v62, %v4024_v63  ;;  %v3826_v52 = vpop.permute.xlu1 %3825  ;;  %v3775_v29 = vmul.f32 %v6360_v48, %v6351_v3 }
 0x240   : > { %v3959_v8 = vadd.f32 %v6377_v40, %v3915_v10  ;;  %v3887_v20 = vmul.f32 %v6353_v9, %v3826_v52  ;;  %v3888_v54 = vmul.f32 %v6355_v38, %v3826_v52  ;;  %v4049_v6 = vmul.f32 %v6367_v35, %v3826_v52 }
 0x241   : > { %v3960_v25 = vadd.f32 %v6380_v27, %v3916_v51  ;;  %v4086_v39 = vadd.f32 %v6390_v44, %v4063_v31  ;;  %v6498_v16 = vpop.permute.xlu0 %3726 }
 0x242   : > { %3992 = vst [vmem:[%s6395_s28 + $0x70] sm:$0xff] %v3959_v8  ;;  %v3919_v60 = vadd.f32 %v3887_v20, %v3763_v45  ;;  %v3920_v17 = vadd.f32 %v3888_v54, %v3764_v13  ;;  %v4065_v34 = vadd.f32 %v4049_v6, %v4026_v58  ;;  %v3776_v8 = vmul.f32 %v6362_v33, %v6351_v3 }
 0x243   : > { %3993 = vst.msk [vmem:[%s6395_s28 + $0x78] sm:$0xff] %vm3978_vm8, %v3960_v25  ;;  %v3836_v15 = vpop.permute.xlu1 %3835 }
 0x244   : > { %4103 = vst.msk [vmem:[%s6402_s11 + $0x38] sm:$0xff] %vm4095_vm2, %v4086_v39  ;;  %v3963_v49 = vadd.f32 %v6377_v40, %v3919_v60  ;;  %v3964_v14 = vadd.f32 %v6380_v27, %v3920_v17  ;;  %v4088_v7 = vadd.f32 %v6390_v44, %v4065_v34  ;;  %v3891_v37 = vmul.f32 %v6353_v9, %v3836_v15 }
 0x245   : > { %v3892_v59 = vmul.f32 %v6355_v38, %v3836_v15  ;;  %v4051_v11 = vmul.f32 %v6367_v35, %v3836_v15  ;;  %v3781_v0 = vpop.permute.xlu0 %3780 }
 0x246   : > { %3996 = vst [vmem:[%s6395_s28 + $0x90] sm:$0xff] %v3963_v49  ;;  %3997 = vst.msk [vmem:[%s6395_s28 + $0x98] sm:$0xff] %vm3978_vm8, %v3964_v14  ;;  %v3923_v21 = vadd.f32 %v3891_v37, %v3767_v24  ;;  %v3869_v4 = vmul.f32 %v6353_v9, %v3781_v0  ;;  %v3870_v63 = vmul.f32 %v6355_v38, %v3781_v0 }
 0x247   : > { %4105 = vst.msk [vmem:[%s6402_s11 + $0x48] sm:$0xff] %vm4095_vm2, %v4088_v7  ;;  %v3924_v50 = vadd.f32 %v3892_v59, %v3768_v55  ;;  %v3846_v42 = vpop.permute.xlu1 %3845  ;;  %v4040_v28 = vmul.f32 %v6367_v35, %v3781_v0  ;;  %v4067_v22 = vadd.f32 %v4051_v11, %v4028_v53  ;;  %v4032_v37 = vmul.f32 %v6372_v57, %v6351_v3 }
 0x248   : > { %v3967_v62 = vadd.f32 %v6377_v40, %v3923_v21  ;;  %v3895_v10 = vmul.f32 %v6353_v9, %v3846_v42  ;;  %v3896_v45 = vmul.f32 %v6355_v38, %v3846_v42  ;;  %v3901_v13 = vadd.f32 %v3869_v4, %v3745_v41 }
 0x249   : > { %v3968_v58 = vadd.f32 %v6380_v27, %v3924_v50  ;;  %v3902_v51 = vadd.f32 %v3870_v63, %v3746_v19  ;;  %v4056_v31 = vadd.f32 %v4040_v28, %v6454_v30  ;;  %v4090_v52 = vadd.f32 %v6390_v44, %v4067_v22  ;;  %v3791_v20 = vpop.permute.xlu0 %3790 }
 0x24a   : > { %4000 = vst [vmem:[%s6395_s28 + $0xb0] sm:$0xff] %v3967_v62  ;;  %v3927_v54 = vadd.f32 %v3895_v10, %v3771_v32  ;;  %v3928_v6 = vadd.f32 %v3896_v45, %v3772_v47  ;;  %v4053_v25 = vmul.f32 %v6367_v35, %v3846_v42  ;;  %v3945_v60 = vadd.f32 %v6377_v40, %v3901_v13 }
 0x24b   : > { %4001 = vst.msk [vmem:[%s6395_s28 + $0xb8] sm:$0xff] %vm3978_vm8, %v3968_v58  ;;  %v3856_v39 = vpop.permute.xlu1 %3855  ;;  %v3946_v30 = vadd.f32 %v6380_v27, %v3902_v51  ;;  %v4079_v17 = vadd.f32 %v6390_v44, %v4056_v31  ;;  %v3873_v34 = vmul.f32 %v6353_v9, %v3791_v20  ;;  %v3874_v41 = vmul.f32 %v6355_v38, %v3791_v20 }
 0x24c   : > { %4107 = vst.msk [vmem:[%s6402_s11 + $0x58] sm:$0xff] %vm4095_vm2, %v4090_v52  ;;  %v4042_v19 = vmul.f32 %v6367_v35, %v3791_v20  ;;  %v3971_v15 = vadd.f32 %v6377_v40, %v3927_v54  ;;  %v3972_v24 = vadd.f32 %v6380_v27, %v3928_v6  ;;  %3977 = vst [vmem:[%s6395_s28] sm:$0xff] %v3945_v60 }
 0x24d   : > { %3979 = vst.msk [vmem:[%s6395_s28 + $0x8] sm:$0xff] %vm3978_vm8, %v3946_v30  ;;  %v3905_v55 = vadd.f32 %v3873_v34, %v6483_v61  ;;  %v4069_v49 = vadd.f32 %v4053_v25, %v4030_v46  ;;  %v3899_v14 = vmul.f32 %v6353_v9, %v3856_v39  ;;  %v3900_v7 = vmul.f32 %v6355_v38, %v3856_v39  ;;  %v3801_v32 = vpop.permute.xlu0 %3800 }
 0x24e   : > { %4096 = vst.msk [vmem:[%s6402_s11] sm:$0xff] %vm4095_vm2, %v4079_v17  ;;  %v3906_v59 = vadd.f32 %v3874_v41, %v6488_v5  ;;  %v4058_v53 = vadd.f32 %v4042_v19, %v6450_v1  ;;  %4004 = vst [vmem:[%s6395_s28 + $0xd0] sm:$0xff] %v3971_v15  ;;  %v4055_v47 = vmul.f32 %v6367_v35, %v3856_v39 }
 0x24f   : > { %4005 = vst.msk [vmem:[%s6395_s28 + $0xd8] sm:$0xff] %vm3978_vm8, %v3972_v24  ;;  %v3949_v61 = vadd.f32 %v6377_v40, %v3905_v55  ;;  %v3877_v11 = vmul.f32 %v6353_v9, %v3801_v32  ;;  %v3878_v46 = vmul.f32 %v6355_v38, %v3801_v32  ;;  %v4044_v3 = vmul.f32 %v6367_v35, %v3801_v32 }
 0x250   : > { %v3950_v5 = vadd.f32 %v6380_v27, %v3906_v59  ;;  %v4081_v1 = vadd.f32 %v6390_v44, %v4058_v53  ;;  %v4092_v0 = vadd.f32 %v6390_v44, %v4069_v49  ;;  %v3931_v21 = vadd.f32 %v3899_v14, %v3775_v29 }
 0x251   : > { %3982 = vst [vmem:[%s6395_s28 + $0x20] sm:$0xff] %v3949_v61  ;;  %v3909_v50 = vadd.f32 %v3877_v11, %v6496_v56  ;;  %v3910_v42 = vadd.f32 %v3878_v46, %v6506_v18  ;;  %v4060_v4 = vadd.f32 %v4044_v3, %v6473_v12  ;;  %v3932_v63 = vadd.f32 %v3900_v7, %v3776_v8  ;;  %v3811_v29 = vpop.permute.xlu0 %3810 }
 0x252   : > { %v3757_v28 = vmul.f32 %v6360_v48, %v6349_v26  ;;  %v3758_v22 = vmul.f32 %v6362_v33, %v6349_v26  ;;  %3983 = vst.msk [vmem:[%s6395_s28 + $0x28] sm:$0xff] %vm3978_vm8, %v3950_v5  ;;  %v3975_v12 = vadd.f32 %v6377_v40, %v3931_v21  ;;  %v4071_v56 = vadd.f32 %v4055_v47, %v4032_v37 }
 0x253   : > { %4098 = vst.msk [vmem:[%s6402_s11 + $0x10] sm:$0xff] %vm4095_vm2, %v4081_v1  ;;  %4109 = vst.msk [vmem:[%s6402_s11 + $0x68] sm:$0xff] %vm4095_vm2, %v4092_v0  ;;  %v3953_v18 = vadd.f32 %v6377_v40, %v3909_v50  ;;  %v3954_v62 = vadd.f32 %v6380_v27, %v3910_v42  ;;  %v4083_v58 = vadd.f32 %v6390_v44, %v4060_v4 }
 0x254   : > { %v3881_v26 = vmul.f32 %v6353_v9, %v3811_v29  ;;  %v3882_v10 = vmul.f32 %v6355_v38, %v3811_v29  ;;  %v4046_v45 = vmul.f32 %v6367_v35, %v3811_v29  ;;  %v3976_v13 = vadd.f32 %v6380_v27, %v3932_v63  ;;  %4008 = vst [vmem:[%s6395_s28 + $0xf0] sm:$0xff] %v3975_v12 }
 0x255   : > { %v4094_v51 = vadd.f32 %v6390_v44, %v4071_v56  ;;  %v4025_v31 = vmul.f32 %v6372_v57, %v6385_v2  ;;  %3986 = vst [vmem:[%s6395_s28 + $0x40] sm:$0xff] %v3953_v18  ;;  %3987 = vst.msk [vmem:[%s6395_s28 + $0x48] sm:$0xff] %vm3978_vm8, %v3954_v62  ;;  %v3761_v8 = vmul.f32 %v6360_v48, %v6385_v2  ;;  %v3821_v25 = vpop.permute.xlu0 %3820 }
 0x256   : > { %4100 = vst.msk [vmem:[%s6402_s11 + $0x20] sm:$0xff] %vm4095_vm2, %v4083_v58  ;;  %v3913_v52 = vadd.f32 %v3881_v26, %v3757_v28  ;;  %v3762_v20 = vmul.f32 %v6362_v33, %v6385_v2  ;;  %v3914_v54 = vadd.f32 %v3882_v10, %v3758_v22  ;;  %v4062_v6 = vadd.f32 %v4046_v45, %v6477_v43 }
 0x257   : > { %4009 = vst.msk [vmem:[%s6395_s28 + $0xf8] sm:$0xff] %vm3978_vm8, %v3976_v13  ;;  %v3885_v60 = vmul.f32 %v6353_v9, %v3821_v25  ;;  %v3886_v30 = vmul.f32 %v6355_v38, %v3821_v25  ;;  %v4048_v17 = vmul.f32 %v6367_v35, %v3821_v25  ;;  %v3765_v15 = vmul.f32 %v6360_v48, %v6421_v36 }
 0x258   : > { %4111 = vst.msk [vmem:[%s6402_s11 + $0x78] sm:$0xff] %vm4095_vm2, %v4094_v51  ;;  %v3957_v39 = vadd.f32 %v6377_v40, %v3913_v52  ;;  %v3958_v2 = vadd.f32 %v6380_v27, %v3914_v54  ;;  %v4085_v34 = vadd.f32 %v6390_v44, %v4062_v6  ;;  %v3766_v37 = vmul.f32 %v6362_v33, %v6421_v36 }
 0x259   : > { %v3917_v43 = vadd.f32 %v3885_v60, %v3761_v8  ;;  %v3918_v41 = vadd.f32 %v3886_v30, %v3762_v20  ;;  %v4064_v19 = vadd.f32 %v4048_v17, %v4025_v31  ;;  %v3831_v24 = vpop.permute.xlu0 %3830  ;;  %v4027_v59 = vmul.f32 %v6372_v57, %v6421_v36 }
 0x25a   : > { %3990 = vst [vmem:[%s6395_s28 + $0x60] sm:$0xff] %v3957_v39  ;;  %3991 = vst.msk [vmem:[%s6395_s28 + $0x68] sm:$0xff] %vm3978_vm8, %v3958_v2  ;;  %v3889_v7 = vmul.f32 %v6353_v9, %v3831_v24  ;;  %v3890_v53 = vmul.f32 %v6355_v38, %v3831_v24  ;;  %v4050_v32 = vmul.f32 %v6367_v35, %v3831_v24 }
 0x25b   : > { %4102 = vst.msk [vmem:[%s6402_s11 + $0x30] sm:$0xff] %vm4095_vm2, %v4085_v34  ;;  %v3961_v55 = vadd.f32 %v6377_v40, %v3917_v43  ;;  %v3962_v49 = vadd.f32 %v6380_v27, %v3918_v41  ;;  %v4087_v14 = vadd.f32 %v6390_v44, %v4064_v19  ;;  %v3769_v47 = vmul.f32 %v6360_v48, %v6444_v23 }
 0x25c   : > { %v3921_v61 = vadd.f32 %v3889_v7, %v3765_v15  ;;  %v3770_v11 = vmul.f32 %v6362_v33, %v6444_v23  ;;  %v4029_v36 = vmul.f32 %v6372_v57, %v6444_v23  ;;  %v3922_v46 = vadd.f32 %v3890_v53, %v3766_v37 }
 0x25d   : > { %3994 = vst [vmem:[%s6395_s28 + $0x80] sm:$0xff] %v3961_v55  ;;  %3995 = vst.msk [vmem:[%s6395_s28 + $0x88] sm:$0xff] %vm3978_vm8, %v3962_v49  ;;  %v4066_v3 = vadd.f32 %v4050_v32, %v4027_v59  ;;  %v3841_v5 = vpop.permute.xlu0 %3840  ;;  %v3773_v22 = vmul.f32 %v6360_v48, %v6498_v16  ;;  %v3774_v58 = vmul.f32 %v6362_v33, %v6498_v16 }
 0x25e   : > { %4104 = vst.msk [vmem:[%s6402_s11 + $0x40] sm:$0xff] %vm4095_vm2, %v4087_v14  ;;  %v3965_v1 = vadd.f32 %v6377_v40, %v3921_v61  ;;  %v3893_v0 = vmul.f32 %v6353_v9, %v3841_v5  ;;  %v3894_v21 = vmul.f32 %v6355_v38, %v3841_v5  ;;  %v4052_v50 = vmul.f32 %v6367_v35, %v3841_v5 }
 0x25f   : > { %v3966_v42 = vadd.f32 %v6380_v27, %v3922_v46  ;;  %v4089_v4 = vadd.f32 %v6390_v44, %v4066_v3  ;;  %v4031_v48 = vmul.f32 %v6372_v57, %v6498_v16 }
 0x260   : > { %3998 = vst [vmem:[%s6395_s28 + $0xa0] sm:$0xff] %v3965_v1  ;;  %v3925_v63 = vadd.f32 %v3893_v0, %v3769_v47  ;;  %v3926_v23 = vadd.f32 %v3894_v21, %v3770_v11  ;;  %v4068_v28 = vadd.f32 %v4052_v50, %v4029_v36 }
 0x261   : > { %3999 = vst.msk [vmem:[%s6395_s28 + $0xa8] sm:$0xff] %vm3978_vm8, %v3966_v42  ;;  %v3851_v29 = vpop.permute.xlu0 %3850 }
 0x262   : > { %4106 = vst.msk [vmem:[%s6402_s11 + $0x50] sm:$0xff] %vm4095_vm2, %v4089_v4  ;;  %v3969_v12 = vadd.f32 %v6377_v40, %v3925_v63  ;;  %v3970_v56 = vadd.f32 %v6380_v27, %v3926_v23  ;;  %v4091_v18 = vadd.f32 %v6390_v44, %v4068_v28  ;;  %v3897_v62 = vmul.f32 %v6353_v9, %v3851_v29 }
 0x263   : > { %v3898_v26 = vmul.f32 %v6355_v38, %v3851_v29  ;;  %v4054_v10 = vmul.f32 %v6367_v35, %v3851_v29 }
 0x264   : > { %4002 = vst [vmem:[%s6395_s28 + $0xc0] sm:$0xff] %v3969_v12  ;;  %4003 = vst.msk [vmem:[%s6395_s28 + $0xc8] sm:$0xff] %vm3978_vm8, %v3970_v56  ;;  %v3929_v45 = vadd.f32 %v3897_v62, %v3773_v22 }
 0x265   : > { %4108 = vst.msk [vmem:[%s6402_s11 + $0x60] sm:$0xff] %vm4095_vm2, %v4091_v18  ;;  %v3930_v13 = vadd.f32 %v3898_v26, %v3774_v58  ;;  %v4070_v51 = vadd.f32 %v4054_v10, %v4031_v48 }
 0x266   : > { %v3973_v9 = vadd.f32 %v6377_v40, %v3929_v45 }
 0x267   : > { %v3974_v31 = vadd.f32 %v6380_v27, %v3930_v13  ;;  %v4093_v33 = vadd.f32 %v6390_v44, %v4070_v51 }
 0x268   : > { %4006 = vst [vmem:[%s6395_s28 + $0xe0] sm:$0xff] %v3973_v9 }
 0x269   : > { %4007 = vst.msk [vmem:[%s6395_s28 + $0xe8] sm:$0xff] %vm3978_vm8, %v3974_v31 }
 0x26a   : > { %4110 = vst.msk [vmem:[%s6402_s11 + $0x70] sm:$0xff] %vm4095_vm2, %v4093_v33 }
 0x26b PF: > { %s19_s27 = sadd.s32 1, %s4501_s27  }
 0x26c   : > { %p16_p4 = scmp.ge.s32.totalorder %s19_s27, 4  }
 0x26e   :  { %18 = sbr.rel (!%p16_p4) target bundleno = 1 (0x1), region = 90 }

</bundles_post_ra>
